<compile_context>
chip_gen: v7x
topology: tpu7x:2x2x1
jax: 0.10.0
libtpu: 0.0.40
codegen_flags: <defaults>
</compile_context>

<pallas_src>
import functools

import numpy as np
import jax
import jax.numpy as jnp
from jax.experimental import pallas as pl

# ---------------- configuration (mirrors ConvNet.__init__ args) ----------------
B = 2
IN_SIZE = (8, 8, 8)
KSIZE = 3
FILTERS = (8, 8)
MAX_POOL_SIZE = 2
MAX_POOL_EVERY = 1
BATCH_NORM_EVERY = 2
HIDDEN_DIMS = (32,)
OUT_DIM = 8
CONTRAST_DIM = 4
HIDDEN_DIMS_REG = (16,)

NPAD = 128                       # lane-dense channel / feature padding
S1 = IN_SIZE[0]                  # 8  : conv1 spatial extent
S2 = S1 // MAX_POOL_SIZE         # 4  : conv2 spatial extent (after pool1)
S3 = S2 // MAX_POOL_SIZE         # 2  : spatial extent after pool2
NOFF = KSIZE ** 3                # 27 kernel offsets
KP1 = 32                         # conv1 im2col K padded (27 -> 32)
FC_IN = S3 ** 3 * FILTERS[-1]    # 64
MROWS = 8                        # row padding for the FC / regressor stage (>= B)
NWIN = MAX_POOL_SIZE ** 3        # 8 elements per 2x2x2 pooling window


# ------------------------------ fused Pallas kernel -----------------------------
def _convnet_kernel(p1_ref, w1_ref, b1_ref, s_ref, w2_ref, b2_ref,
                    bng_ref, bnb_ref, t_ref, wfc1_ref, bfc1_ref,
                    wfc2_ref, bfc2_ref, x1_ref, wr1_ref, br1_ref,
                    wr2_ref, br2_ref, out_ref, *, batch):
    f32 = jnp.float32
    nv1 = batch * S2 ** 3          # pool1 voxels (= rows of pooled-1 activation)
    nv2 = batch * S3 ** 3          # pool2 voxels
    r2 = NWIN * nv2                # conv2 output rows (pool2-window-major ordering)

    # ---- Conv3d #1 + ReLU (im2col patches arrive pool1-window-major) ----
    c1 = jnp.dot(p1_ref[...], w1_ref[...], preferred_element_type=f32) + b1_ref[...]
    c1 = jnp.maximum(c1, 0.0)                                   # (NWIN*nv1, 128)

    # ---- MaxPool3d(2): the 8 window elements are 8 contiguous row blocks ----
    a1 = c1[0:nv1, :]
    for j in range(1, NWIN):
        a1 = jnp.maximum(a1, c1[j * nv1:(j + 1) * nv1, :])
    a1c = a1[:, :FILTERS[0]]                                    # (nv1, 8) real channels

    # ---- Conv3d #2 + ReLU: in-kernel im2col via a constant 0/1 gather matmul,
    #      then 27 small weight matmuls (one per kernel offset) ----
    g = jnp.dot(s_ref[...].astype(f32), a1c, preferred_element_type=f32)  # (27*r2, 8)
    acc = jnp.zeros((r2, NPAD), f32)
    for k in range(NOFF):
        acc = acc + jnp.dot(g[k * r2:(k + 1) * r2, :], w2_ref[k],
                            preferred_element_type=f32)
    c2 = jnp.maximum(acc + b2_ref[...], 0.0)                    # (r2, 128)

    # ---- MaxPool3d(2) ----
    p2 = c2[0:nv2, :]
    for j in range(1, NWIN):
        p2 = jnp.maximum(p2, c2[j * nv2:(j + 1) * nv2, :])      # (nv2, 128)

    # ---- BatchNorm3d (training mode: biased batch stats over batch+spatial), eps=1e-5 ----
    mu = jnp.mean(p2, axis=0, keepdims=True)
    var = jnp.mean((p2 - mu) ** 2, axis=0, keepdims=True)
    bn = (p2 - mu) * jax.lax.rsqrt(var + 1e-5) * bng_ref[...] + bnb_ref[...]
    bnc = bn[:, :FILTERS[1]]                                    # (nv2, 8)

    # ---- fully_connected: Linear(64,32)+ReLU, Linear(32,8)+ReLU
    #      (torch's (B, C, D, H, W) flatten order folded into per-spatial-slot weights) ----
    f1 = jnp.zeros((MROWS, NPAD), f32)
    for s in range(S3 ** 3):
        rows = jnp.dot(t_ref[s], bnc, preferred_element_type=f32)        # (MROWS, 8)
        f1 = f1 + jnp.dot(rows, wfc1_ref[s], preferred_element_type=f32)
    f1 = jnp.maximum(f1 + bfc1_ref[...], 0.0)
    f2 = jnp.dot(f1, wfc2_ref[...], preferred_element_type=f32) + bfc2_ref[...]
    f2 = jnp.maximum(f2, 0.0)

    # ---- regressor: cat((out, contrast)) -> Linear(12,16)+ReLU -> Linear(16,1) ----
    rin = f2 + x1_ref[...]     # contrast pre-placed in lanes [OUT_DIM, OUT_DIM+CONTRAST_DIM)
    r1 = jnp.dot(rin, wr1_ref[...], preferred_element_type=f32) + br1_ref[...]
    r1 = jnp.maximum(r1, 0.0)
    out_ref[...] = jnp.dot(r1, wr2_ref[...], preferred_element_type=f32) + br2_ref[...]


# ------------------------- wrapper-side glue (jitted, tiny) ----------------------
def _build_conv1_patches(x0):
    """im2col for conv1, rows ordered pool1-window-major:
       row = j*(B*64) + (b*64 + x2*16 + y2*4 + z2), j = xi*4 + yi*2 + zi,
       output voxel = (2*x2+xi, 2*y2+yi, 2*z2+zi); column = kx*9 + ky*3 + kz."""
    Bn = x0.shape[0]
    xp = jnp.pad(x0, ((0, 0), (1, 1), (1, 1), (1, 1)))
    cols = []
    for kx in range(KSIZE):
        for ky in range(KSIZE):
            for kz in range(KSIZE):
                sh = xp[:, kx:kx + S1, ky:ky + S1, kz:kz + S1]
                sh = sh.reshape(Bn, S2, 2, S2, 2, S2, 2)
                sh = jnp.transpose(sh, (2, 4, 6, 0, 1, 3, 5)).reshape(-1)
                cols.append(sh)
    p1 = jnp.stack(cols, axis=1)                                 # (8*Bn*64, 27)
    return jnp.pad(p1, ((0, 0), (0, KP1 - NOFF)))                # (8*Bn*64, 32)


@jax.jit
def convnet_forward(x0, x1, packed):
    """x0: (B, 8, 8, 8) stacked item[0] volumes; x1: (B, 1, contrast_dim) item[1]."""
    Bn = x0.shape[0]
    p1 = _build_conv1_patches(x0.astype(jnp.float32))
    x1p = jnp.zeros((MROWS, NPAD), jnp.float32).at[
        :Bn, OUT_DIM:OUT_DIM + CONTRAST_DIM].set(x1[:, 0, :].astype(jnp.float32))
    out = pl.pallas_call(
        functools.partial(_convnet_kernel, batch=Bn),
        out_shape=jax.ShapeDtypeStruct((MROWS, NPAD), jnp.float32),
    )(p1, packed["w1"], packed["b1"], packed["S"], packed["w2"], packed["b2"],
      packed["bn_g"], packed["bn_b"], packed["T"], packed["wfc1"], packed["bfc1"],
      packed["wfc2"], packed["bfc2"], x1p, packed["wr1"], packed["br1"],
      packed["wr2"], packed["br2"])
    return out[:Bn, 0]                                           # (B,)


# TODO(synk): fit/predict/score (host-side torch training loop) have no kernel equivalent
# and are intentionally not translated; only forward() (regressor variant) is implemented.
# TODO(synk): the classifier branch (hidden_dims_classifier) is not exercised by this config.


# ------------------------ one-time parameter / constant packing ------------------
def _build_gather_constants(Bn):
    """Constant 0/1 matrices: S gathers pool1 rows into conv2's im2col (pool2-window-major
    row order, zero rows for padding); T selects, per pooled-2 spatial slot, the batch rows."""
    nv1 = Bn * S2 ** 3
    nv2 = Bn * S3 ** 3
    r2 = NWIN * nv2
    S = np.zeros((NOFF * r2, nv1), np.float32)
    for kx in range(KSIZE):
        for ky in range(KSIZE):
            for kz in range(KSIZE):
                k = (kx * KSIZE + ky) * KSIZE + kz
                for b in range(Bn):
                    for X in range(S3):
                        for Y in range(S3):
                            for Z in range(S3):
                                for xi in range(2):
                                    for yi in range(2):
                                        for zi in range(2):
                                            x, y, z = 2 * X + xi, 2 * Y + yi, 2 * Z + zi
                                            j2 = (xi * 2 + yi) * 2 + zi
                                            s = (X * S3 + Y) * S3 + Z
                                            r = j2 * nv2 + s * Bn + b
                                            sx, sy, sz = x + kx - 1, y + ky - 1, z + kz - 1
                                            if 0 <= sx < S2 and 0 <= sy < S2 and 0 <= sz < S2:
                                                v = b * S2 ** 3 + (sx * S2 + sy) * S2 + sz
                                                S[k * r2 + r, v] = 1.0
    T = np.zeros((S3 ** 3, MROWS, nv2), np.float32)
    for s in range(S3 ** 3):
        for b in range(Bn):
            T[s, b, s * Bn + b] = 1.0
    return jnp.asarray(S, jnp.bfloat16), jnp.asarray(T, jnp.float32)


def _pad2(w, rows, cols=NPAD):
    r, c = w.shape
    return jnp.zeros((rows, cols), jnp.float32).at[:r, :c].set(w.astype(jnp.float32))


def _pad_bias(b):
    return jnp.zeros((1, NPAD), jnp.float32).at[0, :b.shape[0]].set(b.astype(jnp.float32))


def pack_params(params, batch):
    """One-time packing of weights into MXU / lane-dense layouts (hoisted out of forward)."""
    S, T = _build_gather_constants(batch)
    w1 = params["conv1_w"].reshape(NOFF, FILTERS[0])                        # (27, 8)
    w2 = params["conv2_w"].reshape(NOFF, FILTERS[0], FILTERS[1])            # (27, 8, 8)
    wfc1 = params["fc1_w"].reshape(FILTERS[1], S3 ** 3, HIDDEN_DIMS[0])     # (c, s, o)
    wfc1 = jnp.transpose(wfc1, (1, 0, 2))                                   # (s, c, o)
    return {
        "w1": _pad2(w1, KP1),
        "b1": _pad_bias(params["conv1_b"]),
        "S": S,                                                             # bf16, exact 0/1
        "w2": jnp.zeros((NOFF, FILTERS[0], NPAD), jnp.float32).at[:, :, :FILTERS[1]].set(w2),
        "b2": _pad_bias(params["conv2_b"]),
        "bn_g": _pad_bias(params["bn_g"]),
        "bn_b": _pad_bias(params["bn_b"]),
        "T": T,
        "wfc1": jnp.zeros((S3 ** 3, FILTERS[1], NPAD), jnp.float32).at[:, :, :HIDDEN_DIMS[0]].set(wfc1),
        "bfc1": _pad_bias(params["fc1_b"]),
        "wfc2": _pad2(params["fc2_w"], NPAD),
        "bfc2": _pad_bias(params["fc2_b"]),
        "wr1": _pad2(params["reg1_w"], NPAD),
        "br1": _pad_bias(params["reg1_b"]),
        "wr2": _pad2(params["reg2_w"], NPAD),
        "br2": _pad_bias(params["reg2_b"]),
    }


def make_params(key):
    keys = jax.random.split(key, 12)
    s = 0.1
    return {
        "conv1_w": s * jax.random.normal(keys[0], (KSIZE, KSIZE, KSIZE, 1, FILTERS[0]), jnp.float32),
        "conv1_b": s * jax.random.normal(keys[1], (FILTERS[0],), jnp.float32),
        "conv2_w": s * jax.random.normal(keys[2], (KSIZE, KSIZE, KSIZE, FILTERS[0], FILTERS[1]), jnp.float32),
        "conv2_b": s * jax.random.normal(keys[3], (FILTERS[1],), jnp.float32),
        "bn_g": jnp.ones((FILTERS[1],), jnp.float32),    # nn.BatchNorm3d default affine init
        "bn_b": jnp.zeros((FILTERS[1],), jnp.float32),
        "fc1_w": s * jax.random.normal(keys[4], (FC_IN, HIDDEN_DIMS[0]), jnp.float32),
        "fc1_b": s * jax.random.normal(keys[5], (HIDDEN_DIMS[0],), jnp.float32),
        "fc2_w": s * jax.random.normal(keys[6], (HIDDEN_DIMS[0], OUT_DIM), jnp.float32),
        "fc2_b": s * jax.random.normal(keys[7], (OUT_DIM,), jnp.float32),
        "reg1_w": s * jax.random.normal(keys[8], (OUT_DIM + CONTRAST_DIM, HIDDEN_DIMS_REG[0]), jnp.float32),
        "reg1_b": s * jax.random.normal(keys[9], (HIDDEN_DIMS_REG[0],), jnp.float32),
        "reg2_w": s * jax.random.normal(keys[10], (HIDDEN_DIMS_REG[0], 1), jnp.float32),
        "reg2_b": s * jax.random.normal(keys[11], (1,), jnp.float32),
    }


if __name__ == "__main__":
    key = jax.random.PRNGKey(0)
    kp, k0, k1 = jax.random.split(key, 3)
    params = make_params(kp)
    packed = pack_params(params, B)      # weight packing done ONCE, outside the hot path

    # x is a list of (volume, contrast) tuples in the torch module; here pre-stacked:
    x0 = jax.random.normal(k0, (B,) + IN_SIZE, jnp.float32)        # item[0] volumes
    x1 = jax.random.normal(k1, (B, 1, CONTRAST_DIM), jnp.float32)  # item[1] contrast vectors

    out = convnet_forward(x0, x1, packed)
    out = jax.block_until_ready(out)
    assert out.shape == (B,), out.shape
    assert bool(jnp.all(jnp.isfinite(out)))
    print("KERNEL_OK")
</pallas_src>

<mosaic_0001>
module attributes {stable_mosaic.version = 11 : i64} {
  func.func @_convnet_kernel(%arg0: memref<1024x32xf32, #tpu.memory_space<vmem>>, %arg1: memref<32x128xf32, #tpu.memory_space<vmem>>, %arg2: memref<1x128xf32, #tpu.memory_space<vmem>>, %arg3: memref<3456x128xbf16, #tpu.memory_space<vmem>>, %arg4: memref<27x8x128xf32, #tpu.memory_space<vmem>>, %arg5: memref<1x128xf32, #tpu.memory_space<vmem>>, %arg6: memref<1x128xf32, #tpu.memory_space<vmem>>, %arg7: memref<1x128xf32, #tpu.memory_space<vmem>>, %arg8: memref<8x8x16xf32, #tpu.memory_space<vmem>>, %arg9: memref<8x8x128xf32, #tpu.memory_space<vmem>>, %arg10: memref<1x128xf32, #tpu.memory_space<vmem>>, %arg11: memref<128x128xf32, #tpu.memory_space<vmem>>, %arg12: memref<1x128xf32, #tpu.memory_space<vmem>>, %arg13: memref<8x128xf32, #tpu.memory_space<vmem>>, %arg14: memref<128x128xf32, #tpu.memory_space<vmem>>, %arg15: memref<1x128xf32, #tpu.memory_space<vmem>>, %arg16: memref<128x128xf32, #tpu.memory_space<vmem>>, %arg17: memref<1x128xf32, #tpu.memory_space<vmem>>, %arg18: memref<8x128xf32, #tpu.memory_space<vmem>>) attributes {dimension_semantics = [], scalar_prefetch = 0 : i64, scratch_operands = 0 : i64, tpu.core_type = #tpu.core_type<tc>} {
    %c0 = arith.constant 0 : index
    %c0_0 = arith.constant 0 : index
    %0 = vector.load %arg0[%c0, %c0_0] : memref<1024x32xf32, #tpu.memory_space<vmem>>, vector<1024x32xf32>
    %c0_1 = arith.constant 0 : index
    %c0_2 = arith.constant 0 : index
    %1 = vector.load %arg1[%c0_1, %c0_2] : memref<32x128xf32, #tpu.memory_space<vmem>>, vector<32x128xf32>
    %cst = arith.constant dense<0.000000e+00> : vector<1024x128xf32>
    %2 = tpu.matmul %0, %1, %cst {dimension_numbers = #tpu.dot_dimension_numbers<[1], [0], [0], [1], [0, 0, 1, 1], [], []>} : vector<1024x32xf32>, vector<32x128xf32>, vector<1024x128xf32> -> vector<1024x128xf32>
    %c0_3 = arith.constant 0 : index
    %c0_4 = arith.constant 0 : index
    %3 = vector.load %arg2[%c0_3, %c0_4] : memref<1x128xf32, #tpu.memory_space<vmem>>, vector<1x128xf32>
    %4 = vector.broadcast %3 : vector<1x128xf32> to vector<1024x128xf32>
    %5 = arith.addf %2, %4 : vector<1024x128xf32>
    %cst_5 = arith.constant 0.000000e+00 : f32
    %6 = vector.broadcast %cst_5 : f32 to vector<1024x128xf32>
    %7 = arith.maximumf %5, %6 : vector<1024x128xf32>
    %8 = vector.extract_strided_slice %7 {offsets = [0, 0], sizes = [128, 128], strides = [1, 1]} : vector<1024x128xf32> to vector<128x128xf32>
    %9 = vector.extract_strided_slice %7 {offsets = [128, 0], sizes = [128, 128], strides = [1, 1]} : vector<1024x128xf32> to vector<128x128xf32>
    %10 = arith.maximumf %8, %9 : vector<128x128xf32>
    %11 = vector.extract_strided_slice %7 {offsets = [256, 0], sizes = [128, 128], strides = [1, 1]} : vector<1024x128xf32> to vector<128x128xf32>
    %12 = arith.maximumf %10, %11 : vector<128x128xf32>
    %13 = vector.extract_strided_slice %7 {offsets = [384, 0], sizes = [128, 128], strides = [1, 1]} : vector<1024x128xf32> to vector<128x128xf32>
    %14 = arith.maximumf %12, %13 : vector<128x128xf32>
    %15 = vector.extract_strided_slice %7 {offsets = [512, 0], sizes = [128, 128], strides = [1, 1]} : vector<1024x128xf32> to vector<128x128xf32>
    %16 = arith.maximumf %14, %15 : vector<128x128xf32>
    %17 = vector.extract_strided_slice %7 {offsets = [640, 0], sizes = [128, 128], strides = [1, 1]} : vector<1024x128xf32> to vector<128x128xf32>
    %18 = arith.maximumf %16, %17 : vector<128x128xf32>
    %19 = vector.extract_strided_slice %7 {offsets = [768, 0], sizes = [128, 128], strides = [1, 1]} : vector<1024x128xf32> to vector<128x128xf32>
    %20 = arith.maximumf %18, %19 : vector<128x128xf32>
    %21 = vector.extract_strided_slice %7 {offsets = [896, 0], sizes = [128, 128], strides = [1, 1]} : vector<1024x128xf32> to vector<128x128xf32>
    %22 = arith.maximumf %20, %21 : vector<128x128xf32>
    %23 = vector.extract_strided_slice %22 {offsets = [0, 0], sizes = [128, 8], strides = [1, 1]} : vector<128x128xf32> to vector<128x8xf32>
    %c0_6 = arith.constant 0 : index
    %c0_7 = arith.constant 0 : index
    %24 = vector.load %arg3[%c0_6, %c0_7] : memref<3456x128xbf16, #tpu.memory_space<vmem>>, vector<3456x128xbf16>
    %25 = arith.extf %24 : vector<3456x128xbf16> to vector<3456x128xf32>
    %cst_8 = arith.constant dense<0.000000e+00> : vector<3456x8xf32>
    %26 = tpu.matmul %25, %23, %cst_8 {dimension_numbers = #tpu.dot_dimension_numbers<[1], [0], [0], [1], [0, 0, 1, 1], [], []>} : vector<3456x128xf32>, vector<128x8xf32>, vector<3456x8xf32> -> vector<3456x8xf32>
    %cst_9 = arith.constant 0.000000e+00 : f32
    %27 = vector.broadcast %cst_9 : f32 to vector<128x128xf32>
    %28 = vector.extract_strided_slice %26 {offsets = [0, 0], sizes = [128, 8], strides = [1, 1]} : vector<3456x8xf32> to vector<128x8xf32>
    %c0_10 = arith.constant 0 : index
    %c0_11 = arith.constant 0 : index
    %c0_12 = arith.constant 0 : index
    %29 = vector.load %arg4[%c0_10, %c0_11, %c0_12] : memref<27x8x128xf32, #tpu.memory_space<vmem>>, vector<1x8x128xf32>
    %30 = vector.shape_cast %29 : vector<1x8x128xf32> to vector<8x128xf32>
    %cst_13 = arith.constant dense<0.000000e+00> : vector<128x128xf32>
    %31 = tpu.matmul %28, %30, %cst_13 {dimension_numbers = #tpu.dot_dimension_numbers<[1], [0], [0], [1], [0, 0, 1, 1], [], []>} : vector<128x8xf32>, vector<8x128xf32>, vector<128x128xf32> -> vector<128x128xf32>
    %32 = arith.addf %27, %31 : vector<128x128xf32>
    %33 = vector.extract_strided_slice %26 {offsets = [128, 0], sizes = [128, 8], strides = [1, 1]} : vector<3456x8xf32> to vector<128x8xf32>
    %c1 = arith.constant 1 : index
    %c0_14 = arith.constant 0 : index
    %c0_15 = arith.constant 0 : index
    %34 = vector.load %arg4[%c1, %c0_14, %c0_15] : memref<27x8x128xf32, #tpu.memory_space<vmem>>, vector<1x8x128xf32>
    %35 = vector.shape_cast %34 : vector<1x8x128xf32> to vector<8x128xf32>
    %cst_16 = arith.constant dense<0.000000e+00> : vector<128x128xf32>
    %36 = tpu.matmul %33, %35, %cst_16 {dimension_numbers = #tpu.dot_dimension_numbers<[1], [0], [0], [1], [0, 0, 1, 1], [], []>} : vector<128x8xf32>, vector<8x128xf32>, vector<128x128xf32> -> vector<128x128xf32>
    %37 = arith.addf %32, %36 : vector<128x128xf32>
    %38 = vector.extract_strided_slice %26 {offsets = [256, 0], sizes = [128, 8], strides = [1, 1]} : vector<3456x8xf32> to vector<128x8xf32>
    %c2 = arith.constant 2 : index
    %c0_17 = arith.constant 0 : index
    %c0_18 = arith.constant 0 : index
    %39 = vector.load %arg4[%c2, %c0_17, %c0_18] : memref<27x8x128xf32, #tpu.memory_space<vmem>>, vector<1x8x128xf32>
    %40 = vector.shape_cast %39 : vector<1x8x128xf32> to vector<8x128xf32>
    %cst_19 = arith.constant dense<0.000000e+00> : vector<128x128xf32>
    %41 = tpu.matmul %38, %40, %cst_19 {dimension_numbers = #tpu.dot_dimension_numbers<[1], [0], [0], [1], [0, 0, 1, 1], [], []>} : vector<128x8xf32>, vector<8x128xf32>, vector<128x128xf32> -> vector<128x128xf32>
    %42 = arith.addf %37, %41 : vector<128x128xf32>
    %43 = vector.extract_strided_slice %26 {offsets = [384, 0], sizes = [128, 8], strides = [1, 1]} : vector<3456x8xf32> to vector<128x8xf32>
    %c3 = arith.constant 3 : index
    %c0_20 = arith.constant 0 : index
    %c0_21 = arith.constant 0 : index
    %44 = vector.load %arg4[%c3, %c0_20, %c0_21] : memref<27x8x128xf32, #tpu.memory_space<vmem>>, vector<1x8x128xf32>
    %45 = vector.shape_cast %44 : vector<1x8x128xf32> to vector<8x128xf32>
    %cst_22 = arith.constant dense<0.000000e+00> : vector<128x128xf32>
    %46 = tpu.matmul %43, %45, %cst_22 {dimension_numbers = #tpu.dot_dimension_numbers<[1], [0], [0], [1], [0, 0, 1, 1], [], []>} : vector<128x8xf32>, vector<8x128xf32>, vector<128x128xf32> -> vector<128x128xf32>
    %47 = arith.addf %42, %46 : vector<128x128xf32>
    %48 = vector.extract_strided_slice %26 {offsets = [512, 0], sizes = [128, 8], strides = [1, 1]} : vector<3456x8xf32> to vector<128x8xf32>
    %c4 = arith.constant 4 : index
    %c0_23 = arith.constant 0 : index
    %c0_24 = arith.constant 0 : index
    %49 = vector.load %arg4[%c4, %c0_23, %c0_24] : memref<27x8x128xf32, #tpu.memory_space<vmem>>, vector<1x8x128xf32>
    %50 = vector.shape_cast %49 : vector<1x8x128xf32> to vector<8x128xf32>
    %cst_25 = arith.constant dense<0.000000e+00> : vector<128x128xf32>
    %51 = tpu.matmul %48, %50, %cst_25 {dimension_numbers = #tpu.dot_dimension_numbers<[1], [0], [0], [1], [0, 0, 1, 1], [], []>} : vector<128x8xf32>, vector<8x128xf32>, vector<128x128xf32> -> vector<128x128xf32>
    %52 = arith.addf %47, %51 : vector<128x128xf32>
    %53 = vector.extract_strided_slice %26 {offsets = [640, 0], sizes = [128, 8], strides = [1, 1]} : vector<3456x8xf32> to vector<128x8xf32>
    %c5 = arith.constant 5 : index
    %c0_26 = arith.constant 0 : index
    %c0_27 = arith.constant 0 : index
    %54 = vector.load %arg4[%c5, %c0_26, %c0_27] : memref<27x8x128xf32, #tpu.memory_space<vmem>>, vector<1x8x128xf32>
    %55 = vector.shape_cast %54 : vector<1x8x128xf32> to vector<8x128xf32>
    %cst_28 = arith.constant dense<0.000000e+00> : vector<128x128xf32>
    %56 = tpu.matmul %53, %55, %cst_28 {dimension_numbers = #tpu.dot_dimension_numbers<[1], [0], [0], [1], [0, 0, 1, 1], [], []>} : vector<128x8xf32>, vector<8x128xf32>, vector<128x128xf32> -> vector<128x128xf32>
    %57 = arith.addf %52, %56 : vector<128x128xf32>
    %58 = vector.extract_strided_slice %26 {offsets = [768, 0], sizes = [128, 8], strides = [1, 1]} : vector<3456x8xf32> to vector<128x8xf32>
    %c6 = arith.constant 6 : index
    %c0_29 = arith.constant 0 : index
    %c0_30 = arith.constant 0 : index
    %59 = vector.load %arg4[%c6, %c0_29, %c0_30] : memref<27x8x128xf32, #tpu.memory_space<vmem>>, vector<1x8x128xf32>
    %60 = vector.shape_cast %59 : vector<1x8x128xf32> to vector<8x128xf32>
    %cst_31 = arith.constant dense<0.000000e+00> : vector<128x128xf32>
    %61 = tpu.matmul %58, %60, %cst_31 {dimension_numbers = #tpu.dot_dimension_numbers<[1], [0], [0], [1], [0, 0, 1, 1], [], []>} : vector<128x8xf32>, vector<8x128xf32>, vector<128x128xf32> -> vector<128x128xf32>
    %62 = arith.addf %57, %61 : vector<128x128xf32>
    %63 = vector.extract_strided_slice %26 {offsets = [896, 0], sizes = [128, 8], strides = [1, 1]} : vector<3456x8xf32> to vector<128x8xf32>
    %c7 = arith.constant 7 : index
    %c0_32 = arith.constant 0 : index
    %c0_33 = arith.constant 0 : index
    %64 = vector.load %arg4[%c7, %c0_32, %c0_33] : memref<27x8x128xf32, #tpu.memory_space<vmem>>, vector<1x8x128xf32>
    %65 = vector.shape_cast %64 : vector<1x8x128xf32> to vector<8x128xf32>
    %cst_34 = arith.constant dense<0.000000e+00> : vector<128x128xf32>
    %66 = tpu.matmul %63, %65, %cst_34 {dimension_numbers = #tpu.dot_dimension_numbers<[1], [0], [0], [1], [0, 0, 1, 1], [], []>} : vector<128x8xf32>, vector<8x128xf32>, vector<128x128xf32> -> vector<128x128xf32>
    %67 = arith.addf %62, %66 : vector<128x128xf32>
    %68 = vector.extract_strided_slice %26 {offsets = [1024, 0], sizes = [128, 8], strides = [1, 1]} : vector<3456x8xf32> to vector<128x8xf32>
    %c8 = arith.constant 8 : index
    %c0_35 = arith.constant 0 : index
    %c0_36 = arith.constant 0 : index
    %69 = vector.load %arg4[%c8, %c0_35, %c0_36] : memref<27x8x128xf32, #tpu.memory_space<vmem>>, vector<1x8x128xf32>
    %70 = vector.shape_cast %69 : vector<1x8x128xf32> to vector<8x128xf32>
    %cst_37 = arith.constant dense<0.000000e+00> : vector<128x128xf32>
    %71 = tpu.matmul %68, %70, %cst_37 {dimension_numbers = #tpu.dot_dimension_numbers<[1], [0], [0], [1], [0, 0, 1, 1], [], []>} : vector<128x8xf32>, vector<8x128xf32>, vector<128x128xf32> -> vector<128x128xf32>
    %72 = arith.addf %67, %71 : vector<128x128xf32>
    %73 = vector.extract_strided_slice %26 {offsets = [1152, 0], sizes = [128, 8], strides = [1, 1]} : vector<3456x8xf32> to vector<128x8xf32>
    %c9 = arith.constant 9 : index
    %c0_38 = arith.constant 0 : index
    %c0_39 = arith.constant 0 : index
    %74 = vector.load %arg4[%c9, %c0_38, %c0_39] : memref<27x8x128xf32, #tpu.memory_space<vmem>>, vector<1x8x128xf32>
    %75 = vector.shape_cast %74 : vector<1x8x128xf32> to vector<8x128xf32>
    %cst_40 = arith.constant dense<0.000000e+00> : vector<128x128xf32>
    %76 = tpu.matmul %73, %75, %cst_40 {dimension_numbers = #tpu.dot_dimension_numbers<[1], [0], [0], [1], [0, 0, 1, 1], [], []>} : vector<128x8xf32>, vector<8x128xf32>, vector<128x128xf32> -> vector<128x128xf32>
    %77 = arith.addf %72, %76 : vector<128x128xf32>
    %78 = vector.extract_strided_slice %26 {offsets = [1280, 0], sizes = [128, 8], strides = [1, 1]} : vector<3456x8xf32> to vector<128x8xf32>
    %c10 = arith.constant 10 : index
    %c0_41 = arith.constant 0 : index
    %c0_42 = arith.constant 0 : index
    %79 = vector.load %arg4[%c10, %c0_41, %c0_42] : memref<27x8x128xf32, #tpu.memory_space<vmem>>, vector<1x8x128xf32>
    %80 = vector.shape_cast %79 : vector<1x8x128xf32> to vector<8x128xf32>
    %cst_43 = arith.constant dense<0.000000e+00> : vector<128x128xf32>
    %81 = tpu.matmul %78, %80, %cst_43 {dimension_numbers = #tpu.dot_dimension_numbers<[1], [0], [0], [1], [0, 0, 1, 1], [], []>} : vector<128x8xf32>, vector<8x128xf32>, vector<128x128xf32> -> vector<128x128xf32>
    %82 = arith.addf %77, %81 : vector<128x128xf32>
    %83 = vector.extract_strided_slice %26 {offsets = [1408, 0], sizes = [128, 8], strides = [1, 1]} : vector<3456x8xf32> to vector<128x8xf32>
    %c11 = arith.constant 11 : index
    %c0_44 = arith.constant 0 : index
    %c0_45 = arith.constant 0 : index
    %84 = vector.load %arg4[%c11, %c0_44, %c0_45] : memref<27x8x128xf32, #tpu.memory_space<vmem>>, vector<1x8x128xf32>
    %85 = vector.shape_cast %84 : vector<1x8x128xf32> to vector<8x128xf32>
    %cst_46 = arith.constant dense<0.000000e+00> : vector<128x128xf32>
    %86 = tpu.matmul %83, %85, %cst_46 {dimension_numbers = #tpu.dot_dimension_numbers<[1], [0], [0], [1], [0, 0, 1, 1], [], []>} : vector<128x8xf32>, vector<8x128xf32>, vector<128x128xf32> -> vector<128x128xf32>
    %87 = arith.addf %82, %86 : vector<128x128xf32>
    %88 = vector.extract_strided_slice %26 {offsets = [1536, 0], sizes = [128, 8], strides = [1, 1]} : vector<3456x8xf32> to vector<128x8xf32>
    %c12 = arith.constant 12 : index
    %c0_47 = arith.constant 0 : index
    %c0_48 = arith.constant 0 : index
    %89 = vector.load %arg4[%c12, %c0_47, %c0_48] : memref<27x8x128xf32, #tpu.memory_space<vmem>>, vector<1x8x128xf32>
    %90 = vector.shape_cast %89 : vector<1x8x128xf32> to vector<8x128xf32>
    %cst_49 = arith.constant dense<0.000000e+00> : vector<128x128xf32>
    %91 = tpu.matmul %88, %90, %cst_49 {dimension_numbers = #tpu.dot_dimension_numbers<[1], [0], [0], [1], [0, 0, 1, 1], [], []>} : vector<128x8xf32>, vector<8x128xf32>, vector<128x128xf32> -> vector<128x128xf32>
    %92 = arith.addf %87, %91 : vector<128x128xf32>
    %93 = vector.extract_strided_slice %26 {offsets = [1664, 0], sizes = [128, 8], strides = [1, 1]} : vector<3456x8xf32> to vector<128x8xf32>
    %c13 = arith.constant 13 : index
    %c0_50 = arith.constant 0 : index
    %c0_51 = arith.constant 0 : index
    %94 = vector.load %arg4[%c13, %c0_50, %c0_51] : memref<27x8x128xf32, #tpu.memory_space<vmem>>, vector<1x8x128xf32>
    %95 = vector.shape_cast %94 : vector<1x8x128xf32> to vector<8x128xf32>
    %cst_52 = arith.constant dense<0.000000e+00> : vector<128x128xf32>
    %96 = tpu.matmul %93, %95, %cst_52 {dimension_numbers = #tpu.dot_dimension_numbers<[1], [0], [0], [1], [0, 0, 1, 1], [], []>} : vector<128x8xf32>, vector<8x128xf32>, vector<128x128xf32> -> vector<128x128xf32>
    %97 = arith.addf %92, %96 : vector<128x128xf32>
    %98 = vector.extract_strided_slice %26 {offsets = [1792, 0], sizes = [128, 8], strides = [1, 1]} : vector<3456x8xf32> to vector<128x8xf32>
    %c14 = arith.constant 14 : index
    %c0_53 = arith.constant 0 : index
    %c0_54 = arith.constant 0 : index
    %99 = vector.load %arg4[%c14, %c0_53, %c0_54] : memref<27x8x128xf32, #tpu.memory_space<vmem>>, vector<1x8x128xf32>
    %100 = vector.shape_cast %99 : vector<1x8x128xf32> to vector<8x128xf32>
    %cst_55 = arith.constant dense<0.000000e+00> : vector<128x128xf32>
    %101 = tpu.matmul %98, %100, %cst_55 {dimension_numbers = #tpu.dot_dimension_numbers<[1], [0], [0], [1], [0, 0, 1, 1], [], []>} : vector<128x8xf32>, vector<8x128xf32>, vector<128x128xf32> -> vector<128x128xf32>
    %102 = arith.addf %97, %101 : vector<128x128xf32>
    %103 = vector.extract_strided_slice %26 {offsets = [1920, 0], sizes = [128, 8], strides = [1, 1]} : vector<3456x8xf32> to vector<128x8xf32>
    %c15 = arith.constant 15 : index
    %c0_56 = arith.constant 0 : index
    %c0_57 = arith.constant 0 : index
    %104 = vector.load %arg4[%c15, %c0_56, %c0_57] : memref<27x8x128xf32, #tpu.memory_space<vmem>>, vector<1x8x128xf32>
    %105 = vector.shape_cast %104 : vector<1x8x128xf32> to vector<8x128xf32>
    %cst_58 = arith.constant dense<0.000000e+00> : vector<128x128xf32>
    %106 = tpu.matmul %103, %105, %cst_58 {dimension_numbers = #tpu.dot_dimension_numbers<[1], [0], [0], [1], [0, 0, 1, 1], [], []>} : vector<128x8xf32>, vector<8x128xf32>, vector<128x128xf32> -> vector<128x128xf32>
    %107 = arith.addf %102, %106 : vector<128x128xf32>
    %108 = vector.extract_strided_slice %26 {offsets = [2048, 0], sizes = [128, 8], strides = [1, 1]} : vector<3456x8xf32> to vector<128x8xf32>
    %c16 = arith.constant 16 : index
    %c0_59 = arith.constant 0 : index
    %c0_60 = arith.constant 0 : index
    %109 = vector.load %arg4[%c16, %c0_59, %c0_60] : memref<27x8x128xf32, #tpu.memory_space<vmem>>, vector<1x8x128xf32>
    %110 = vector.shape_cast %109 : vector<1x8x128xf32> to vector<8x128xf32>
    %cst_61 = arith.constant dense<0.000000e+00> : vector<128x128xf32>
    %111 = tpu.matmul %108, %110, %cst_61 {dimension_numbers = #tpu.dot_dimension_numbers<[1], [0], [0], [1], [0, 0, 1, 1], [], []>} : vector<128x8xf32>, vector<8x128xf32>, vector<128x128xf32> -> vector<128x128xf32>
    %112 = arith.addf %107, %111 : vector<128x128xf32>
    %113 = vector.extract_strided_slice %26 {offsets = [2176, 0], sizes = [128, 8], strides = [1, 1]} : vector<3456x8xf32> to vector<128x8xf32>
    %c17 = arith.constant 17 : index
    %c0_62 = arith.constant 0 : index
    %c0_63 = arith.constant 0 : index
    %114 = vector.load %arg4[%c17, %c0_62, %c0_63] : memref<27x8x128xf32, #tpu.memory_space<vmem>>, vector<1x8x128xf32>
    %115 = vector.shape_cast %114 : vector<1x8x128xf32> to vector<8x128xf32>
    %cst_64 = arith.constant dense<0.000000e+00> : vector<128x128xf32>
    %116 = tpu.matmul %113, %115, %cst_64 {dimension_numbers = #tpu.dot_dimension_numbers<[1], [0], [0], [1], [0, 0, 1, 1], [], []>} : vector<128x8xf32>, vector<8x128xf32>, vector<128x128xf32> -> vector<128x128xf32>
    %117 = arith.addf %112, %116 : vector<128x128xf32>
    %118 = vector.extract_strided_slice %26 {offsets = [2304, 0], sizes = [128, 8], strides = [1, 1]} : vector<3456x8xf32> to vector<128x8xf32>
    %c18 = arith.constant 18 : index
    %c0_65 = arith.constant 0 : index
    %c0_66 = arith.constant 0 : index
    %119 = vector.load %arg4[%c18, %c0_65, %c0_66] : memref<27x8x128xf32, #tpu.memory_space<vmem>>, vector<1x8x128xf32>
    %120 = vector.shape_cast %119 : vector<1x8x128xf32> to vector<8x128xf32>
    %cst_67 = arith.constant dense<0.000000e+00> : vector<128x128xf32>
    %121 = tpu.matmul %118, %120, %cst_67 {dimension_numbers = #tpu.dot_dimension_numbers<[1], [0], [0], [1], [0, 0, 1, 1], [], []>} : vector<128x8xf32>, vector<8x128xf32>, vector<128x128xf32> -> vector<128x128xf32>
    %122 = arith.addf %117, %121 : vector<128x128xf32>
    %123 = vector.extract_strided_slice %26 {offsets = [2432, 0], sizes = [128, 8], strides = [1, 1]} : vector<3456x8xf32> to vector<128x8xf32>
    %c19 = arith.constant 19 : index
    %c0_68 = arith.constant 0 : index
    %c0_69 = arith.constant 0 : index
    %124 = vector.load %arg4[%c19, %c0_68, %c0_69] : memref<27x8x128xf32, #tpu.memory_space<vmem>>, vector<1x8x128xf32>
    %125 = vector.shape_cast %124 : vector<1x8x128xf32> to vector<8x128xf32>
    %cst_70 = arith.constant dense<0.000000e+00> : vector<128x128xf32>
    %126 = tpu.matmul %123, %125, %cst_70 {dimension_numbers = #tpu.dot_dimension_numbers<[1], [0], [0], [1], [0, 0, 1, 1], [], []>} : vector<128x8xf32>, vector<8x128xf32>, vector<128x128xf32> -> vector<128x128xf32>
    %127 = arith.addf %122, %126 : vector<128x128xf32>
    %128 = vector.extract_strided_slice %26 {offsets = [2560, 0], sizes = [128, 8], strides = [1, 1]} : vector<3456x8xf32> to vector<128x8xf32>
    %c20 = arith.constant 20 : index
    %c0_71 = arith.constant 0 : index
    %c0_72 = arith.constant 0 : index
    %129 = vector.load %arg4[%c20, %c0_71, %c0_72] : memref<27x8x128xf32, #tpu.memory_space<vmem>>, vector<1x8x128xf32>
    %130 = vector.shape_cast %129 : vector<1x8x128xf32> to vector<8x128xf32>
    %cst_73 = arith.constant dense<0.000000e+00> : vector<128x128xf32>
    %131 = tpu.matmul %128, %130, %cst_73 {dimension_numbers = #tpu.dot_dimension_numbers<[1], [0], [0], [1], [0, 0, 1, 1], [], []>} : vector<128x8xf32>, vector<8x128xf32>, vector<128x128xf32> -> vector<128x128xf32>
    %132 = arith.addf %127, %131 : vector<128x128xf32>
    %133 = vector.extract_strided_slice %26 {offsets = [2688, 0], sizes = [128, 8], strides = [1, 1]} : vector<3456x8xf32> to vector<128x8xf32>
    %c21 = arith.constant 21 : index
    %c0_74 = arith.constant 0 : index
    %c0_75 = arith.constant 0 : index
    %134 = vector.load %arg4[%c21, %c0_74, %c0_75] : memref<27x8x128xf32, #tpu.memory_space<vmem>>, vector<1x8x128xf32>
    %135 = vector.shape_cast %134 : vector<1x8x128xf32> to vector<8x128xf32>
    %cst_76 = arith.constant dense<0.000000e+00> : vector<128x128xf32>
    %136 = tpu.matmul %133, %135, %cst_76 {dimension_numbers = #tpu.dot_dimension_numbers<[1], [0], [0], [1], [0, 0, 1, 1], [], []>} : vector<128x8xf32>, vector<8x128xf32>, vector<128x128xf32> -> vector<128x128xf32>
    %137 = arith.addf %132, %136 : vector<128x128xf32>
    %138 = vector.extract_strided_slice %26 {offsets = [2816, 0], sizes = [128, 8], strides = [1, 1]} : vector<3456x8xf32> to vector<128x8xf32>
    %c22 = arith.constant 22 : index
    %c0_77 = arith.constant 0 : index
    %c0_78 = arith.constant 0 : index
    %139 = vector.load %arg4[%c22, %c0_77, %c0_78] : memref<27x8x128xf32, #tpu.memory_space<vmem>>, vector<1x8x128xf32>
    %140 = vector.shape_cast %139 : vector<1x8x128xf32> to vector<8x128xf32>
    %cst_79 = arith.constant dense<0.000000e+00> : vector<128x128xf32>
    %141 = tpu.matmul %138, %140, %cst_79 {dimension_numbers = #tpu.dot_dimension_numbers<[1], [0], [0], [1], [0, 0, 1, 1], [], []>} : vector<128x8xf32>, vector<8x128xf32>, vector<128x128xf32> -> vector<128x128xf32>
    %142 = arith.addf %137, %141 : vector<128x128xf32>
    %143 = vector.extract_strided_slice %26 {offsets = [2944, 0], sizes = [128, 8], strides = [1, 1]} : vector<3456x8xf32> to vector<128x8xf32>
    %c23 = arith.constant 23 : index
    %c0_80 = arith.constant 0 : index
    %c0_81 = arith.constant 0 : index
    %144 = vector.load %arg4[%c23, %c0_80, %c0_81] : memref<27x8x128xf32, #tpu.memory_space<vmem>>, vector<1x8x128xf32>
    %145 = vector.shape_cast %144 : vector<1x8x128xf32> to vector<8x128xf32>
    %cst_82 = arith.constant dense<0.000000e+00> : vector<128x128xf32>
    %146 = tpu.matmul %143, %145, %cst_82 {dimension_numbers = #tpu.dot_dimension_numbers<[1], [0], [0], [1], [0, 0, 1, 1], [], []>} : vector<128x8xf32>, vector<8x128xf32>, vector<128x128xf32> -> vector<128x128xf32>
    %147 = arith.addf %142, %146 : vector<128x128xf32>
    %148 = vector.extract_strided_slice %26 {offsets = [3072, 0], sizes = [128, 8], strides = [1, 1]} : vector<3456x8xf32> to vector<128x8xf32>
    %c24 = arith.constant 24 : index
    %c0_83 = arith.constant 0 : index
    %c0_84 = arith.constant 0 : index
    %149 = vector.load %arg4[%c24, %c0_83, %c0_84] : memref<27x8x128xf32, #tpu.memory_space<vmem>>, vector<1x8x128xf32>
    %150 = vector.shape_cast %149 : vector<1x8x128xf32> to vector<8x128xf32>
    %cst_85 = arith.constant dense<0.000000e+00> : vector<128x128xf32>
    %151 = tpu.matmul %148, %150, %cst_85 {dimension_numbers = #tpu.dot_dimension_numbers<[1], [0], [0], [1], [0, 0, 1, 1], [], []>} : vector<128x8xf32>, vector<8x128xf32>, vector<128x128xf32> -> vector<128x128xf32>
    %152 = arith.addf %147, %151 : vector<128x128xf32>
    %153 = vector.extract_strided_slice %26 {offsets = [3200, 0], sizes = [128, 8], strides = [1, 1]} : vector<3456x8xf32> to vector<128x8xf32>
    %c25 = arith.constant 25 : index
    %c0_86 = arith.constant 0 : index
    %c0_87 = arith.constant 0 : index
    %154 = vector.load %arg4[%c25, %c0_86, %c0_87] : memref<27x8x128xf32, #tpu.memory_space<vmem>>, vector<1x8x128xf32>
    %155 = vector.shape_cast %154 : vector<1x8x128xf32> to vector<8x128xf32>
    %cst_88 = arith.constant dense<0.000000e+00> : vector<128x128xf32>
    %156 = tpu.matmul %153, %155, %cst_88 {dimension_numbers = #tpu.dot_dimension_numbers<[1], [0], [0], [1], [0, 0, 1, 1], [], []>} : vector<128x8xf32>, vector<8x128xf32>, vector<128x128xf32> -> vector<128x128xf32>
    %157 = arith.addf %152, %156 : vector<128x128xf32>
    %158 = vector.extract_strided_slice %26 {offsets = [3328, 0], sizes = [128, 8], strides = [1, 1]} : vector<3456x8xf32> to vector<128x8xf32>
    %c26 = arith.constant 26 : index
    %c0_89 = arith.constant 0 : index
    %c0_90 = arith.constant 0 : index
    %159 = vector.load %arg4[%c26, %c0_89, %c0_90] : memref<27x8x128xf32, #tpu.memory_space<vmem>>, vector<1x8x128xf32>
    %160 = vector.shape_cast %159 : vector<1x8x128xf32> to vector<8x128xf32>
    %cst_91 = arith.constant dense<0.000000e+00> : vector<128x128xf32>
    %161 = tpu.matmul %158, %160, %cst_91 {dimension_numbers = #tpu.dot_dimension_numbers<[1], [0], [0], [1], [0, 0, 1, 1], [], []>} : vector<128x8xf32>, vector<8x128xf32>, vector<128x128xf32> -> vector<128x128xf32>
    %162 = arith.addf %157, %161 : vector<128x128xf32>
    %c0_92 = arith.constant 0 : index
    %c0_93 = arith.constant 0 : index
    %163 = vector.load %arg5[%c0_92, %c0_93] : memref<1x128xf32, #tpu.memory_space<vmem>>, vector<1x128xf32>
    %164 = vector.broadcast %163 : vector<1x128xf32> to vector<128x128xf32>
    %165 = arith.addf %162, %164 : vector<128x128xf32>
    %cst_94 = arith.constant 0.000000e+00 : f32
    %166 = vector.broadcast %cst_94 : f32 to vector<128x128xf32>
    %167 = arith.maximumf %165, %166 : vector<128x128xf32>
    %168 = vector.extract_strided_slice %167 {offsets = [0, 0], sizes = [16, 128], strides = [1, 1]} : vector<128x128xf32> to vector<16x128xf32>
    %169 = vector.extract_strided_slice %167 {offsets = [16, 0], sizes = [16, 128], strides = [1, 1]} : vector<128x128xf32> to vector<16x128xf32>
    %170 = arith.maximumf %168, %169 : vector<16x128xf32>
    %171 = vector.extract_strided_slice %167 {offsets = [32, 0], sizes = [16, 128], strides = [1, 1]} : vector<128x128xf32> to vector<16x128xf32>
    %172 = arith.maximumf %170, %171 : vector<16x128xf32>
    %173 = vector.extract_strided_slice %167 {offsets = [48, 0], sizes = [16, 128], strides = [1, 1]} : vector<128x128xf32> to vector<16x128xf32>
    %174 = arith.maximumf %172, %173 : vector<16x128xf32>
    %175 = vector.extract_strided_slice %167 {offsets = [64, 0], sizes = [16, 128], strides = [1, 1]} : vector<128x128xf32> to vector<16x128xf32>
    %176 = arith.maximumf %174, %175 : vector<16x128xf32>
    %177 = vector.extract_strided_slice %167 {offsets = [80, 0], sizes = [16, 128], strides = [1, 1]} : vector<128x128xf32> to vector<16x128xf32>
    %178 = arith.maximumf %176, %177 : vector<16x128xf32>
    %179 = vector.extract_strided_slice %167 {offsets = [96, 0], sizes = [16, 128], strides = [1, 1]} : vector<128x128xf32> to vector<16x128xf32>
    %180 = arith.maximumf %178, %179 : vector<16x128xf32>
    %181 = vector.extract_strided_slice %167 {offsets = [112, 0], sizes = [16, 128], strides = [1, 1]} : vector<128x128xf32> to vector<16x128xf32>
    %182 = arith.maximumf %180, %181 : vector<16x128xf32>
    %cst_95 = arith.constant dense<0.000000e+00> : vector<128xf32>
    %183 = vector.multi_reduction <add>, %182, %cst_95 [0] : vector<16x128xf32> to vector<128xf32>
    %184 = vector.shape_cast %183 : vector<128xf32> to vector<1x128xf32>
    %cst_96 = arith.constant 1.600000e+01 : f32
    %185 = vector.broadcast %cst_96 : f32 to vector<1x128xf32>
    %186 = arith.divf %184, %185 : vector<1x128xf32>
    %187 = vector.broadcast %186 : vector<1x128xf32> to vector<16x128xf32>
    %188 = arith.subf %182, %187 : vector<16x128xf32>
    %189 = arith.mulf %188, %188 : vector<16x128xf32>
    %cst_97 = arith.constant dense<0.000000e+00> : vector<128xf32>
    %190 = vector.multi_reduction <add>, %189, %cst_97 [0] : vector<16x128xf32> to vector<128xf32>
    %191 = vector.shape_cast %190 : vector<128xf32> to vector<1x128xf32>
    %cst_98 = arith.constant 1.600000e+01 : f32
    %192 = vector.broadcast %cst_98 : f32 to vector<1x128xf32>
    %193 = arith.divf %191, %192 : vector<1x128xf32>
    %194 = vector.broadcast %186 : vector<1x128xf32> to vector<16x128xf32>
    %195 = arith.subf %182, %194 : vector<16x128xf32>
    %cst_99 = arith.constant 9.99999974E-6 : f32
    %196 = vector.broadcast %cst_99 : f32 to vector<1x128xf32>
    %197 = arith.addf %193, %196 : vector<1x128xf32>
    %198 = math.rsqrt %197 : vector<1x128xf32>
    %199 = vector.broadcast %198 : vector<1x128xf32> to vector<16x128xf32>
    %200 = arith.mulf %195, %199 : vector<16x128xf32>
    %c0_100 = arith.constant 0 : index
    %c0_101 = arith.constant 0 : index
    %201 = vector.load %arg6[%c0_100, %c0_101] : memref<1x128xf32, #tpu.memory_space<vmem>>, vector<1x128xf32>
    %202 = vector.broadcast %201 : vector<1x128xf32> to vector<16x128xf32>
    %203 = arith.mulf %200, %202 : vector<16x128xf32>
    %c0_102 = arith.constant 0 : index
    %c0_103 = arith.constant 0 : index
    %204 = vector.load %arg7[%c0_102, %c0_103] : memref<1x128xf32, #tpu.memory_space<vmem>>, vector<1x128xf32>
    %205 = vector.broadcast %204 : vector<1x128xf32> to vector<16x128xf32>
    %206 = arith.addf %203, %205 : vector<16x128xf32>
    %207 = vector.extract_strided_slice %206 {offsets = [0, 0], sizes = [16, 8], strides = [1, 1]} : vector<16x128xf32> to vector<16x8xf32>
    %cst_104 = arith.constant 0.000000e+00 : f32
    %208 = vector.broadcast %cst_104 : f32 to vector<8x128xf32>
    %c0_105 = arith.constant 0 : index
    %c0_106 = arith.constant 0 : index
    %c0_107 = arith.constant 0 : index
    %209 = vector.load %arg8[%c0_105, %c0_106, %c0_107] : memref<8x8x16xf32, #tpu.memory_space<vmem>>, vector<1x8x16xf32>
    %210 = vector.shape_cast %209 : vector<1x8x16xf32> to vector<8x16xf32>
    %cst_108 = arith.constant dense<0.000000e+00> : vector<8x8xf32>
    %211 = tpu.matmul %210, %207, %cst_108 {dimension_numbers = #tpu.dot_dimension_numbers<[1], [0], [0], [1], [0, 0, 1, 1], [], []>} : vector<8x16xf32>, vector<16x8xf32>, vector<8x8xf32> -> vector<8x8xf32>
    %c0_109 = arith.constant 0 : index
    %c0_110 = arith.constant 0 : index
    %c0_111 = arith.constant 0 : index
    %212 = vector.load %arg9[%c0_109, %c0_110, %c0_111] : memref<8x8x128xf32, #tpu.memory_space<vmem>>, vector<1x8x128xf32>
    %213 = vector.shape_cast %212 : vector<1x8x128xf32> to vector<8x128xf32>
    %cst_112 = arith.constant dense<0.000000e+00> : vector<8x128xf32>
    %214 = tpu.matmul %211, %213, %cst_112 {dimension_numbers = #tpu.dot_dimension_numbers<[1], [0], [0], [1], [0, 0, 1, 1], [], []>} : vector<8x8xf32>, vector<8x128xf32>, vector<8x128xf32> -> vector<8x128xf32>
    %215 = arith.addf %208, %214 : vector<8x128xf32>
    %c1_113 = arith.constant 1 : index
    %c0_114 = arith.constant 0 : index
    %c0_115 = arith.constant 0 : index
    %216 = vector.load %arg8[%c1_113, %c0_114, %c0_115] : memref<8x8x16xf32, #tpu.memory_space<vmem>>, vector<1x8x16xf32>
    %217 = vector.shape_cast %216 : vector<1x8x16xf32> to vector<8x16xf32>
    %cst_116 = arith.constant dense<0.000000e+00> : vector<8x8xf32>
    %218 = tpu.matmul %217, %207, %cst_116 {dimension_numbers = #tpu.dot_dimension_numbers<[1], [0], [0], [1], [0, 0, 1, 1], [], []>} : vector<8x16xf32>, vector<16x8xf32>, vector<8x8xf32> -> vector<8x8xf32>
    %c1_117 = arith.constant 1 : index
    %c0_118 = arith.constant 0 : index
    %c0_119 = arith.constant 0 : index
    %219 = vector.load %arg9[%c1_117, %c0_118, %c0_119] : memref<8x8x128xf32, #tpu.memory_space<vmem>>, vector<1x8x128xf32>
    %220 = vector.shape_cast %219 : vector<1x8x128xf32> to vector<8x128xf32>
    %cst_120 = arith.constant dense<0.000000e+00> : vector<8x128xf32>
    %221 = tpu.matmul %218, %220, %cst_120 {dimension_numbers = #tpu.dot_dimension_numbers<[1], [0], [0], [1], [0, 0, 1, 1], [], []>} : vector<8x8xf32>, vector<8x128xf32>, vector<8x128xf32> -> vector<8x128xf32>
    %222 = arith.addf %215, %221 : vector<8x128xf32>
    %c2_121 = arith.constant 2 : index
    %c0_122 = arith.constant 0 : index
    %c0_123 = arith.constant 0 : index
    %223 = vector.load %arg8[%c2_121, %c0_122, %c0_123] : memref<8x8x16xf32, #tpu.memory_space<vmem>>, vector<1x8x16xf32>
    %224 = vector.shape_cast %223 : vector<1x8x16xf32> to vector<8x16xf32>
    %cst_124 = arith.constant dense<0.000000e+00> : vector<8x8xf32>
    %225 = tpu.matmul %224, %207, %cst_124 {dimension_numbers = #tpu.dot_dimension_numbers<[1], [0], [0], [1], [0, 0, 1, 1], [], []>} : vector<8x16xf32>, vector<16x8xf32>, vector<8x8xf32> -> vector<8x8xf32>
    %c2_125 = arith.constant 2 : index
    %c0_126 = arith.constant 0 : index
    %c0_127 = arith.constant 0 : index
    %226 = vector.load %arg9[%c2_125, %c0_126, %c0_127] : memref<8x8x128xf32, #tpu.memory_space<vmem>>, vector<1x8x128xf32>
    %227 = vector.shape_cast %226 : vector<1x8x128xf32> to vector<8x128xf32>
    %cst_128 = arith.constant dense<0.000000e+00> : vector<8x128xf32>
    %228 = tpu.matmul %225, %227, %cst_128 {dimension_numbers = #tpu.dot_dimension_numbers<[1], [0], [0], [1], [0, 0, 1, 1], [], []>} : vector<8x8xf32>, vector<8x128xf32>, vector<8x128xf32> -> vector<8x128xf32>
    %229 = arith.addf %222, %228 : vector<8x128xf32>
    %c3_129 = arith.constant 3 : index
    %c0_130 = arith.constant 0 : index
    %c0_131 = arith.constant 0 : index
    %230 = vector.load %arg8[%c3_129, %c0_130, %c0_131] : memref<8x8x16xf32, #tpu.memory_space<vmem>>, vector<1x8x16xf32>
    %231 = vector.shape_cast %230 : vector<1x8x16xf32> to vector<8x16xf32>
    %cst_132 = arith.constant dense<0.000000e+00> : vector<8x8xf32>
    %232 = tpu.matmul %231, %207, %cst_132 {dimension_numbers = #tpu.dot_dimension_numbers<[1], [0], [0], [1], [0, 0, 1, 1], [], []>} : vector<8x16xf32>, vector<16x8xf32>, vector<8x8xf32> -> vector<8x8xf32>
    %c3_133 = arith.constant 3 : index
    %c0_134 = arith.constant 0 : index
    %c0_135 = arith.constant 0 : index
    %233 = vector.load %arg9[%c3_133, %c0_134, %c0_135] : memref<8x8x128xf32, #tpu.memory_space<vmem>>, vector<1x8x128xf32>
    %234 = vector.shape_cast %233 : vector<1x8x128xf32> to vector<8x128xf32>
    %cst_136 = arith.constant dense<0.000000e+00> : vector<8x128xf32>
    %235 = tpu.matmul %232, %234, %cst_136 {dimension_numbers = #tpu.dot_dimension_numbers<[1], [0], [0], [1], [0, 0, 1, 1], [], []>} : vector<8x8xf32>, vector<8x128xf32>, vector<8x128xf32> -> vector<8x128xf32>
    %236 = arith.addf %229, %235 : vector<8x128xf32>
    %c4_137 = arith.constant 4 : index
    %c0_138 = arith.constant 0 : index
    %c0_139 = arith.constant 0 : index
    %237 = vector.load %arg8[%c4_137, %c0_138, %c0_139] : memref<8x8x16xf32, #tpu.memory_space<vmem>>, vector<1x8x16xf32>
    %238 = vector.shape_cast %237 : vector<1x8x16xf32> to vector<8x16xf32>
    %cst_140 = arith.constant dense<0.000000e+00> : vector<8x8xf32>
    %239 = tpu.matmul %238, %207, %cst_140 {dimension_numbers = #tpu.dot_dimension_numbers<[1], [0], [0], [1], [0, 0, 1, 1], [], []>} : vector<8x16xf32>, vector<16x8xf32>, vector<8x8xf32> -> vector<8x8xf32>
    %c4_141 = arith.constant 4 : index
    %c0_142 = arith.constant 0 : index
    %c0_143 = arith.constant 0 : index
    %240 = vector.load %arg9[%c4_141, %c0_142, %c0_143] : memref<8x8x128xf32, #tpu.memory_space<vmem>>, vector<1x8x128xf32>
    %241 = vector.shape_cast %240 : vector<1x8x128xf32> to vector<8x128xf32>
    %cst_144 = arith.constant dense<0.000000e+00> : vector<8x128xf32>
    %242 = tpu.matmul %239, %241, %cst_144 {dimension_numbers = #tpu.dot_dimension_numbers<[1], [0], [0], [1], [0, 0, 1, 1], [], []>} : vector<8x8xf32>, vector<8x128xf32>, vector<8x128xf32> -> vector<8x128xf32>
    %243 = arith.addf %236, %242 : vector<8x128xf32>
    %c5_145 = arith.constant 5 : index
    %c0_146 = arith.constant 0 : index
    %c0_147 = arith.constant 0 : index
    %244 = vector.load %arg8[%c5_145, %c0_146, %c0_147] : memref<8x8x16xf32, #tpu.memory_space<vmem>>, vector<1x8x16xf32>
    %245 = vector.shape_cast %244 : vector<1x8x16xf32> to vector<8x16xf32>
    %cst_148 = arith.constant dense<0.000000e+00> : vector<8x8xf32>
    %246 = tpu.matmul %245, %207, %cst_148 {dimension_numbers = #tpu.dot_dimension_numbers<[1], [0], [0], [1], [0, 0, 1, 1], [], []>} : vector<8x16xf32>, vector<16x8xf32>, vector<8x8xf32> -> vector<8x8xf32>
    %c5_149 = arith.constant 5 : index
    %c0_150 = arith.constant 0 : index
    %c0_151 = arith.constant 0 : index
    %247 = vector.load %arg9[%c5_149, %c0_150, %c0_151] : memref<8x8x128xf32, #tpu.memory_space<vmem>>, vector<1x8x128xf32>
    %248 = vector.shape_cast %247 : vector<1x8x128xf32> to vector<8x128xf32>
    %cst_152 = arith.constant dense<0.000000e+00> : vector<8x128xf32>
    %249 = tpu.matmul %246, %248, %cst_152 {dimension_numbers = #tpu.dot_dimension_numbers<[1], [0], [0], [1], [0, 0, 1, 1], [], []>} : vector<8x8xf32>, vector<8x128xf32>, vector<8x128xf32> -> vector<8x128xf32>
    %250 = arith.addf %243, %249 : vector<8x128xf32>
    %c6_153 = arith.constant 6 : index
    %c0_154 = arith.constant 0 : index
    %c0_155 = arith.constant 0 : index
    %251 = vector.load %arg8[%c6_153, %c0_154, %c0_155] : memref<8x8x16xf32, #tpu.memory_space<vmem>>, vector<1x8x16xf32>
    %252 = vector.shape_cast %251 : vector<1x8x16xf32> to vector<8x16xf32>
    %cst_156 = arith.constant dense<0.000000e+00> : vector<8x8xf32>
    %253 = tpu.matmul %252, %207, %cst_156 {dimension_numbers = #tpu.dot_dimension_numbers<[1], [0], [0], [1], [0, 0, 1, 1], [], []>} : vector<8x16xf32>, vector<16x8xf32>, vector<8x8xf32> -> vector<8x8xf32>
    %c6_157 = arith.constant 6 : index
    %c0_158 = arith.constant 0 : index
    %c0_159 = arith.constant 0 : index
    %254 = vector.load %arg9[%c6_157, %c0_158, %c0_159] : memref<8x8x128xf32, #tpu.memory_space<vmem>>, vector<1x8x128xf32>
    %255 = vector.shape_cast %254 : vector<1x8x128xf32> to vector<8x128xf32>
    %cst_160 = arith.constant dense<0.000000e+00> : vector<8x128xf32>
    %256 = tpu.matmul %253, %255, %cst_160 {dimension_numbers = #tpu.dot_dimension_numbers<[1], [0], [0], [1], [0, 0, 1, 1], [], []>} : vector<8x8xf32>, vector<8x128xf32>, vector<8x128xf32> -> vector<8x128xf32>
    %257 = arith.addf %250, %256 : vector<8x128xf32>
    %c7_161 = arith.constant 7 : index
    %c0_162 = arith.constant 0 : index
    %c0_163 = arith.constant 0 : index
    %258 = vector.load %arg8[%c7_161, %c0_162, %c0_163] : memref<8x8x16xf32, #tpu.memory_space<vmem>>, vector<1x8x16xf32>
    %259 = vector.shape_cast %258 : vector<1x8x16xf32> to vector<8x16xf32>
    %cst_164 = arith.constant dense<0.000000e+00> : vector<8x8xf32>
    %260 = tpu.matmul %259, %207, %cst_164 {dimension_numbers = #tpu.dot_dimension_numbers<[1], [0], [0], [1], [0, 0, 1, 1], [], []>} : vector<8x16xf32>, vector<16x8xf32>, vector<8x8xf32> -> vector<8x8xf32>
    %c7_165 = arith.constant 7 : index
    %c0_166 = arith.constant 0 : index
    %c0_167 = arith.constant 0 : index
    %261 = vector.load %arg9[%c7_165, %c0_166, %c0_167] : memref<8x8x128xf32, #tpu.memory_space<vmem>>, vector<1x8x128xf32>
    %262 = vector.shape_cast %261 : vector<1x8x128xf32> to vector<8x128xf32>
    %cst_168 = arith.constant dense<0.000000e+00> : vector<8x128xf32>
    %263 = tpu.matmul %260, %262, %cst_168 {dimension_numbers = #tpu.dot_dimension_numbers<[1], [0], [0], [1], [0, 0, 1, 1], [], []>} : vector<8x8xf32>, vector<8x128xf32>, vector<8x128xf32> -> vector<8x128xf32>
    %264 = arith.addf %257, %263 : vector<8x128xf32>
    %c0_169 = arith.constant 0 : index
    %c0_170 = arith.constant 0 : index
    %265 = vector.load %arg10[%c0_169, %c0_170] : memref<1x128xf32, #tpu.memory_space<vmem>>, vector<1x128xf32>
    %266 = vector.broadcast %265 : vector<1x128xf32> to vector<8x128xf32>
    %267 = arith.addf %264, %266 : vector<8x128xf32>
    %cst_171 = arith.constant 0.000000e+00 : f32
    %268 = vector.broadcast %cst_171 : f32 to vector<8x128xf32>
    %269 = arith.maximumf %267, %268 : vector<8x128xf32>
    %c0_172 = arith.constant 0 : index
    %c0_173 = arith.constant 0 : index
    %270 = vector.load %arg11[%c0_172, %c0_173] : memref<128x128xf32, #tpu.memory_space<vmem>>, vector<128x128xf32>
    %cst_174 = arith.constant dense<0.000000e+00> : vector<8x128xf32>
    %271 = tpu.matmul %269, %270, %cst_174 {dimension_numbers = #tpu.dot_dimension_numbers<[1], [0], [0], [1], [0, 0, 1, 1], [], []>} : vector<8x128xf32>, vector<128x128xf32>, vector<8x128xf32> -> vector<8x128xf32>
    %c0_175 = arith.constant 0 : index
    %c0_176 = arith.constant 0 : index
    %272 = vector.load %arg12[%c0_175, %c0_176] : memref<1x128xf32, #tpu.memory_space<vmem>>, vector<1x128xf32>
    %273 = vector.broadcast %272 : vector<1x128xf32> to vector<8x128xf32>
    %274 = arith.addf %271, %273 : vector<8x128xf32>
    %cst_177 = arith.constant 0.000000e+00 : f32
    %275 = vector.broadcast %cst_177 : f32 to vector<8x128xf32>
    %276 = arith.maximumf %274, %275 : vector<8x128xf32>
    %c0_178 = arith.constant 0 : index
    %c0_179 = arith.constant 0 : index
    %277 = vector.load %arg13[%c0_178, %c0_179] : memref<8x128xf32, #tpu.memory_space<vmem>>, vector<8x128xf32>
    %278 = arith.addf %276, %277 : vector<8x128xf32>
    %c0_180 = arith.constant 0 : index
    %c0_181 = arith.constant 0 : index
    %279 = vector.load %arg14[%c0_180, %c0_181] : memref<128x128xf32, #tpu.memory_space<vmem>>, vector<128x128xf32>
    %cst_182 = arith.constant dense<0.000000e+00> : vector<8x128xf32>
    %280 = tpu.matmul %278, %279, %cst_182 {dimension_numbers = #tpu.dot_dimension_numbers<[1], [0], [0], [1], [0, 0, 1, 1], [], []>} : vector<8x128xf32>, vector<128x128xf32>, vector<8x128xf32> -> vector<8x128xf32>
    %c0_183 = arith.constant 0 : index
    %c0_184 = arith.constant 0 : index
    %281 = vector.load %arg15[%c0_183, %c0_184] : memref<1x128xf32, #tpu.memory_space<vmem>>, vector<1x128xf32>
    %282 = vector.broadcast %281 : vector<1x128xf32> to vector<8x128xf32>
    %283 = arith.addf %280, %282 : vector<8x128xf32>
    %cst_185 = arith.constant 0.000000e+00 : f32
    %284 = vector.broadcast %cst_185 : f32 to vector<8x128xf32>
    %285 = arith.maximumf %283, %284 : vector<8x128xf32>
    %c0_186 = arith.constant 0 : index
    %c0_187 = arith.constant 0 : index
    %286 = vector.load %arg16[%c0_186, %c0_187] : memref<128x128xf32, #tpu.memory_space<vmem>>, vector<128x128xf32>
    %cst_188 = arith.constant dense<0.000000e+00> : vector<8x128xf32>
    %287 = tpu.matmul %285, %286, %cst_188 {dimension_numbers = #tpu.dot_dimension_numbers<[1], [0], [0], [1], [0, 0, 1, 1], [], []>} : vector<8x128xf32>, vector<128x128xf32>, vector<8x128xf32> -> vector<8x128xf32>
    %c0_189 = arith.constant 0 : index
    %c0_190 = arith.constant 0 : index
    %288 = vector.load %arg17[%c0_189, %c0_190] : memref<1x128xf32, #tpu.memory_space<vmem>>, vector<1x128xf32>
    %289 = vector.broadcast %288 : vector<1x128xf32> to vector<8x128xf32>
    %290 = arith.addf %287, %289 : vector<8x128xf32>
    %c0_191 = arith.constant 0 : index
    %c0_192 = arith.constant 0 : index
    %291 = vector.load %arg18[%c0_191, %c0_192] : memref<8x128xf32, #tpu.memory_space<vmem>>, vector<8x128xf32>
    tpu.vector_store %arg18[%c0_191, %c0_192], %290 {strides = array<i32>} : memref<8x128xf32, #tpu.memory_space<vmem>>, vector<8x128xf32>,
    return
  }
}

</mosaic_0001>

<bundles_post_ra>
// kernel: convnet_forward.1
= control target key start
LH: loop header
LB: loop body
LE: loop exit
PB: predicated region body
PF: predicated region fallthrough
CT: control target
= control target key end

     0   :  { %vm198_vm0 = vcmask 261120   ;;  %vm4620_vm1 = vcmask 64512   ;;  %vm17058_vm2 = vmmov 0   ;;  %vm10379_vm3 = vcmask 130048   ;;  %s20604_s1 = inlined_call_operand.vmem [shape: f32[32,128], index: 1, kind: input, shape index: {}]   ;;  %s20605_s0 = inlined_call_operand.vmem [shape: f32[1024,32], index: 0, kind: input, shape index: {}]   ;;  %s20606_s2 = inlined_call_operand.vmem [shape: f32[1,128], index: 2, kind: input, shape index: {}]   ;;  %s20607_s3 = inlined_call_operand.vmem [shape: bf16[3456,128], index: 3, kind: input, shape index: {}]   ;;  %s20608_s4 = inlined_call_operand.vmem [shape: f32[27,8,128], index: 4, kind: input, shape index: {}]   ;;  %s20609_s5 = inlined_call_operand.vmem [shape: f32[1,128], index: 5, kind: input, shape index: {}]   ;;  %s20610_s6 = inlined_call_operand.vmem [shape: f32[1,128], index: 6, kind: input, shape index: {}]   ;;  %s20611_s7 = inlined_call_operand.vmem [shape: f32[1,128], index: 7, kind: input, shape index: {}]   ;;  %s20612_s8 = inlined_call_operand.vmem [shape: f32[8,8,16], index: 8, kind: input, shape index: {}]   ;;  %s20613_s9 = inlined_call_operand.vmem [shape: f32[8,8,128], index: 9, kind: input, shape index: {}]   ;;  %s20614_s11 = inlined_call_operand.vmem [shape: f32[128,128], index: 11, kind: input, shape index: {}]   ;;  %s20615_s10 = inlined_call_operand.vmem [shape: f32[1,128], index: 10, kind: input, shape index: {}]   ;;  %s20616_s14 = inlined_call_operand.vmem [shape: f32[128,128], index: 14, kind: input, shape index: {}]   ;;  %s20617_s12 = inlined_call_operand.vmem [shape: f32[1,128], index: 12, kind: input, shape index: {}]   ;;  %s20618_s16 = inlined_call_operand.vmem [shape: f32[128,128], index: 16, kind: input, shape index: {}]   ;;  %s20619_s13 = inlined_call_operand.vmem [shape: f32[8,128], index: 13, kind: input, shape index: {}]   ;;  %s20620_s15 = inlined_call_operand.vmem [shape: f32[1,128], index: 15, kind: input, shape index: {}]   ;;  %s20621_s17 = inlined_call_operand.vmem [shape: f32[1,128], index: 17, kind: input, shape index: {}]   ;;  %s20622_s18 = inlined_call_operand.vmem [shape: f32[8,128], index: 18, kind: output, shape index: {}]  }
   0x1   :  { %20625 = sst [smem:[#allocation2_spill]] %s20604_s1 }
   0x2   :  { %20626 = sst [smem:[#allocation3_spill]] %s20605_s0  ;;  %s20628_s29 = sld [smem:[#allocation2_spill]] }
   0x3   :  { %20627 = sst [smem:[#allocation4_spill]] %s20606_s2  ;;  %s20629_s23 = sld [smem:[#allocation3_spill]] }
   0x4   :  { %s20630_s27 = sld [smem:[#allocation4_spill]] }
   0x8   :  { %v187_v0 = vld [vmem:[%s20628_s29] sm:$0xff]  ;;  %v188_v1 = vld [vmem:[%s20628_s29 + $0x8] sm:$0xff]  ;;  %v189_v2 = vld [vmem:[%s20628_s29 + $0x10] sm:$0xff] }
   0x9   :  { %v16496_v3 = vpack.c.bf16 %v188_v1, %v187_v0  ;;  %v190_v4 = vld [vmem:[%s20628_s29 + $0x18] sm:$0xff]  ;;  %v59_v5 = vld [vmem:[%s20629_s23] sm:$0xff]  ;;  %v60_v7 = vld [vmem:[%s20629_s23 + $0x8] sm:$0xff] }
   0xa   :  { %v16500_v6 = vpack.c.bf16 %v190_v4, %v189_v2  ;;  %14721 = vmatprep.mubr.msk.f32.mxu0 %vm198_vm0, %v59_v5  ;;  %v61_v8 = vld [vmem:[%s20629_s23 + $0x10] sm:$0xff]  ;;  %v62_v9 = vld [vmem:[%s20629_s23 + $0x18] sm:$0xff]  ;;  %v63_v10 = vld [vmem:[%s20629_s23 + $0x20] sm:$0xff] }
   0xb   :  { %16497 = vmatprep.subr.bf16.mxu0 %v16496_v3  ;;  %16632 = vmatprep.subr.bf16.mxu1 %v16496_v3  ;;  %v64_v11 = vld [vmem:[%s20629_s23 + $0x28] sm:$0xff]  ;;  %v65_v12 = vld [vmem:[%s20629_s23 + $0x30] sm:$0xff]  ;;  %v66_v13 = vld [vmem:[%s20629_s23 + $0x38] sm:$0xff] }
   0xc   :  { %16499 = vmatpush3.bf16.msra.mxu0 %v16496_v3  ;;  %16634 = vmatpush3.bf16.msra.mxu1 %v16496_v3  ;;  %v67_v14 = vld [vmem:[%s20629_s23 + $0x40] sm:$0xff]  ;;  %v68_v15 = vld [vmem:[%s20629_s23 + $0x48] sm:$0xff]  ;;  %v69_v16 = vld [vmem:[%s20629_s23 + $0x50] sm:$0xff] }
   0xd   :  { %16501 = vmatprep.subr.bf16.mxu0 %v16500_v6  ;;  %16633 = vmatprep.subr.bf16.mxu1 %v16500_v6  ;;  %v70_v17 = vld [vmem:[%s20629_s23 + $0x58] sm:$0xff]  ;;  %v163_v18 = vld [vmem:[%s20629_s23 + $0x340] sm:$0xff]  ;;  %v164_v20 = vld [vmem:[%s20629_s23 + $0x348] sm:$0xff] }
   0xe   :  { %v71_v19 = vld [vmem:[%s20629_s23 + $0x60] sm:$0xff]  ;;  %14877 = vmatprep.mubr.msk.f32.mxu1 %vm198_vm0, %v163_v18  ;;  %v72_v21 = vld [vmem:[%s20629_s23 + $0x68] sm:$0xff]  ;;  %v165_v22 = vld [vmem:[%s20629_s23 + $0x350] sm:$0xff] }
   0xf   :  { %v73_v23 = vld [vmem:[%s20629_s23 + $0x70] sm:$0xff]  ;;  %v166_v24 = vld [vmem:[%s20629_s23 + $0x358] sm:$0xff]  ;;  %v167_v26 = vld [vmem:[%s20629_s23 + $0x360] sm:$0xff] }
  0x10   :  { %16503 = vmatpush3.bf16.msra.mxu0 %v16500_v6  ;;  %16635 = vmatpush3.bf16.msra.mxu1 %v16500_v6  ;;  %v74_v25 = vld [vmem:[%s20629_s23 + $0x78] sm:$0xff]  ;;  %v75_v27 = vld [vmem:[%s20629_s23 + $0x80] sm:$0xff]  ;;  %v168_v28 = vld [vmem:[%s20629_s23 + $0x368] sm:$0xff] }
  0x11   :  { %v76_v29 = vld [vmem:[%s20629_s23 + $0x88] sm:$0xff]  ;;  %v169_v30 = vld [vmem:[%s20629_s23 + $0x370] sm:$0xff]  ;;  %v170_v32 = vld [vmem:[%s20629_s23 + $0x378] sm:$0xff] }
  0x12   :  { %v77_v31 = vld [vmem:[%s20629_s23 + $0x90] sm:$0xff]  ;;  %v78_v33 = vld [vmem:[%s20629_s23 + $0x98] sm:$0xff]  ;;  %v171_v34 = vld [vmem:[%s20629_s23 + $0x380] sm:$0xff] }
  0x13   :  { %14722 = vmatmul.mubr.msk.f32.vlgmr.msra.gmra.mrb[0].mxu0 %vm198_vm0, %v60_v7  ;;  %14878 = vmatmul.mubr.msk.f32.vlgmr.msra.gmra.mrb[0].mxu1 %vm198_vm0, %v164_v20  ;;  %v79_v35 = vld [vmem:[%s20629_s23 + $0xa0] sm:$0xff]  ;;  %v172_v36 = vld [vmem:[%s20629_s23 + $0x388] sm:$0xff]  ;;  %v173_v38 = vld [vmem:[%s20629_s23 + $0x390] sm:$0xff] }
  0x14   :  { %14724 = vmatprep.mubr.msk.f32.mxu0 %vm198_vm0, %v61_v8  ;;  %14880 = vmatprep.mubr.msk.f32.mxu1 %vm198_vm0, %v165_v22  ;;  %v80_v37 = vld [vmem:[%s20629_s23 + $0xa8] sm:$0xff]  ;;  %v81_v39 = vld [vmem:[%s20629_s23 + $0xb0] sm:$0xff]  ;;  %v174_v40 = vld [vmem:[%s20629_s23 + $0x398] sm:$0xff] }
  0x15   :  { %v82_v41 = vld [vmem:[%s20629_s23 + $0xb8] sm:$0xff]  ;;  %v175_v42 = vld [vmem:[%s20629_s23 + $0x3a0] sm:$0xff]  ;;  %v176_v44 = vld [vmem:[%s20629_s23 + $0x3a8] sm:$0xff] }
  0x16   :  { %v83_v43 = vld [vmem:[%s20629_s23 + $0xc0] sm:$0xff]  ;;  %v84_v45 = vld [vmem:[%s20629_s23 + $0xc8] sm:$0xff]  ;;  %v177_v46 = vld [vmem:[%s20629_s23 + $0x3b0] sm:$0xff] }
  0x17   :  { %14725 = vmatmul.mubr.msk.f32.gmra.mrb[2].mxu0 %vm198_vm0, %v62_v9  ;;  %14881 = vmatmul.mubr.msk.f32.gmra.mrb[2].mxu1 %vm198_vm0, %v166_v24  ;;  %v85_v47 = vld [vmem:[%s20629_s23 + $0xd0] sm:$0xff]  ;;  %v178_v48 = vld [vmem:[%s20629_s23 + $0x3b8] sm:$0xff]  ;;  %v179_v50 = vld [vmem:[%s20629_s23 + $0x3c0] sm:$0xff] }
  0x18   :  { %14727 = vmatprep.mubr.msk.f32.mxu0 %vm198_vm0, %v63_v10  ;;  %14883 = vmatprep.mubr.msk.f32.mxu1 %vm198_vm0, %v167_v26  ;;  %v86_v49 = vld [vmem:[%s20629_s23 + $0xd8] sm:$0xff]  ;;  %v87_v51 = vld [vmem:[%s20629_s23 + $0xe0] sm:$0xff]  ;;  %v180_v52 = vld [vmem:[%s20629_s23 + $0x3c8] sm:$0xff] }
  0x19   :  { %v88_v53 = vld [vmem:[%s20629_s23 + $0xe8] sm:$0xff]  ;;  %v181_v54 = vld [vmem:[%s20629_s23 + $0x3d0] sm:$0xff]  ;;  %v182_v56 = vld [vmem:[%s20629_s23 + $0x3d8] sm:$0xff] }
  0x1a   :  { %v89_v55 = vld [vmem:[%s20629_s23 + $0xf0] sm:$0xff]  ;;  %v90_v57 = vld [vmem:[%s20629_s23 + $0xf8] sm:$0xff]  ;;  %v183_v58 = vld [vmem:[%s20629_s23 + $0x3e0] sm:$0xff] }
  0x1b   :  { %14728 = vmatmul.mubr.msk.f32.gmra.mrb[4].mxu0 %vm198_vm0, %v64_v11  ;;  %14884 = vmatmul.mubr.msk.f32.gmra.mrb[4].mxu1 %vm198_vm0, %v168_v28  ;;  %v91_v59 = vld [vmem:[%s20629_s23 + $0x100] sm:$0xff]  ;;  %v184_v60 = vld [vmem:[%s20629_s23 + $0x3e8] sm:$0xff]  ;;  %v185_v62 = vld [vmem:[%s20629_s23 + $0x3f0] sm:$0xff] }
  0x1c   :  { %14730 = vmatprep.mubr.msk.f32.mxu0 %vm198_vm0, %v65_v12  ;;  %14886 = vmatprep.mubr.msk.f32.mxu1 %vm198_vm0, %v169_v30  ;;  %v92_v61 = vld [vmem:[%s20629_s23 + $0x108] sm:$0xff]  ;;  %v93_v63 = vld [vmem:[%s20629_s23 + $0x110] sm:$0xff]  ;;  %v186_v0 = vld [vmem:[%s20629_s23 + $0x3f8] sm:$0xff] }
  0x1d   :  { %v94_v1 = vld [vmem:[%s20629_s23 + $0x118] sm:$0xff]  ;;  %v95_v2 = vld [vmem:[%s20629_s23 + $0x120] sm:$0xff]  ;;  %v96_v3 = vld [vmem:[%s20629_s23 + $0x128] sm:$0xff] }
  0x1e   :  { %v97_v4 = vld [vmem:[%s20629_s23 + $0x130] sm:$0xff]  ;;  %v98_v5 = vld [vmem:[%s20629_s23 + $0x138] sm:$0xff]  ;;  %v99_v6 = vld [vmem:[%s20629_s23 + $0x140] sm:$0xff] }
  0x1f   :  { %14731 = vmatmul.mubr.msk.f32.gmra.mrb[6].mxu0 %vm198_vm0, %v66_v13  ;;  %14887 = vmatmul.mubr.msk.f32.gmra.mrb[6].mxu1 %vm198_vm0, %v170_v32  ;;  %v100_v7 = vld [vmem:[%s20629_s23 + $0x148] sm:$0xff]  ;;  %v101_v8 = vld [vmem:[%s20629_s23 + $0x150] sm:$0xff]  ;;  %v102_v9 = vld [vmem:[%s20629_s23 + $0x158] sm:$0xff] }
  0x20   :  { %14733 = vmatprep.mubr.msk.f32.mxu0 %vm198_vm0, %v67_v14  ;;  %14889 = vmatprep.mubr.msk.f32.mxu1 %vm198_vm0, %v171_v34  ;;  %v103_v10 = vld [vmem:[%s20629_s23 + $0x160] sm:$0xff]  ;;  %v104_v11 = vld [vmem:[%s20629_s23 + $0x168] sm:$0xff]  ;;  %v105_v12 = vld [vmem:[%s20629_s23 + $0x170] sm:$0xff] }
  0x21   :  { %v106_v13 = vld [vmem:[%s20629_s23 + $0x178] sm:$0xff]  ;;  %v107_v14 = vld [vmem:[%s20629_s23 + $0x180] sm:$0xff]  ;;  %v113_v20 = vld [vmem:[%s20629_s23 + $0x1b0] sm:$0xff] }
  0x22   :  { %v111_v18 = vld [vmem:[%s20629_s23 + $0x1a0] sm:$0xff]  ;;  %v117_v24 = vld [vmem:[%s20629_s23 + $0x1d0] sm:$0xff] }
  0x23   :  { %14734 = vmatmul.mubr.msk.f32.gmra.mrb[8].mxu0 %vm198_vm0, %v68_v15  ;;  %14890 = vmatmul.mubr.msk.f32.gmra.mrb[8].mxu1 %vm198_vm0, %v172_v36  ;;  %v108_v15 = vld [vmem:[%s20629_s23 + $0x188] sm:$0xff]  ;;  %v115_v22 = vld [vmem:[%s20629_s23 + $0x1c0] sm:$0xff]  ;;  %v121_v28 = vld [vmem:[%s20629_s23 + $0x1f0] sm:$0xff] }
  0x24   :  { %14736 = vmatprep.mubr.msk.f32.mxu0 %vm198_vm0, %v69_v16  ;;  %14892 = vmatprep.mubr.msk.f32.mxu1 %vm198_vm0, %v173_v38  ;;  %v109_v16 = vld [vmem:[%s20629_s23 + $0x190] sm:$0xff]  ;;  %v119_v26 = vld [vmem:[%s20629_s23 + $0x1e0] sm:$0xff] }
  0x25   :  { %v123_v30 = vld [vmem:[%s20629_s23 + $0x200] sm:$0xff]  ;;  %v125_v32 = vld [vmem:[%s20629_s23 + $0x210] sm:$0xff] }
  0x26   :  { %v127_v34 = vld [vmem:[%s20629_s23 + $0x220] sm:$0xff]  ;;  %v129_v36 = vld [vmem:[%s20629_s23 + $0x230] sm:$0xff] }
  0x27   :  { %14737 = vmatmul.mubr.msk.f32.gmra.mrb[10].mxu0 %vm198_vm0, %v70_v17  ;;  %14893 = vmatmul.mubr.msk.f32.gmra.mrb[10].mxu1 %vm198_vm0, %v174_v40  ;;  %v110_v17 = vld [vmem:[%s20629_s23 + $0x198] sm:$0xff]  ;;  %v131_v38 = vld [vmem:[%s20629_s23 + $0x240] sm:$0xff]  ;;  %v133_v40 = vld [vmem:[%s20629_s23 + $0x250] sm:$0xff] }
  0x28   :  { %14739 = vmatprep.mubr.msk.f32.mxu0 %vm198_vm0, %v71_v19  ;;  %14895 = vmatprep.mubr.msk.f32.mxu1 %vm198_vm0, %v175_v42  ;;  %v112_v19 = vld [vmem:[%s20629_s23 + $0x1a8] sm:$0xff]  ;;  %v135_v42 = vld [vmem:[%s20629_s23 + $0x260] sm:$0xff] }
  0x2b   :  { %14740 = vmatmul.mubr.msk.f32.gmra.mrb[12].mxu0 %vm198_vm0, %v72_v21  ;;  %14896 = vmatmul.mubr.msk.f32.gmra.mrb[12].mxu1 %vm198_vm0, %v176_v44  ;;  %v114_v21 = vld [vmem:[%s20629_s23 + $0x1b8] sm:$0xff]  ;;  %v137_v44 = vld [vmem:[%s20629_s23 + $0x270] sm:$0xff] }
  0x2c   :  { %14742 = vmatprep.mubr.msk.f32.mxu0 %vm198_vm0, %v73_v23  ;;  %14898 = vmatprep.mubr.msk.f32.mxu1 %vm198_vm0, %v177_v46  ;;  %v116_v23 = vld [vmem:[%s20629_s23 + $0x1c8] sm:$0xff]  ;;  %v139_v46 = vld [vmem:[%s20629_s23 + $0x280] sm:$0xff] }
  0x2f   :  { %14743 = vmatmul.mubr.msk.f32.gmra.mrb[14].mxu0 %vm198_vm0, %v74_v25  ;;  %14899 = vmatmul.mubr.msk.f32.gmra.mrb[14].mxu1 %vm198_vm0, %v178_v48  ;;  %v118_v25 = vld [vmem:[%s20629_s23 + $0x1d8] sm:$0xff]  ;;  %v141_v48 = vld [vmem:[%s20629_s23 + $0x290] sm:$0xff] }
  0x30   :  { %14745 = vmatprep.mubr.msk.f32.mxu0 %vm198_vm0, %v75_v27  ;;  %14901 = vmatprep.mubr.msk.f32.mxu1 %vm198_vm0, %v179_v50  ;;  %v120_v27 = vld [vmem:[%s20629_s23 + $0x1e8] sm:$0xff]  ;;  %v143_v50 = vld [vmem:[%s20629_s23 + $0x2a0] sm:$0xff] }
  0x33   :  { %14746 = vmatmul.mubr.msk.f32.gmra.mrb[16].mxu0 %vm198_vm0, %v76_v29  ;;  %14902 = vmatmul.mubr.msk.f32.gmra.mrb[16].mxu1 %vm198_vm0, %v180_v52  ;;  %v122_v29 = vld [vmem:[%s20629_s23 + $0x1f8] sm:$0xff]  ;;  %v145_v52 = vld [vmem:[%s20629_s23 + $0x2b0] sm:$0xff] }
  0x34   :  { %14748 = vmatprep.mubr.msk.f32.mxu0 %vm198_vm0, %v77_v31  ;;  %14904 = vmatprep.mubr.msk.f32.mxu1 %vm198_vm0, %v181_v54  ;;  %v124_v31 = vld [vmem:[%s20629_s23 + $0x208] sm:$0xff]  ;;  %v147_v54 = vld [vmem:[%s20629_s23 + $0x2c0] sm:$0xff] }
  0x37   :  { %14749 = vmatmul.mubr.msk.f32.gmra.mrb[18].mxu0 %vm198_vm0, %v78_v33  ;;  %14905 = vmatmul.mubr.msk.f32.gmra.mrb[18].mxu1 %vm198_vm0, %v182_v56  ;;  %v126_v33 = vld [vmem:[%s20629_s23 + $0x218] sm:$0xff]  ;;  %v149_v56 = vld [vmem:[%s20629_s23 + $0x2d0] sm:$0xff] }
  0x38   :  { %14751 = vmatprep.mubr.msk.f32.mxu0 %vm198_vm0, %v79_v35  ;;  %14907 = vmatprep.mubr.msk.f32.mxu1 %vm198_vm0, %v183_v58  ;;  %v128_v35 = vld [vmem:[%s20629_s23 + $0x228] sm:$0xff]  ;;  %v151_v58 = vld [vmem:[%s20629_s23 + $0x2e0] sm:$0xff] }
  0x3b   :  { %14752 = vmatmul.mubr.msk.f32.gmra.mrb[20].mxu0 %vm198_vm0, %v80_v37  ;;  %14908 = vmatmul.mubr.msk.f32.gmra.mrb[20].mxu1 %vm198_vm0, %v184_v60  ;;  %v130_v37 = vld [vmem:[%s20629_s23 + $0x238] sm:$0xff]  ;;  %v153_v60 = vld [vmem:[%s20629_s23 + $0x2f0] sm:$0xff] }
  0x3c   :  { %14754 = vmatprep.mubr.msk.f32.mxu0 %vm198_vm0, %v81_v39  ;;  %14910 = vmatprep.mubr.msk.f32.mxu1 %vm198_vm0, %v185_v62  ;;  %v132_v39 = vld [vmem:[%s20629_s23 + $0x248] sm:$0xff]  ;;  %v155_v62 = vld [vmem:[%s20629_s23 + $0x300] sm:$0xff] }
  0x3f   :  { %14755 = vmatmul.mubr.msk.f32.gmra.mrb[22].mxu0 %vm198_vm0, %v82_v41  ;;  %14911 = vmatmul.mubr.msk.f32.gmra.mrb[22].mxu1 %vm198_vm0, %v186_v0  ;;  %v134_v41 = vld [vmem:[%s20629_s23 + $0x258] sm:$0xff]  ;;  %v157_v0 = vld [vmem:[%s20629_s23 + $0x310] sm:$0xff] }
  0x40   :  { %14757 = vmatprep.mubr.msk.f32.mxu0 %vm198_vm0, %v83_v43  ;;  %v136_v43 = vld [vmem:[%s20629_s23 + $0x268] sm:$0xff] }
  0x43   :  { %14758 = vmatmul.mubr.msk.f32.gmra.mrb[24].mxu0 %vm198_vm0, %v84_v45  ;;  %v138_v45 = vld [vmem:[%s20629_s23 + $0x278] sm:$0xff] }
  0x44   :  { %14760 = vmatprep.mubr.msk.f32.mxu0 %vm198_vm0, %v85_v47  ;;  %v140_v47 = vld [vmem:[%s20629_s23 + $0x288] sm:$0xff] }
  0x47   :  { %14761 = vmatmul.mubr.msk.f32.gmra.mrb[26].mxu0 %vm198_vm0, %v86_v49  ;;  %v142_v49 = vld [vmem:[%s20629_s23 + $0x298] sm:$0xff] }
  0x48   :  { %14763 = vmatprep.mubr.msk.f32.mxu0 %vm198_vm0, %v87_v51  ;;  %v144_v51 = vld [vmem:[%s20629_s23 + $0x2a8] sm:$0xff] }
  0x4b   :  { %14764 = vmatmul.mubr.msk.f32.gmra.mrb[28].mxu0 %vm198_vm0, %v88_v53  ;;  %v146_v53 = vld [vmem:[%s20629_s23 + $0x2b8] sm:$0xff] }
  0x4c   :  { %14766 = vmatprep.mubr.msk.f32.mxu0 %vm198_vm0, %v89_v55  ;;  %v148_v55 = vld [vmem:[%s20629_s23 + $0x2c8] sm:$0xff] }
  0x4f   :  { %14767 = vmatmul.mubr.msk.f32.gmra.mrb[30].mxu0 %vm198_vm0, %v90_v57  ;;  %v150_v57 = vld [vmem:[%s20629_s23 + $0x2d8] sm:$0xff] }
  0x50   :  { %14769 = vmatprep.mubr.msk.f32.mxu0 %vm198_vm0, %v91_v59  ;;  %v152_v59 = vld [vmem:[%s20629_s23 + $0x2e8] sm:$0xff] }
  0x53   :  { %14770 = vmatmul.mubr.msk.f32.gmra.mrb[32].mxu0 %vm198_vm0, %v92_v61  ;;  %v154_v61 = vld [vmem:[%s20629_s23 + $0x2f8] sm:$0xff] }
  0x54   :  { %14772 = vmatprep.mubr.msk.f32.mxu0 %vm198_vm0, %v93_v63  ;;  %v156_v63 = vld [vmem:[%s20629_s23 + $0x308] sm:$0xff] }
  0x57   :  { %14773 = vmatmul.mubr.msk.f32.gmra.mrb[34].mxu0 %vm198_vm0, %v94_v1  ;;  %v158_v1 = vld [vmem:[%s20629_s23 + $0x318] sm:$0xff] }
  0x58   :  { %14775 = vmatprep.mubr.msk.f32.mxu0 %vm198_vm0, %v95_v2  ;;  %v159_v2 = vld [vmem:[%s20629_s23 + $0x320] sm:$0xff] }
  0x5b   :  { %14776 = vmatmul.mubr.msk.f32.gmra.mrb[36].mxu0 %vm198_vm0, %v96_v3  ;;  %v160_v3 = vld [vmem:[%s20629_s23 + $0x328] sm:$0xff] }
  0x5c   :  { %14778 = vmatprep.mubr.msk.f32.mxu0 %vm198_vm0, %v97_v4  ;;  %v161_v4 = vld [vmem:[%s20629_s23 + $0x330] sm:$0xff] }
  0x5f   :  { %14779 = vmatmul.mubr.msk.f32.gmra.mrb[38].mxu0 %vm198_vm0, %v98_v5  ;;  %v162_v5 = vld [vmem:[%s20629_s23 + $0x338] sm:$0xff] }
  0x60   :  { %14781 = vmatprep.mubr.msk.f32.mxu0 %vm198_vm0, %v99_v6 }
  0x63   :  { %14782 = vmatmul.mubr.msk.f32.gmra.mrb[40].mxu0 %vm198_vm0, %v100_v7 }
  0x64   :  { %14784 = vmatprep.mubr.msk.f32.mxu0 %vm198_vm0, %v101_v8 }
  0x67   :  { %14785 = vmatmul.mubr.msk.f32.gmra.mrb[42].mxu0 %vm198_vm0, %v102_v9 }
  0x68   :  { %14787 = vmatprep.mubr.msk.f32.mxu0 %vm198_vm0, %v103_v10 }
  0x6b   :  { %14788 = vmatmul.mubr.msk.f32.gmra.mrb[44].mxu0 %vm198_vm0, %v104_v11 }
  0x6c   :  { %14790 = vmatprep.mubr.msk.f32.mxu0 %vm198_vm0, %v105_v12 }
  0x6f   :  { %14791 = vmatmul.mubr.msk.f32.gmra.mrb[46].mxu0 %vm198_vm0, %v106_v13 }
  0x70   :  { %14793 = vmatprep.mubr.msk.f32.mxu0 %vm198_vm0, %v107_v14 }
  0x73   :  { %14794 = vmatmul.mubr.msk.f32.gmra.mrb[48].mxu0 %vm198_vm0, %v108_v15 }
  0x74   :  { %14796 = vmatprep.mubr.msk.f32.mxu0 %vm198_vm0, %v109_v16 }
  0x77   :  { %14797 = vmatmul.mubr.msk.f32.gmra.mrb[50].mxu0 %vm198_vm0, %v110_v17 }
  0x78   :  { %14799 = vmatprep.mubr.msk.f32.mxu0 %vm198_vm0, %v111_v18 }
  0x7b   :  { %14800 = vmatmul.mubr.msk.f32.gmra.mrb[52].mxu0 %vm198_vm0, %v112_v19 }
  0x7c   :  { %14802 = vmatprep.mubr.msk.f32.mxu0 %vm198_vm0, %v113_v20  ;;  %v17694_v20 = vld [vmem:[%s20630_s27] ss:$0 sm:$0xff] }
  0x7f   :  { %14803 = vmatmul.mubr.msk.f32.gmra.mrb[54].mxu0 %vm198_vm0, %v114_v21 }
  0x80   :  { %14805 = vmatprep.mubr.msk.f32.mxu0 %vm198_vm0, %v115_v22 }
  0x83   :  { %14806 = vmatmul.mubr.msk.f32.gmra.mrb[56].mxu0 %vm198_vm0, %v116_v23 }
  0x84   :  { %14808 = vmatprep.mubr.msk.f32.mxu0 %vm198_vm0, %v117_v24 }
  0x87   :  { %14809 = vmatmul.mubr.msk.f32.gmra.mrb[58].mxu0 %vm198_vm0, %v118_v25 }
  0x88   :  { %14811 = vmatprep.mubr.msk.f32.mxu0 %vm198_vm0, %v119_v26 }
  0x8b   :  { %14812 = vmatmul.mubr.msk.f32.gmra.mrb[60].mxu0 %vm198_vm0, %v120_v27 }
  0x8c   :  { %14814 = vmatprep.mubr.msk.f32.mxu0 %vm198_vm0, %v121_v28 }
  0x8f   :  { %14815 = vmatmul.mubr.msk.f32.gmra.mrb[62].mxu0 %vm198_vm0, %v122_v29 }
  0x90   :  { %14817 = vmatprep.mubr.msk.f32.mxu0 %vm198_vm0, %v123_v30 }
  0x93   :  { %14818 = vmatmul.mubr.msk.f32.gmra.mrb[64].mxu0 %vm198_vm0, %v124_v31 }
  0x94   :  { %14820 = vmatprep.mubr.msk.f32.mxu0 %vm198_vm0, %v125_v32 }
  0x97   :  { %14821 = vmatmul.mubr.msk.f32.gmra.mrb[66].mxu0 %vm198_vm0, %v126_v33 }
  0x98   :  { %14823 = vmatprep.mubr.msk.f32.mxu0 %vm198_vm0, %v127_v34 }
  0x9b   :  { %14824 = vmatmul.mubr.msk.f32.gmra.mrb[68].mxu0 %vm198_vm0, %v128_v35 }
  0x9c   :  { %14826 = vmatprep.mubr.msk.f32.mxu0 %vm198_vm0, %v129_v36 }
  0x9f   :  { %14827 = vmatmul.mubr.msk.f32.gmra.mrb[70].mxu0 %vm198_vm0, %v130_v37 }
  0xa0   :  { %14829 = vmatprep.mubr.msk.f32.mxu0 %vm198_vm0, %v131_v38 }
  0xa3   :  { %14830 = vmatmul.mubr.msk.f32.gmra.mrb[72].mxu0 %vm198_vm0, %v132_v39 }
  0xa4   :  { %14832 = vmatprep.mubr.msk.f32.mxu0 %vm198_vm0, %v133_v40 }
  0xa7   :  { %14833 = vmatmul.mubr.msk.f32.gmra.mrb[74].mxu0 %vm198_vm0, %v134_v41 }
  0xa8   :  { %14835 = vmatprep.mubr.msk.f32.mxu0 %vm198_vm0, %v135_v42 }
  0xab   :  { %14836 = vmatmul.mubr.msk.f32.gmra.mrb[76].mxu0 %vm198_vm0, %v136_v43 }
  0xac   :  { %14838 = vmatprep.mubr.msk.f32.mxu0 %vm198_vm0, %v137_v44 }
  0xaf   :  { %14839 = vmatmul.mubr.msk.f32.gmra.mrb[78].mxu0 %vm198_vm0, %v138_v45 }
  0xb0   :  { %14841 = vmatprep.mubr.msk.f32.mxu0 %vm198_vm0, %v139_v46 }
  0xb3   :  { %14842 = vmatmul.mubr.msk.f32.gmra.mrb[80].mxu0 %vm198_vm0, %v140_v47 }
  0xb4   :  { %14844 = vmatprep.mubr.msk.f32.mxu0 %vm198_vm0, %v141_v48 }
  0xb7   :  { %14845 = vmatmul.mubr.msk.f32.gmra.mrb[82].mxu0 %vm198_vm0, %v142_v49 }
  0xb8   :  { %14847 = vmatprep.mubr.msk.f32.mxu0 %vm198_vm0, %v143_v50 }
  0xbb   :  { %14848 = vmatmul.mubr.msk.f32.gmra.mrb[84].mxu0 %vm198_vm0, %v144_v51 }
  0xbc   :  { %14850 = vmatprep.mubr.msk.f32.mxu0 %vm198_vm0, %v145_v52 }
  0xbf   :  { %14851 = vmatmul.mubr.msk.f32.gmra.mrb[86].mxu0 %vm198_vm0, %v146_v53 }
  0xc0   :  { %14853 = vmatprep.mubr.msk.f32.mxu0 %vm198_vm0, %v147_v54 }
  0xc3   :  { %14854 = vmatmul.mubr.msk.f32.gmra.mrb[88].mxu0 %vm198_vm0, %v148_v55 }
  0xc4   :  { %14856 = vmatprep.mubr.msk.f32.mxu0 %vm198_vm0, %v149_v56 }
  0xc7   :  { %14857 = vmatmul.mubr.msk.f32.gmra.mrb[90].mxu0 %vm198_vm0, %v150_v57 }
  0xc8   :  { %14859 = vmatprep.mubr.msk.f32.mxu0 %vm198_vm0, %v151_v58 }
  0xcb   :  { %14860 = vmatmul.mubr.msk.f32.gmra.mrb[92].mxu0 %vm198_vm0, %v152_v59 }
  0xcc   :  { %14862 = vmatprep.mubr.msk.f32.mxu0 %vm198_vm0, %v153_v60 }
  0xcf   :  { %14863 = vmatmul.mubr.msk.f32.gmra.mrb[94].mxu0 %vm198_vm0, %v154_v61 }
  0xd0   :  { %14865 = vmatprep.mubr.msk.f32.mxu0 %vm198_vm0, %v155_v62 }
  0xd3   :  { %14866 = vmatmul.mubr.msk.f32.gmra.mrb[96].mxu0 %vm198_vm0, %v156_v63 }
  0xd4   :  { %14868 = vmatprep.mubr.msk.f32.mxu0 %vm198_vm0, %v157_v0 }
  0xd7   :  { %14869 = vmatmul.mubr.msk.f32.gmra.mrb[98].mxu0 %vm198_vm0, %v158_v1 }
  0xd8   :  { %14871 = vmatprep.mubr.msk.f32.mxu0 %vm198_vm0, %v159_v2 }
  0xdb   :  { %14872 = vmatmul.mubr.msk.f32.gmra.mrb[100].mxu0 %vm198_vm0, %v160_v3 }
  0xdc   :  { %14874 = vmatprep.mubr.msk.f32.mxu0 %vm198_vm0, %v161_v4 }
  0xdf   :  { %14875 = vmatmul.mubr.msk.f32.gmra.mrb[102].mxu0 %vm198_vm0, %v162_v5 }
  0xe6   :  { %v14723_v6 = vpop.f32.mrb[0].mxu0  ;;  %v17706_v36 = vpop.f32.mrb[0].mxu1 }
  0xe7   :  { %v649_v7 = vpop.f32.mrb[1].mxu0  ;;  %v655_v23 = vadd.f32 %v14723_v6, %v17694_v20  ;;  %v17711_v40 = vpop.f32.mrb[1].mxu1 }
  0xe8   :  { %v650_v24 = vadd.f32 %v17694_v20, %v649_v7 }
  0xe9   :  { %v1289_v29 = vmax.f32 %v655_v23, 0.0 }
  0xea   :  { %v14726_v8 = vpop.f32.mrb[2].mxu0  ;;  %v1288_v32 = vmax.f32 %v650_v24, 0.0  ;;  %v17716_v43 = vpop.f32.mrb[2].mxu1 }
  0xeb   :  { %v659_v9 = vpop.f32.mrb[3].mxu0  ;;  %v665_v30 = vadd.f32 %v14726_v8, %v17694_v20  ;;  %v17719_v47 = vpop.f32.mrb[3].mxu1 }
  0xec   :  { %v660_v33 = vadd.f32 %v17694_v20, %v659_v9 }
  0xed   :  { %v1291_v44 = vmax.f32 %v665_v30, 0.0 }
  0xee   :  { %v14729_v10 = vpop.f32.mrb[4].mxu0  ;;  %v1290_v48 = vmax.f32 %v660_v33, 0.0  ;;  %v17722_v52 = vpop.f32.mrb[4].mxu1 }
  0xef   :  { %v669_v11 = vpop.f32.mrb[5].mxu0  ;;  %v675_v45 = vadd.f32 %v14729_v10, %v17694_v20  ;;  %v17727_v56 = vpop.f32.mrb[5].mxu1 }
  0xf0   :  { %v670_v49 = vadd.f32 %v17694_v20, %v669_v11 }
  0xf1   :  { %v1293_v60 = vmax.f32 %v675_v45, 0.0 }
  0xf2   :  { %v14732_v12 = vpop.f32.mrb[6].mxu0  ;;  %v17732_v59 = vpop.f32.mrb[6].mxu1  ;;  %v1292_v0 = vmax.f32 %v670_v49, 0.0 }
  0xf3   :  { %v679_v13 = vpop.f32.mrb[7].mxu0  ;;  %v685_v61 = vadd.f32 %v14732_v12, %v17694_v20  ;;  %v17735_v63 = vpop.f32.mrb[7].mxu1 }
  0xf4   :  { %v680_v1 = vadd.f32 %v17694_v20, %v679_v13 }
  0xf5   :  { %v1295_v12 = vmax.f32 %v685_v61, 0.0 }
  0xf6   :  { %v17679_v14 = vpop.f32.mrb[8].mxu0  ;;  %v17738_v4 = vpop.f32.mrb[8].mxu1 }
  0xf7   :  { %v17681_v15 = vpop.f32.mrb[9].mxu0  ;;  %v17743_v8 = vpop.f32.mrb[9].mxu1  ;;  %v695_v13 = vadd.f32 %v17679_v14, %v17694_v20 }
  0xfa   :  { %v17683_v16 = vpop.f32.mrb[10].mxu0  ;;  %v17748_v11 = vpop.f32.mrb[10].mxu1 }
  0xfb   :  { %v17685_v17 = vpop.f32.mrb[11].mxu0  ;;  %v17752_v24 = vpop.f32.mrb[11].mxu1 }
  0xfc   :  { %v700_v45 = vadd.f32 %v17694_v20, %v17685_v17 }
  0xfe   :  { %v17687_v18 = vpop.f32.mrb[12].mxu0 }
  0xff   :  { %v17689_v19 = vpop.f32.mrb[13].mxu0  ;;  %v715_v61 = vadd.f32 %v17687_v18, %v17694_v20 }
 0x102   :  { %v17696_v21 = vpop.f32.mrb[14].mxu0 }
 0x103   :  { %v17698_v22 = vpop.f32.mrb[15].mxu0 }
 0x106   :  { %v14747_v25 = vpop.f32.mrb[16].mxu0 }
 0x107   :  { %v735_v26 = vadd.f32 %v14747_v25, %v17694_v20  ;;  %v729_v27 = vpop.f32.mrb[17].mxu0  ;;  %v1294_v25 = vmax.f32 %v680_v1, 0.0 }
 0x108   :  { %v730_v28 = vadd.f32 %v17694_v20, %v729_v27 }
 0x109   :  { %v1305_v31 = vmax.f32 %v735_v26, 0.0  ;;  %v690_v26 = vadd.f32 %v17694_v20, %v17681_v15  ;;  %v705_v15 = vadd.f32 %v17683_v16, %v17694_v20 }
 0x10a   :  { %v1304_v34 = vmax.f32 %v730_v28, 0.0  ;;  %v14750_v35 = vpop.f32.mrb[18].mxu0 }
 0x10b   :  { %v17708_v37 = vmax.f32 %v1289_v29, %v1305_v31  ;;  %v745_v38 = vadd.f32 %v14750_v35, %v17694_v20  ;;  %v739_v39 = vpop.f32.mrb[19].mxu0  ;;  %v17756_v29 = vpop.f32.mrb[12].mxu1 }
 0x10c   :  { %v17713_v41 = vmax.f32 %v1288_v32, %v1304_v34  ;;  %v740_v42 = vadd.f32 %v17694_v20, %v739_v39  ;;  %v17761_v33 = vpop.f32.mrb[13].mxu1 }
 0x10d   :  { %v1307_v46 = vmax.f32 %v745_v38, 0.0  ;;  %v17766_v35 = vpop.f32.mrb[14].mxu1  ;;  %v1297_v38 = vmax.f32 %v695_v13, 0.0 }
 0x10e   :  { %v1306_v50 = vmax.f32 %v740_v42, 0.0  ;;  %v14753_v51 = vpop.f32.mrb[20].mxu0  ;;  %v17770_v42 = vpop.f32.mrb[15].mxu1 }
 0x10f   :  { %v17724_v53 = vmax.f32 %v1291_v44, %v1307_v46  ;;  %v755_v54 = vadd.f32 %v14753_v51, %v17694_v20  ;;  %v749_v55 = vpop.f32.mrb[21].mxu0  ;;  %v1296_v44 = vmax.f32 %v690_v26, 0.0  ;;  %v17774_v49 = vpop.f32.mrb[16].mxu1 }
 0x110   :  { %v17729_v57 = vmax.f32 %v1290_v48, %v1306_v50  ;;  %v750_v58 = vadd.f32 %v17694_v20, %v749_v55  ;;  %v17779_v55 = vpop.f32.mrb[17].mxu1 }
 0x111   :  { %v1309_v62 = vmax.f32 %v755_v54, 0.0 }
 0x112   :  { %v1308_v2 = vmax.f32 %v750_v58, 0.0  ;;  %v14756_v3 = vpop.f32.mrb[22].mxu0 }
 0x113   :  { %v17740_v5 = vmax.f32 %v1293_v60, %v1309_v62  ;;  %v765_v6 = vadd.f32 %v14756_v3, %v17694_v20  ;;  %v759_v7 = vpop.f32.mrb[23].mxu0  ;;  %v1299_v60 = vmax.f32 %v705_v15, 0.0  ;;  %v1298_v62 = vmax.f32 %v700_v45, 0.0  ;;  %v17788_v3 = vpop.f32.mrb[18].mxu1 }
 0x114   :  { %v17745_v9 = vmax.f32 %v1292_v0, %v1308_v2  ;;  %v760_v10 = vadd.f32 %v17694_v20, %v759_v7  ;;  %v710_v0 = vadd.f32 %v17694_v20, %v17689_v19 }
 0x115   :  { %v1311_v23 = vmax.f32 %v765_v6, 0.0 }
 0x116   :  { %v1310_v27 = vmax.f32 %v760_v10, 0.0  ;;  %v14759_v28 = vpop.f32.mrb[24].mxu0  ;;  %v1300_v26 = vmax.f32 %v710_v0, 0.0 }
 0x117   :  { %v17758_v30 = vmax.f32 %v1295_v12, %v1311_v23  ;;  %v775_v31 = vadd.f32 %v14759_v28, %v17694_v20  ;;  %v769_v32 = vpop.f32.mrb[25].mxu0  ;;  %v17793_v12 = vpop.f32.mrb[19].mxu1  ;;  %v1301_v23 = vmax.f32 %v715_v61, 0.0 }
 0x118   :  { %v17763_v34 = vmax.f32 %v1294_v25, %v1310_v27  ;;  %v770_v14 = vadd.f32 %v17694_v20, %v769_v32  ;;  %v725_v25 = vadd.f32 %v17696_v21, %v17694_v20  ;;  %v720_v27 = vadd.f32 %v17694_v20, %v17698_v22  ;;  %v17802_v32 = vpop.f32.mrb[20].mxu1 }
 0x119   :  { %v1313_v39 = vmax.f32 %v775_v31, 0.0 }
 0x11a   :  { %v1312_v46 = vmax.f32 %v770_v14, 0.0  ;;  %v14762_v48 = vpop.f32.mrb[26].mxu0  ;;  %v1303_v45 = vmax.f32 %v725_v25, 0.0 }
 0x11b   :  { %v17776_v50 = vmax.f32 %v1297_v38, %v1313_v39  ;;  %v785_v51 = vadd.f32 %v14762_v48, %v17694_v20  ;;  %v779_v54 = vpop.f32.mrb[27].mxu0  ;;  %v17807_v39 = vpop.f32.mrb[21].mxu1  ;;  %v1302_v48 = vmax.f32 %v720_v27, 0.0 }
 0x11c   :  { %v17781_v58 = vmax.f32 %v1296_v44, %v1312_v46  ;;  %v780_v16 = vadd.f32 %v17694_v20, %v779_v54  ;;  %v17812_v54 = vpop.f32.mrb[22].mxu1 }
 0x11d   :  { %v1315_v17 = vmax.f32 %v785_v51, 0.0 }
 0x11e   :  { %v1314_v1 = vmax.f32 %v780_v16, 0.0  ;;  %v14765_v2 = vpop.f32.mrb[28].mxu0 }
 0x11f   :  { %v17790_v6 = vmax.f32 %v1299_v60, %v1315_v17  ;;  %v795_v7 = vadd.f32 %v14765_v2, %v17694_v20  ;;  %v789_v10 = vpop.f32.mrb[29].mxu0  ;;  %v17817_v17 = vpop.f32.mrb[23].mxu1 }
 0x120   :  { %v17795_v13 = vmax.f32 %v1298_v62, %v1314_v1  ;;  %v790_v18 = vadd.f32 %v17694_v20, %v789_v10 }
 0x121   :  { %v1317_v19 = vmax.f32 %v795_v7, 0.0 }
 0x122   :  { %v1316_v28 = vmax.f32 %v790_v18, 0.0  ;;  %v14768_v31 = vpop.f32.mrb[30].mxu0 }
 0x123   :  { %v17804_v14 = vmax.f32 %v1301_v23, %v1317_v19  ;;  %v805_v38 = vadd.f32 %v14768_v31, %v17694_v20  ;;  %v799_v15 = vpop.f32.mrb[31].mxu0 }
 0x124   :  { %v17809_v44 = vmax.f32 %v1300_v26, %v1316_v28  ;;  %v800_v21 = vadd.f32 %v17694_v20, %v799_v15 }
 0x125   :  { %v1319_v46 = vmax.f32 %v805_v38, 0.0 }
 0x126   :  { %v1318_v51 = vmax.f32 %v800_v21, 0.0  ;;  %v14771_v22 = vpop.f32.mrb[32].mxu0 }
 0x127   :  { %v17814_v16 = vmax.f32 %v1303_v45, %v1319_v46  ;;  %v815_v60 = vadd.f32 %v14771_v22, %v17694_v20  ;;  %v809_v61 = vpop.f32.mrb[33].mxu0 }
 0x128   :  { %v17819_v62 = vmax.f32 %v1302_v48, %v1318_v51  ;;  %v810_v0 = vadd.f32 %v17694_v20, %v809_v61 }
 0x129   :  { %v1321_v1 = vmax.f32 %v815_v60, 0.0 }
 0x12a   :  { %v1320_v2 = vmax.f32 %v810_v0, 0.0  ;;  %v14774_v7 = vpop.f32.mrb[34].mxu0 }
 0x12b   :  { %v17823_v10 = vmax.f32 %v17708_v37, %v1321_v1  ;;  %v825_v18 = vadd.f32 %v14774_v7, %v17694_v20  ;;  %v819_v23 = vpop.f32.mrb[35].mxu0 }
 0x12c   :  { %v17827_v25 = vmax.f32 %v17713_v41, %v1320_v2  ;;  %v820_v19 = vadd.f32 %v17694_v20, %v819_v23 }
 0x12d   :  { %v1323_v26 = vmax.f32 %v825_v18, 0.0 }
 0x12e   :  { %v1322_v27 = vmax.f32 %v820_v19, 0.0  ;;  %v14777_v28 = vpop.f32.mrb[36].mxu0 }
 0x12f   :  { %v17831_v31 = vmax.f32 %v17724_v53, %v1323_v26  ;;  %v835_v38 = vadd.f32 %v14777_v28, %v17694_v20  ;;  %v829_v15 = vpop.f32.mrb[37].mxu0 }
 0x130   :  { %v17835_v37 = vmax.f32 %v17729_v57, %v1322_v27  ;;  %v830_v21 = vadd.f32 %v17694_v20, %v829_v15 }
 0x131   :  { %v1325_v45 = vmax.f32 %v835_v38, 0.0 }
 0x132   :  { %v1324_v46 = vmax.f32 %v830_v21, 0.0  ;;  %v14780_v41 = vpop.f32.mrb[38].mxu0 }
 0x133   :  { %v17839_v48 = vmax.f32 %v17740_v5, %v1325_v45  ;;  %v845_v51 = vadd.f32 %v14780_v41, %v17694_v20  ;;  %v839_v22 = vpop.f32.mrb[39].mxu0 }
 0x134   :  { %v17843_v53 = vmax.f32 %v17745_v9, %v1324_v46  ;;  %v840_v60 = vadd.f32 %v17694_v20, %v839_v22 }
 0x135   :  { %v1327_v61 = vmax.f32 %v845_v51, 0.0 }
 0x136   :  { %v1326_v0 = vmax.f32 %v840_v60, 0.0  ;;  %v14783_v57 = vpop.f32.mrb[40].mxu0 }
 0x137   :  { %v17847_v1 = vmax.f32 %v17758_v30, %v1327_v61  ;;  %v855_v2 = vadd.f32 %v14783_v57, %v17694_v20  ;;  %v849_v7 = vpop.f32.mrb[41].mxu0 }
 0x138   :  { %v17851_v5 = vmax.f32 %v17763_v34, %v1326_v0  ;;  %v850_v18 = vadd.f32 %v17694_v20, %v849_v7 }
 0x139   :  { %v1329_v23 = vmax.f32 %v855_v2, 0.0 }
 0x13a   :  { %v1328_v19 = vmax.f32 %v850_v18, 0.0  ;;  %v14786_v9 = vpop.f32.mrb[42].mxu0 }
 0x13b   :  { %v17855_v26 = vmax.f32 %v17776_v50, %v1329_v23  ;;  %v865_v27 = vadd.f32 %v14786_v9, %v17694_v20  ;;  %v859_v28 = vpop.f32.mrb[43].mxu0 }
 0x13c   :  { %v17859_v30 = vmax.f32 %v17781_v58, %v1328_v19  ;;  %v860_v38 = vadd.f32 %v17694_v20, %v859_v28 }
 0x13d   :  { %v1331_v15 = vmax.f32 %v865_v27, 0.0 }
 0x13e   :  { %v1330_v21 = vmax.f32 %v860_v38, 0.0  ;;  %v14789_v34 = vpop.f32.mrb[44].mxu0 }
 0x13f   :  { %v17863_v45 = vmax.f32 %v17790_v6, %v1331_v15  ;;  %v875_v46 = vadd.f32 %v14789_v34, %v17694_v20  ;;  %v869_v41 = vpop.f32.mrb[45].mxu0 }
 0x140   :  { %v17867_v50 = vmax.f32 %v17795_v13, %v1330_v21  ;;  %v870_v51 = vadd.f32 %v17694_v20, %v869_v41 }
 0x141   :  { %v1333_v22 = vmax.f32 %v875_v46, 0.0 }
 0x142   :  { %v1332_v60 = vmax.f32 %v870_v51, 0.0  ;;  %v14792_v58 = vpop.f32.mrb[46].mxu0 }
 0x143   :  { %v17871_v61 = vmax.f32 %v17804_v14, %v1333_v22  ;;  %v885_v0 = vadd.f32 %v14792_v58, %v17694_v20  ;;  %v879_v57 = vpop.f32.mrb[47].mxu0  ;;  %v17897_v22 = vld [vmem:[%s20607_s3] sm:$0xff]  }
 0x144   :  { %v17875_v6 = vmax.f32 %v17809_v44, %v1332_v60  ;;  %v880_v2 = vadd.f32 %v17694_v20, %v879_v57 }
 0x145   :  { %v1335_v7 = vmax.f32 %v885_v0, 0.0  ;;  %v12506_v0 = vunpack.c.l.bf16 %v17897_v22 }
 0x146   :  { %v1334_v18 = vmax.f32 %v880_v2, 0.0  ;;  %v14795_v13 = vpop.f32.mrb[48].mxu0 }
 0x147   :  { %v17879_v23 = vmax.f32 %v17814_v16, %v1335_v7  ;;  %v895_v19 = vadd.f32 %v14795_v13, %v17694_v20  ;;  %v889_v9 = vpop.f32.mrb[49].mxu0  ;;  %14945 = vmatprep.mubr.f32.mxu1 %v12506_v0 }
 0x148   :  { %v17883_v14 = vmax.f32 %v17819_v62, %v1334_v18  ;;  %v890_v27 = vadd.f32 %v17694_v20, %v889_v9 }
 0x149   :  { %v1337_v28 = vmax.f32 %v895_v19, 0.0 }
 0x14a   :  { %v1336_v38 = vmax.f32 %v890_v27, 0.0  ;;  %v14798_v44 = vpop.f32.mrb[50].mxu0 }
 0x14b   :  { %v17887_v15 = vmax.f32 %v17823_v10, %v1337_v28  ;;  %v905_v21 = vadd.f32 %v14798_v44, %v17694_v20  ;;  %v899_v34 = vpop.f32.mrb[51].mxu0 }
 0x14c   :  { %v17891_v16 = vmax.f32 %v17827_v25, %v1336_v38  ;;  %v900_v46 = vadd.f32 %v17694_v20, %v899_v34 }
 0x14d   :  { %v1339_v41 = vmax.f32 %v905_v21, 0.0 }
 0x14e   :  { %v1338_v51 = vmax.f32 %v900_v46, 0.0  ;;  %v14801_v62 = vpop.f32.mrb[52].mxu0 }
 0x14f   :  { %v17900_v60 = vmax.f32 %v17831_v31, %v1339_v41  ;;  %v915_v10 = vadd.f32 %v14801_v62, %v17694_v20  ;;  %v909_v58 = vpop.f32.mrb[53].mxu0 }
 0x150   :  { %v17905_v25 = vmax.f32 %v17835_v37, %v1338_v51  ;;  %v910_v57 = vadd.f32 %v17694_v20, %v909_v58 }
 0x151   :  { %v1341_v2 = vmax.f32 %v915_v10, 0.0 }
 0x152   :  { %v1340_v7 = vmax.f32 %v910_v57, 0.0  ;;  %v14804_v18 = vpop.f32.mrb[54].mxu0 }
 0x153   :  { %v17909_v13 = vmax.f32 %v17839_v48, %v1341_v2  ;;  %v925_v31 = vadd.f32 %v14804_v18, %v17694_v20  ;;  %v919_v19 = vpop.f32.mrb[55].mxu0 }
 0x154   :  { %v17913_v9 = vmax.f32 %v17843_v53, %v1340_v7  ;;  %v920_v27 = vadd.f32 %v17694_v20, %v919_v19 }
 0x155   :  { %v1343_v28 = vmax.f32 %v925_v31, 0.0 }
 0x156   :  { %v1342_v37 = vmax.f32 %v920_v27, 0.0  ;;  %v14807_v38 = vpop.f32.mrb[56].mxu0 }
 0x157   :  { %v17917_v44 = vmax.f32 %v17847_v1, %v1343_v28  ;;  %v935_v21 = vadd.f32 %v14807_v38, %v17694_v20  ;;  %v929_v34 = vpop.f32.mrb[57].mxu0 }
 0x158   :  { %v17921_v48 = vmax.f32 %v17851_v5, %v1342_v37  ;;  %v930_v46 = vadd.f32 %v17694_v20, %v929_v34 }
 0x159   :  { %v1345_v41 = vmax.f32 %v935_v21, 0.0 }
 0x15a   :  { %v1344_v51 = vmax.f32 %v930_v46, 0.0  ;;  %v14810_v53 = vpop.f32.mrb[58].mxu0 }
 0x15b   :  { %v17925_v62 = vmax.f32 %v17855_v26, %v1345_v41  ;;  %v945_v10 = vadd.f32 %v14810_v53, %v17694_v20  ;;  %v939_v58 = vpop.f32.mrb[59].mxu0 }
 0x15c   :  { %v17929_v1 = vmax.f32 %v17859_v30, %v1344_v51  ;;  %v940_v0 = vadd.f32 %v17694_v20, %v939_v58 }
 0x15d   :  { %v1347_v57 = vmax.f32 %v945_v10, 0.0 }
 0x15e   :  { %v1346_v2 = vmax.f32 %v940_v0, 0.0  ;;  %v14813_v5 = vpop.f32.mrb[60].mxu0 }
 0x15f   :  { %v17933_v7 = vmax.f32 %v17863_v45, %v1347_v57  ;;  %v955_v18 = vadd.f32 %v14813_v5, %v17694_v20  ;;  %v949_v31 = vpop.f32.mrb[61].mxu0 }
 0x160   :  { %v17937_v26 = vmax.f32 %v17867_v50, %v1346_v2  ;;  %v950_v19 = vadd.f32 %v17694_v20, %v949_v31 }
 0x161   :  { %v1349_v27 = vmax.f32 %v955_v18, 0.0 }
 0x162   :  { %v1348_v28 = vmax.f32 %v950_v19, 0.0  ;;  %v14816_v30 = vpop.f32.mrb[62].mxu0 }
 0x163   :  { %v17941_v37 = vmax.f32 %v17871_v61, %v1349_v27  ;;  %v965_v38 = vadd.f32 %v14816_v30, %v17694_v20  ;;  %v959_v21 = vpop.f32.mrb[63].mxu0 }
 0x164   :  { %v17945_v45 = vmax.f32 %v17875_v6, %v1348_v28  ;;  %v960_v34 = vadd.f32 %v17694_v20, %v959_v21 }
 0x165   :  { %v1351_v46 = vmax.f32 %v965_v38, 0.0 }
 0x166   :  { %v1350_v41 = vmax.f32 %v960_v34, 0.0  ;;  %v14819_v50 = vpop.f32.mrb[64].mxu0 }
 0x167   :  { %v17949_v51 = vmax.f32 %v17879_v23, %v1351_v46  ;;  %v975_v53 = vadd.f32 %v14819_v50, %v17694_v20  ;;  %v969_v10 = vpop.f32.mrb[65].mxu0 }
 0x168   :  { %v17953_v61 = vmax.f32 %v17883_v14, %v1350_v41  ;;  %v970_v58 = vadd.f32 %v17694_v20, %v969_v10 }
 0x169   :  { %v1353_v0 = vmax.f32 %v975_v53, 0.0 }
 0x16a   :  { %v1352_v57 = vmax.f32 %v970_v58, 0.0  ;;  %v14822_v6 = vpop.f32.mrb[66].mxu0 }
 0x16b   :  { %v17957_v2 = vmax.f32 %v17887_v15, %v1353_v0  ;;  %v985_v5 = vadd.f32 %v14822_v6, %v17694_v20  ;;  %v979_v18 = vpop.f32.mrb[67].mxu0 }
 0x16c   :  { %v17961_v23 = vmax.f32 %v17891_v16, %v1352_v57  ;;  %v980_v31 = vadd.f32 %v17694_v20, %v979_v18 }
 0x16d   :  { %v1355_v19 = vmax.f32 %v985_v5, 0.0 }
 0x16e   :  { %v1354_v27 = vmax.f32 %v980_v31, 0.0  ;;  %v14825_v14 = vpop.f32.mrb[68].mxu0 }
 0x16f   :  { %v17965_v28 = vmax.f32 %v17900_v60, %v1355_v19  ;;  %v995_v30 = vadd.f32 %v14825_v14, %v17694_v20  ;;  %v989_v38 = vpop.f32.mrb[69].mxu0 }
 0x170   :  { %v17969_v15 = vmax.f32 %v17905_v25, %v1354_v27  ;;  %v990_v21 = vadd.f32 %v17694_v20, %v989_v38 }
 0x171   :  { %v1357_v34 = vmax.f32 %v995_v30, 0.0 }
 0x172   :  { %v1356_v46 = vmax.f32 %v990_v21, 0.0  ;;  %v14828_v16 = vpop.f32.mrb[70].mxu0 }
 0x173   :  { %v17973_v41 = vmax.f32 %v17909_v13, %v1357_v34  ;;  %v1005_v50 = vadd.f32 %v14828_v16, %v17694_v20  ;;  %v999_v53 = vpop.f32.mrb[71].mxu0 }
 0x174   :  { %v17977_v60 = vmax.f32 %v17913_v9, %v1356_v46  ;;  %v1000_v10 = vadd.f32 %v17694_v20, %v999_v53 }
 0x175   :  { %v1359_v58 = vmax.f32 %v1005_v50, 0.0 }
 0x176   :  { %v1358_v0 = vmax.f32 %v1000_v10, 0.0  ;;  %v14831_v25 = vpop.f32.mrb[72].mxu0 }
 0x177   :  { %v17981_v57 = vmax.f32 %v17917_v44, %v1359_v58  ;;  %v1015_v6 = vadd.f32 %v14831_v25, %v17694_v20  ;;  %v1009_v5 = vpop.f32.mrb[73].mxu0 }
 0x178   :  { %v17985_v13 = vmax.f32 %v17921_v48, %v1358_v0  ;;  %v1010_v18 = vadd.f32 %v17694_v20, %v1009_v5 }
 0x179   :  { %v1361_v31 = vmax.f32 %v1015_v6, 0.0 }
 0x17a   :  { %v1360_v19 = vmax.f32 %v1010_v18, 0.0  ;;  %v14834_v9 = vpop.f32.mrb[74].mxu0 }
 0x17b   :  { %v17989_v27 = vmax.f32 %v17925_v62, %v1361_v31  ;;  %v1025_v14 = vadd.f32 %v14834_v9, %v17694_v20  ;;  %v1019_v30 = vpop.f32.mrb[75].mxu0 }
 0x17c   :  { %v17993_v44 = vmax.f32 %v17929_v1, %v1360_v19  ;;  %v1020_v38 = vadd.f32 %v17694_v20, %v1019_v30 }
 0x17d   :  { %v1363_v21 = vmax.f32 %v1025_v14, 0.0 }
 0x17e   :  { %v1362_v34 = vmax.f32 %v1020_v38, 0.0  ;;  %v14837_v48 = vpop.f32.mrb[76].mxu0 }
 0x17f   :  { %v17997_v46 = vmax.f32 %v17933_v7, %v1363_v21  ;;  %v1035_v16 = vadd.f32 %v14837_v48, %v17694_v20  ;;  %v1029_v50 = vpop.f32.mrb[77].mxu0 }
 0x180   :  { %v18001_v62 = vmax.f32 %v17937_v26, %v1362_v34  ;;  %v1030_v53 = vadd.f32 %v17694_v20, %v1029_v50 }
 0x181   :  { %v1365_v10 = vmax.f32 %v1035_v16, 0.0 }
 0x182   :  { %v1364_v58 = vmax.f32 %v1030_v53, 0.0  ;;  %v14840_v1 = vpop.f32.mrb[78].mxu0 }
 0x183   :  { %v18005_v0 = vmax.f32 %v17941_v37, %v1365_v10  ;;  %v1045_v25 = vadd.f32 %v14840_v1, %v17694_v20  ;;  %v1039_v6 = vpop.f32.mrb[79].mxu0 }
 0x184   :  { %v18009_v7 = vmax.f32 %v17945_v45, %v1364_v58  ;;  %v1040_v5 = vadd.f32 %v17694_v20, %v1039_v6 }
 0x185   :  { %v1367_v18 = vmax.f32 %v1045_v25, 0.0 }
 0x186   :  { %v1366_v31 = vmax.f32 %v1040_v5, 0.0  ;;  %v14843_v26 = vpop.f32.mrb[80].mxu0 }
 0x187   :  { %v18013_v19 = vmax.f32 %v17949_v51, %v1367_v18  ;;  %v1055_v9 = vadd.f32 %v14843_v26, %v17694_v20  ;;  %v1049_v14 = vpop.f32.mrb[81].mxu0 }
 0x188   :  { %v18017_v37 = vmax.f32 %v17953_v61, %v1366_v31  ;;  %v1050_v30 = vadd.f32 %v17694_v20, %v1049_v14  ;;  %v1175_v31 = vadd.f32 %v17706_v36, %v17694_v20  ;;  %v1170_v14 = vadd.f32 %v17694_v20, %v17711_v40 }
 0x189   :  { %v1369_v38 = vmax.f32 %v1055_v9, 0.0  ;;  %v1180_v36 = vadd.f32 %v17694_v20, %v17719_v47 }
 0x18a   :  { %v1368_v21 = vmax.f32 %v1050_v30, 0.0  ;;  %v14846_v45 = vpop.f32.mrb[82].mxu0 }
 0x18b   :  { %v18021_v34 = vmax.f32 %v17957_v2, %v1369_v38  ;;  %v1065_v48 = vadd.f32 %v14846_v45, %v17694_v20  ;;  %v1059_v16 = vpop.f32.mrb[83].mxu0  ;;  %v1185_v38 = vadd.f32 %v17716_v43, %v17694_v20  ;;  %v1255_v43 = vadd.f32 %v17774_v49, %v17694_v20 }
 0x18c   :  { %v18025_v51 = vmax.f32 %v17961_v23, %v1368_v21  ;;  %v1060_v50 = vadd.f32 %v17694_v20, %v1059_v16  ;;  %v1393_v16 = vmax.f32 %v1175_v31, 0.0  ;;  %v18073_v49 = vadd.f32 %v17732_v59, %v17694_v20 }
 0x18d   :  { %v1371_v53 = vmax.f32 %v1065_v48, 0.0  ;;  %v1409_v31 = vmax.f32 %v1255_v43, 0.0 }
 0x18e   :  { %v1370_v10 = vmax.f32 %v1060_v50, 0.0  ;;  %v14849_v61 = vpop.f32.mrb[84].mxu0 }
 0x18f   :  { %v18029_v58 = vmax.f32 %v17965_v28, %v1371_v53  ;;  %v1075_v1 = vadd.f32 %v14849_v61, %v17694_v20  ;;  %v1069_v25 = vpop.f32.mrb[85].mxu0  ;;  %v1392_v53 = vmax.f32 %v1170_v14, 0.0  ;;  %v1395_v61 = vmax.f32 %v1185_v38, 0.0 }
 0x190   :  { %v18033_v2 = vmax.f32 %v17969_v15, %v1370_v10  ;;  %v1070_v6 = vadd.f32 %v17694_v20, %v1069_v25 }
 0x191   :  { %v1373_v5 = vmax.f32 %v1075_v1, 0.0  ;;  %v1394_v1 = vmax.f32 %v1180_v36, 0.0 }
 0x192   :  { %v1372_v18 = vmax.f32 %v1070_v6, 0.0  ;;  %v14852_v23 = vpop.f32.mrb[86].mxu0 }
 0x193   :  { %v18039_v26 = vmax.f32 %v17973_v41, %v1373_v5  ;;  %v1085_v28 = vadd.f32 %v14852_v23, %v17694_v20  ;;  %v1079_v9 = vpop.f32.mrb[87].mxu0  ;;  %v18054_v41 = vadd.f32 %v17722_v52, %v17694_v20  ;;  %v1250_v52 = vadd.f32 %v17694_v20, %v17779_v55 }
 0x194   :  { %v18045_v15 = vmax.f32 %v17977_v60, %v1372_v18  ;;  %v1080_v30 = vadd.f32 %v17694_v20, %v1079_v9 }
 0x195   :  { %v1375_v21 = vmax.f32 %v1085_v28, 0.0  ;;  %v1397_v6 = vmax.f32 %v18054_v41, 0.0  ;;  %v1408_v14 = vmax.f32 %v1250_v52, 0.0 }
 0x196   :  { %v1374_v45 = vmax.f32 %v1080_v30, 0.0  ;;  %v14855_v48 = vpop.f32.mrb[88].mxu0 }
 0x197   :  { %v18057_v40 = vmax.f32 %v17981_v57, %v1375_v21  ;;  %v1095_v60 = vadd.f32 %v14855_v48, %v17694_v20  ;;  %v1089_v50 = vpop.f32.mrb[89].mxu0  ;;  %v1190_v57 = vadd.f32 %v17694_v20, %v17727_v56  ;;  %v1265_v56 = vadd.f32 %v17788_v3, %v17694_v20 }
 0x198   :  { %v18063_v47 = vmax.f32 %v17985_v13, %v1374_v45  ;;  %v1090_v10 = vadd.f32 %v17694_v20, %v1089_v50  ;;  %v18077_v13 = vadd.f32 %v17694_v20, %v17735_v63  ;;  %v1260_v63 = vadd.f32 %v17694_v20, %v17793_v12 }
 0x199   :  { %v1377_v25 = vmax.f32 %v1095_v60, 0.0  ;;  %v1396_v30 = vmax.f32 %v1190_v57, 0.0  ;;  %v1399_v21 = vmax.f32 %v18073_v49, 0.0  ;;  %v1270_v3 = vadd.f32 %v17694_v20, %v17807_v39 }
 0x19a   :  { %v1376_v5 = vmax.f32 %v1090_v10, 0.0  ;;  %v14858_v18 = vpop.f32.mrb[90].mxu0  ;;  %v1411_v50 = vmax.f32 %v1265_v56, 0.0 }
 0x19b   :  { %v1489_v55 = vmax.f32 %v17989_v27, %v1377_v25  ;;  %v1105_v23 = vadd.f32 %v14858_v18, %v17694_v20  ;;  %v1099_v28 = vpop.f32.mrb[91].mxu0  ;;  %v1275_v27 = vadd.f32 %v17802_v32, %v17694_v20  ;;  %v1410_v32 = vmax.f32 %v1260_v63, 0.0 }
 0x19c   :  { %v1488_v9 = vmax.f32 %v17993_v44, %v1376_v5  ;;  %v1100_v59 = vadd.f32 %v17694_v20, %v1099_v28  ;;  %v1285_v28 = vadd.f32 %v17812_v54, %v17694_v20  ;;  %v1225_v54 = vadd.f32 %v17748_v11, %v17694_v20 }
 0x19d   :  { %v1505_v38 = vmax.f32 %v1489_v55, %v1393_v16  ;;  %v1379_v36 = vmax.f32 %v1105_v23, 0.0  ;;  %v1413_v49 = vmax.f32 %v1275_v27, 0.0  ;;  %v1220_v11 = vadd.f32 %v17694_v20, %v17752_v24 }
 0x19e   :  { %v1504_v41 = vmax.f32 %v1488_v9, %v1392_v53  ;;  %v1378_v45 = vmax.f32 %v1100_v59, 0.0  ;;  %v14861_v48 = vpop.f32.mrb[92].mxu0  ;;  %v1398_v53 = vmax.f32 %v18077_v13, 0.0  ;;  %v1215_v59 = vadd.f32 %v17738_v4, %v17694_v20 }
 0x19f   :  { %v1491_v44 = vmax.f32 %v17997_v46, %v1379_v36  ;;  %v1115_v60 = vadd.f32 %v14861_v48, %v17694_v20  ;;  %v1109_v12 = vpop.f32.mrb[93].mxu0  ;;  %v1521_v43 = vmax.f32 %v1505_v38, %v1409_v31  ;;  %v1412_v46 = vmax.f32 %v1270_v3, 0.0 }
 0x1a0   :  { %v1490_v16 = vmax.f32 %v18001_v62, %v1378_v45  ;;  %v1110_v10 = vadd.f32 %v17694_v20, %v1109_v12  ;;  %v1520_v52 = vmax.f32 %v1504_v41, %v1408_v14  ;;  %v1415_v45 = vmax.f32 %v1285_v28, 0.0 }
 0x1a1   :  { %v1507_v57 = vmax.f32 %v1491_v44, %v1395_v61  ;;  %v1381_v25 = vmax.f32 %v1115_v60, 0.0  ;;  %v1401_v60 = vmax.f32 %v1215_v59, 0.0 }
 0x1a2   :  { %v1506_v5 = vmax.f32 %v1490_v16, %v1394_v1  ;;  %v1380_v39 = vmax.f32 %v1110_v10, 0.0  ;;  %v14864_v18 = vpop.f32.mrb[94].mxu0  ;;  %v18097_v55 = vpack.c.bf16 %v1521_v43, %v1520_v52  ;;  %v1280_v1 = vadd.f32 %v17694_v20, %v17817_v17 }
 0x1a3   :  { %v1493_v23 = vmax.f32 %v18005_v0, %v1381_v25  ;;  %v1125_v31 = vadd.f32 %v14864_v18, %v17694_v20  ;;  %v1119_v62 = vpop.f32.mrb[95].mxu0  ;;  %v1523_v56 = vmax.f32 %v1507_v57, %v1411_v50  ;;  %v1210_v0 = vadd.f32 %v17694_v20, %v17743_v8 }
 0x1a4   :  { %v1492_v13 = vmax.f32 %v18009_v7, %v1380_v39  ;;  %v1120_v61 = vadd.f32 %v17694_v20, %v1119_v62  ;;  %v1522_v9 = vmax.f32 %v1506_v5, %v1410_v32  ;;  %v1403_v25 = vmax.f32 %v1225_v54, 0.0 }
 0x1a5   :  { %v1509_v14 = vmax.f32 %v1493_v23, %v1397_v6  ;;  %v1383_v63 = vmax.f32 %v1125_v31, 0.0  ;;  %v1414_v6 = vmax.f32 %v1280_v1, 0.0  ;;  %v1400_v12 = vmax.f32 %v1210_v0, 0.0 }
 0x1a6   :  { %v1508_v38 = vmax.f32 %v1492_v13, %v1396_v30  ;;  %v1382_v36 = vmax.f32 %v1120_v61, 0.0  ;;  %v14867_v7 = vpop.f32.mrb[96].mxu0  ;;  %v18113_v27 = vpack.c.bf16 %v1523_v56, %v1522_v9  ;;  %v1245_v9 = vadd.f32 %v17766_v35, %v17694_v20 }
 0x1a7   :  { %v1495_v41 = vmax.f32 %v18013_v19, %v1383_v63  ;;  %v1135_v17 = vadd.f32 %v14867_v7, %v17694_v20  ;;  %v1129_v48 = vpop.f32.mrb[97].mxu0  ;;  %v1525_v4 = vmax.f32 %v1509_v14, %v1413_v49  ;;  %v1240_v14 = vadd.f32 %v17694_v20, %v17770_v42 }
 0x1a8   :  { %v1494_v3 = vmax.f32 %v18017_v37, %v1382_v36  ;;  %v1130_v8 = vadd.f32 %v17694_v20, %v1129_v48  ;;  %v1524_v44 = vmax.f32 %v1508_v38, %v1412_v46  ;;  %v1230_v46 = vadd.f32 %v17694_v20, %v17761_v33 }
 0x1a9   :  { %v1511_v30 = vmax.f32 %v1495_v41, %v1399_v21  ;;  %v1385_v50 = vmax.f32 %v1135_v17, 0.0  ;;  %v1402_v21 = vmax.f32 %v1220_v11, 0.0  ;;  %v1407_v17 = vmax.f32 %v1245_v9, 0.0 }
 0x1aa   :  { %v1510_v43 = vmax.f32 %v1494_v3, %v1398_v53  ;;  %v1384_v19 = vmax.f32 %v1130_v8, 0.0  ;;  %v14870_v16 = vpop.f32.mrb[98].mxu0  ;;  %v18121_v10 = vpack.c.bf16 %v1525_v4, %v1524_v44  ;;  %v1235_v53 = vadd.f32 %v17756_v29, %v17694_v20 }
 0x1ab   :  { %v1497_v32 = vmax.f32 %v18021_v34, %v1385_v50  ;;  %v1145_v37 = vadd.f32 %v14870_v16, %v17694_v20  ;;  %v1139_v52 = vpop.f32.mrb[99].mxu0  ;;  %v1527_v57 = vmax.f32 %v1511_v30, %v1415_v45  ;;  %v1404_v0 = vmax.f32 %v1230_v46, 0.0  ;;  %v13370_v30 = vld [vmem:[%s20607_s3 + $0x18] sm:$0xff]   ;;  %v13372_v16 = vld [vmem:[%s20607_s3 + $0x28] sm:$0xff]  }
 0x1ac   :  { %v1496_v49 = vmax.f32 %v18025_v51, %v1384_v19  ;;  %v1140_v5 = vadd.f32 %v17694_v20, %v1139_v52  ;;  %v1526_v24 = vmax.f32 %v1510_v43, %v1414_v6  ;;  %v1405_v29 = vmax.f32 %v1235_v53, 0.0 }
 0x1ad   :  { %v1513_v39 = vmax.f32 %v1497_v32, %v1401_v60  ;;  %v1387_v18 = vmax.f32 %v1145_v37, 0.0  ;;  %v1406_v4 = vmax.f32 %v1240_v14, 0.0  ;;  %v12519_v43 = vunpack.c.h.bf16 %v13370_v30  ;;  %v13373_v37 = vld [vmem:[%s20607_s3 + $0x30] sm:$0xff]   ;;  %v13382_v14 = vld [vmem:[%s20607_s3 + $0x78] sm:$0xff]  }
 0x1ae   :  { %v1512_v34 = vmax.f32 %v1496_v49, %v1400_v12  ;;  %v1386_v23 = vmax.f32 %v1140_v5, 0.0  ;;  %v14873_v31 = vpop.f32.mrb[100].mxu0  ;;  %v16532_v62 = vpack.c.bf16 %v1527_v57, %v1526_v24  ;;  %v12518_v12 = vunpack.c.l.bf16 %v13370_v30  ;;  %v13375_v24 = vld [vmem:[%s20607_s3 + $0x40] sm:$0xff]  }
 0x1af   :  { %v1499_v28 = vmax.f32 %v18029_v58, %v1387_v18  ;;  %v1155_v51 = vadd.f32 %v14873_v31, %v17694_v20  ;;  %v1149_v56 = vpop.f32.mrb[101].mxu0  ;;  %v12526_v32 = vunpack.c.l.bf16 %v13372_v16  ;;  %v12527_v52 = vunpack.c.h.bf16 %v13372_v16 }
 0x1b0   :  { %v1498_v13 = vmax.f32 %v18033_v2, %v1386_v23  ;;  %v1150_v61 = vadd.f32 %v17694_v20, %v1149_v56  ;;  %v16504_v1 = vpack.c.bf16 %v1513_v39, %v1512_v34  ;;  %v12530_v57 = vunpack.c.l.bf16 %v13373_v37  ;;  %v13376_v39 = vld [vmem:[%s20607_s3 + $0x48] sm:$0xff]   ;;  %v13377_v34 = vld [vmem:[%s20607_s3 + $0x50] sm:$0xff]   ;;  %v13379_v56 = vld [vmem:[%s20607_s3 + $0x60] sm:$0xff]  }
 0x1b1   :  { %v1515_v59 = vmax.f32 %v1499_v28, %v1403_v25  ;;  %v1389_v33 = vmax.f32 %v1155_v51, 0.0  ;;  %v13374_v25 = vld [vmem:[%s20607_s3 + $0x38] sm:$0xff]   ;;  %v12531_v49 = vunpack.c.h.bf16 %v13373_v37  ;;  %v12538_v53 = vunpack.c.l.bf16 %v13375_v24 }
 0x1b2   :  { %v1514_v63 = vmax.f32 %v1498_v13, %v1402_v21  ;;  %v1388_v58 = vmax.f32 %v1150_v61, 0.0  ;;  %v14876_v54 = vpop.f32.mrb[102].mxu0  ;;  %16505 = vmatprep.subr.bf16.mxu1 %v16504_v1  ;;  %v12534_v5 = vunpack.c.l.bf16 %v13374_v25  ;;  %v12535_v21 = vunpack.c.h.bf16 %v13374_v25 }
 0x1b3   :  { %v1501_v38 = vmax.f32 %v18039_v26, %v1389_v33  ;;  %v1165_v2 = vadd.f32 %v14876_v54, %v17694_v20  ;;  %v1159_v36 = vpop.f32.mrb[103].mxu0  ;;  %16507 = vmatpush3.bf16.msra.mxu1 %v16504_v1  ;;  %v12539_v18 = vunpack.c.h.bf16 %v13375_v24  ;;  %v12542_v46 = vunpack.c.l.bf16 %v13376_v39  ;;  %v13380_v1 = vld [vmem:[%s20607_s3 + $0x68] sm:$0xff]   ;;  %v13383_v54 = vld [vmem:[%s20607_s3 + $0x80] sm:$0xff]  }
 0x1b4   :  { %v1500_v7 = vmax.f32 %v18045_v15, %v1388_v58  ;;  %v1160_v35 = vadd.f32 %v17694_v20, %v1159_v36  ;;  %v16508_v41 = vpack.c.bf16 %v1515_v59, %v1514_v63  ;;  %v13368_v20 = vld [vmem:[%s20607_s3 + $0x8] sm:$0xff]   ;;  %v12543_v23 = vunpack.c.h.bf16 %v13376_v39  ;;  %v13381_v59 = vld [vmem:[%s20607_s3 + $0x70] sm:$0xff]  }
 0x1b5   :  { %v1517_v45 = vmax.f32 %v1501_v38, %v1405_v29  ;;  %v1391_v48 = vmax.f32 %v1165_v2, 0.0  ;;  %v12511_v11 = vunpack.c.h.bf16 %v13368_v20  ;;  %v12546_v31 = vunpack.c.l.bf16 %v13377_v34  ;;  %v13384_v36 = vld [vmem:[%s20607_s3 + $0x88] sm:$0xff]  }
 0x1b6   :  { %v1516_v42 = vmax.f32 %v1500_v7, %v1404_v0  ;;  %v1390_v3 = vmax.f32 %v1160_v35, 0.0  ;;  %16509 = vmatprep.subr.bf16.mxu1 %v16508_v41  ;;  %v12547_v28 = vunpack.c.h.bf16 %v13377_v34  ;;  %v12554_v61 = vunpack.c.l.bf16 %v13379_v56  ;;  %v12009_v34 = vld [vmem:[%s20608_s4 + $0x8] sm:$0xff] }
 0x1b7   :  { %v1503_v8 = vmax.f32 %v18057_v40, %v1391_v48  ;;  %16511 = vmatpush3.bf16.msra.mxu1 %v16508_v41  ;;  %v12507_v40 = vunpack.c.h.bf16 %v17897_v22  ;;  %v13371_v22 = vld [vmem:[%s20607_s3 + $0x20] sm:$0xff]   ;;  %v12555_v29 = vunpack.c.h.bf16 %v13379_v56  ;;  %v12558_v9 = vunpack.c.l.bf16 %v13380_v1  ;;  %v13385_v41 = vld [vmem:[%s20607_s3 + $0x90] sm:$0xff]   ;;  %v13386_v48 = vld [vmem:[%s20607_s3 + $0x98] sm:$0xff]   ;;  %15593 = vmatprep.subr.mxu0 %v12009_v34 }
 0x1b8   :  { %v1502_v26 = vmax.f32 %v18063_v47, %v1390_v3  ;;  %v16512_v6 = vpack.c.bf16 %v1517_v45, %v1516_v42  ;;  %v12510_v47 = vunpack.c.l.bf16 %v13368_v20  ;;  %v12522_v19 = vunpack.c.l.bf16 %v13371_v22  ;;  %v13387_v3 = vld [vmem:[%s20607_s3 + $0xa0] sm:$0xff]   ;;  %15594 = vmatpush3.msra.mxu0 %v12009_v34  ;;  %v13400_v56 = vld [vmem:[%s20607_s3 + $0x108] sm:$0xff]  }
 0x1b9   :  { %v1519_v44 = vmax.f32 %v1503_v8, %v1407_v17  ;;  %v12559_v33 = vunpack.c.h.bf16 %v13380_v1  ;;  %v12562_v0 = vunpack.c.l.bf16 %v13381_v59  ;;  %v12563_v63 = vunpack.c.h.bf16 %v13381_v59  ;;  %v13401_v1 = vld [vmem:[%s20607_s3 + $0x110] sm:$0xff]   ;;  %v13402_v59 = vld [vmem:[%s20607_s3 + $0x118] sm:$0xff]   ;;  %v13419_v34 = vld [vmem:[%s20607_s3 + $0x1a0] sm:$0xff]  }
 0x1ba   :  { %v1518_v60 = vmax.f32 %v1502_v26, %v1406_v4  ;;  %16513 = vmatprep.subr.bf16.mxu1 %v16512_v6  ;;  %v12566_v58 = vunpack.c.l.bf16 %v13382_v14  ;;  %v12567_v38 = vunpack.c.h.bf16 %v13382_v14  ;;  %v12570_v2 = vunpack.c.l.bf16 %v13383_v54  ;;  %v13403_v14 = vld [vmem:[%s20607_s3 + $0x120] sm:$0xff]  }
 0x1bb   :  { %16515 = vmatpush3.bf16.msra.mxu1 %v16512_v6  ;;  %v12571_v7 = vunpack.c.h.bf16 %v13383_v54  ;;  %v12574_v35 = vunpack.c.l.bf16 %v13384_v36  ;;  %v12575_v17 = vunpack.c.h.bf16 %v13384_v36  ;;  %v12578_v45 = vunpack.c.l.bf16 %v13385_v41  ;;  %v13388_v6 = vld [vmem:[%s20607_s3 + $0xa8] sm:$0xff]   ;;  %v13405_v36 = vld [vmem:[%s20607_s3 + $0x130] sm:$0xff]  }
 0x1bc   :  { %v16516_v15 = vpack.c.bf16 %v1519_v44, %v1518_v60  ;;  %v12579_v4 = vunpack.c.h.bf16 %v13385_v41  ;;  %v12582_v42 = vunpack.c.l.bf16 %v13386_v48  ;;  %v12583_v8 = vunpack.c.h.bf16 %v13386_v48  ;;  %v13404_v54 = vld [vmem:[%s20607_s3 + $0x128] sm:$0xff]   ;;  %v13406_v41 = vld [vmem:[%s20607_s3 + $0x138] sm:$0xff]  }
 0x1bd   :  { %v12586_v26 = vunpack.c.l.bf16 %v13387_v3  ;;  %v12587_v44 = vunpack.c.h.bf16 %v13387_v3  ;;  %v12590_v60 = vunpack.c.l.bf16 %v13388_v6  ;;  %v12591_v20 = vunpack.c.h.bf16 %v13388_v6 }
 0x1be   :  { %16517 = vmatprep.subr.bf16.mxu1 %v16516_v15  ;;  %v12662_v48 = vunpack.c.l.bf16 %v13406_v41 }
 0x1bf   :  { %16519 = vmatpush3.bf16.msra.mxu1 %v16516_v15  ;;  %v13389_v15 = vld [vmem:[%s20607_s3 + $0xb0] sm:$0xff]  }
 0x1c0   :  { %16521 = vmatprep.subr.bf16.mxu1 %v18097_v55 }
 0x1c3   :  { %16523 = vmatpush3.bf16.msra.mxu1 %v18097_v55  ;;  %v13369_v55 = vld [vmem:[%s20607_s3 + $0x10] sm:$0xff]  }
 0x1c4   :  { %16525 = vmatprep.subr.bf16.mxu1 %v18113_v27  ;;  %v12515_v50 = vunpack.c.h.bf16 %v13369_v55 }
 0x1c7   :  { %16527 = vmatpush3.bf16.msra.mxu1 %v18113_v27  ;;  %v12514_v27 = vunpack.c.l.bf16 %v13369_v55  ;;  %v12595_v55 = vunpack.c.h.bf16 %v13389_v15 }
 0x1c8   :  { %16529 = vmatprep.subr.bf16.mxu1 %v18121_v10 }
 0x1cb   :  { %16531 = vmatpush3.bf16.msra.mxu1 %v18121_v10  ;;  %v12523_v10 = vunpack.c.h.bf16 %v13371_v22 }
 0x1cc   :  { %16533 = vmatprep.subr.bf16.mxu1 %v16532_v62 }
 0x1cf   :  { %16535 = vmatpush3.bf16.msra.mxu1 %v16532_v62  ;;  %v13378_v62 = vld [vmem:[%s20607_s3 + $0x58] sm:$0xff]  }
 0x1d0   :  { %v12550_v51 = vunpack.c.l.bf16 %v13378_v62  ;;  %v12551_v13 = vunpack.c.h.bf16 %v13378_v62  ;;  %v13399_v62 = vld [vmem:[%s20607_s3 + $0x100] sm:$0xff]  }
 0x1d2   :  { %14946 = vmatmul.mubr.f32.vlgmr.msra.gmra.mrb[24].mxu1 %v12507_v40  ;;  %v12594_v40 = vunpack.c.l.bf16 %v13389_v15 }
 0x1d3   :  { %14948 = vmatprep.mubr.f32.mxu1 %v12510_v47  ;;  %v13390_v47 = vld [vmem:[%s20607_s3 + $0xb8] sm:$0xff]  }
 0x1d4   :  { %v12599_v30 = vunpack.c.h.bf16 %v13390_v47 }
 0x1d6   :  { %14949 = vmatmul.mubr.f32.gmra.mrb[26].mxu1 %v12511_v11  ;;  %v12598_v11 = vunpack.c.l.bf16 %v13390_v47 }
 0x1d7   :  { %14951 = vmatprep.mubr.f32.mxu1 %v12514_v27  ;;  %v13391_v27 = vld [vmem:[%s20607_s3 + $0xc0] sm:$0xff]  }
 0x1d8   :  { %v12603_v22 = vunpack.c.h.bf16 %v13391_v27 }
 0x1da   :  { %14952 = vmatmul.mubr.f32.gmra.mrb[28].mxu1 %v12515_v50  ;;  %v12602_v50 = vunpack.c.l.bf16 %v13391_v27 }
 0x1db   :  { %14954 = vmatprep.mubr.f32.mxu1 %v12518_v12  ;;  %v13392_v12 = vld [vmem:[%s20607_s3 + $0xc8] sm:$0xff]  }
 0x1dc   :  { %v12607_v16 = vunpack.c.h.bf16 %v13392_v12 }
 0x1de   :  { %14955 = vmatmul.mubr.f32.gmra.mrb[30].mxu1 %v12519_v43  ;;  %v12606_v43 = vunpack.c.l.bf16 %v13392_v12 }
 0x1df   :  { %14957 = vmatprep.mubr.f32.mxu1 %v12522_v19  ;;  %v13393_v19 = vld [vmem:[%s20607_s3 + $0xd0] sm:$0xff]  }
 0x1e0   :  { %v12611_v37 = vunpack.c.h.bf16 %v13393_v19 }
 0x1e2   :  { %14958 = vmatmul.mubr.f32.gmra.mrb[32].mxu1 %v12523_v10  ;;  %v12610_v10 = vunpack.c.l.bf16 %v13393_v19 }
 0x1e3   :  { %14960 = vmatprep.mubr.f32.mxu1 %v12526_v32  ;;  %v13394_v32 = vld [vmem:[%s20607_s3 + $0xd8] sm:$0xff]  }
 0x1e4   :  { %v12615_v25 = vunpack.c.h.bf16 %v13394_v32 }
 0x1e6   :  { %14961 = vmatmul.mubr.f32.gmra.mrb[34].mxu1 %v12527_v52  ;;  %v12614_v52 = vunpack.c.l.bf16 %v13394_v32 }
 0x1e7   :  { %14963 = vmatprep.mubr.f32.mxu1 %v12530_v57  ;;  %v13395_v57 = vld [vmem:[%s20607_s3 + $0xe0] sm:$0xff]  }
 0x1e8   :  { %v12619_v24 = vunpack.c.h.bf16 %v13395_v57 }
 0x1ea   :  { %14964 = vmatmul.mubr.f32.gmra.mrb[36].mxu1 %v12531_v49  ;;  %v12618_v49 = vunpack.c.l.bf16 %v13395_v57 }
 0x1eb   :  { %14966 = vmatprep.mubr.f32.mxu1 %v12534_v5  ;;  %v13396_v5 = vld [vmem:[%s20607_s3 + $0xe8] sm:$0xff]  }
 0x1ec   :  { %v12623_v39 = vunpack.c.h.bf16 %v13396_v5 }
 0x1ee   :  { %14967 = vmatmul.mubr.f32.gmra.mrb[38].mxu1 %v12535_v21  ;;  %v12622_v21 = vunpack.c.l.bf16 %v13396_v5 }
 0x1ef   :  { %14969 = vmatprep.mubr.f32.mxu1 %v12538_v53  ;;  %v13397_v53 = vld [vmem:[%s20607_s3 + $0xf0] sm:$0xff]  }
 0x1f2   :  { %14970 = vmatmul.mubr.f32.gmra.mrb[40].mxu1 %v12539_v18  ;;  %v12626_v18 = vunpack.c.l.bf16 %v13397_v53 }
 0x1f3   :  { %14972 = vmatprep.mubr.f32.mxu1 %v12542_v46  ;;  %v13398_v46 = vld [vmem:[%s20607_s3 + $0xf8] sm:$0xff]  }
 0x1f6   :  { %14973 = vmatmul.mubr.f32.gmra.mrb[42].mxu1 %v12543_v23  ;;  %v12627_v23 = vunpack.c.h.bf16 %v13397_v53 }
 0x1f7   :  { %14975 = vmatprep.mubr.f32.mxu1 %v12546_v31  ;;  %v12630_v31 = vunpack.c.l.bf16 %v13398_v46 }
 0x1fa   :  { %14976 = vmatmul.mubr.f32.gmra.mrb[44].mxu1 %v12547_v28  ;;  %v12631_v28 = vunpack.c.h.bf16 %v13398_v46 }
 0x1fb   :  { %14978 = vmatprep.mubr.f32.mxu1 %v12550_v51  ;;  %v12634_v51 = vunpack.c.l.bf16 %v13399_v62 }
 0x1fe   :  { %14979 = vmatmul.mubr.f32.gmra.mrb[46].mxu1 %v12551_v13  ;;  %v12635_v13 = vunpack.c.h.bf16 %v13399_v62  ;;  %v13420_v62 = vld [vmem:[%s20607_s3 + $0x1a8] sm:$0xff]  }
 0x1ff   :  { %14981 = vmatprep.mubr.f32.mxu1 %v12554_v61  ;;  %v12638_v61 = vunpack.c.l.bf16 %v13400_v56 }
 0x202   :  { %14982 = vmatmul.mubr.f32.gmra.mrb[48].mxu1 %v12555_v29  ;;  %v12639_v29 = vunpack.c.h.bf16 %v13400_v56  ;;  %v13421_v56 = vld [vmem:[%s20607_s3 + $0x1b0] sm:$0xff]  }
 0x203   :  { %14984 = vmatprep.mubr.f32.mxu1 %v12558_v9  ;;  %v12642_v9 = vunpack.c.l.bf16 %v13401_v1 }
 0x206   :  { %14985 = vmatmul.mubr.f32.gmra.mrb[50].mxu1 %v12559_v33  ;;  %v12643_v33 = vunpack.c.h.bf16 %v13401_v1  ;;  %v13422_v1 = vld [vmem:[%s20607_s3 + $0x1b8] sm:$0xff]  }
 0x207   :  { %14987 = vmatprep.mubr.f32.mxu1 %v12562_v0  ;;  %v12646_v0 = vunpack.c.l.bf16 %v13402_v59 }
 0x20a   :  { %14988 = vmatmul.mubr.f32.gmra.mrb[52].mxu1 %v12563_v63  ;;  %v12647_v63 = vunpack.c.h.bf16 %v13402_v59  ;;  %v12723_v59 = vunpack.c.h.bf16 %v13421_v56 }
 0x20b   :  { %14990 = vmatprep.mubr.f32.mxu1 %v12566_v58  ;;  %v12650_v58 = vunpack.c.l.bf16 %v13403_v14 }
 0x20e   :  { %14991 = vmatmul.mubr.f32.gmra.mrb[54].mxu1 %v12567_v38  ;;  %v12651_v38 = vunpack.c.h.bf16 %v13403_v14 }
 0x20f   :  { %14993 = vmatprep.mubr.f32.mxu1 %v12570_v2  ;;  %v12654_v2 = vunpack.c.l.bf16 %v13404_v54 }
 0x212   :  { %14994 = vmatmul.mubr.f32.gmra.mrb[56].mxu1 %v12571_v7  ;;  %v12655_v7 = vunpack.c.h.bf16 %v13404_v54 }
 0x213   :  { %14996 = vmatprep.mubr.f32.mxu1 %v12574_v35  ;;  %v12658_v35 = vunpack.c.l.bf16 %v13405_v36 }
 0x216   :  { %14997 = vmatmul.mubr.f32.gmra.mrb[58].mxu1 %v12575_v17  ;;  %v18275_v17 = vld [vmem:[%s20608_s4] sm:$0xff] }
 0x217   :  { %14999 = vmatprep.mubr.f32.mxu1 %v12578_v45  ;;  %v12659_v45 = vunpack.c.h.bf16 %v13405_v36  ;;  %15619 = vmatprep.subr.mxu0 %v18275_v17 }
 0x21a   :  { %15000 = vmatmul.mubr.f32.gmra.mrb[60].mxu1 %v12579_v4  ;;  %v13407_v4 = vld [vmem:[%s20607_s3 + $0x140] sm:$0xff]  }
 0x21b   :  { %15002 = vmatprep.mubr.f32.mxu1 %v12582_v42  ;;  %v12663_v42 = vunpack.c.h.bf16 %v13406_v41  ;;  %v12666_v3 = vunpack.c.l.bf16 %v13407_v4  ;;  %v13425_v41 = vld [vmem:[%s20607_s3 + $0x1d0] sm:$0xff]  }
 0x21e   :  { %15003 = vmatmul.mubr.f32.gmra.mrb[62].mxu1 %v12583_v8  ;;  %v13408_v8 = vld [vmem:[%s20607_s3 + $0x148] sm:$0xff]  }
 0x21f   :  { %15005 = vmatprep.mubr.f32.mxu1 %v12586_v26  ;;  %v12667_v26 = vunpack.c.h.bf16 %v13407_v4  ;;  %v12670_v6 = vunpack.c.l.bf16 %v13408_v8 }
 0x222   :  { %15006 = vmatmul.mubr.f32.gmra.mrb[64].mxu1 %v12587_v44  ;;  %v13409_v44 = vld [vmem:[%s20607_s3 + $0x150] sm:$0xff]  }
 0x223   :  { %15008 = vmatprep.mubr.f32.mxu1 %v12590_v60  ;;  %v12671_v60 = vunpack.c.h.bf16 %v13408_v8  ;;  %v12674_v15 = vunpack.c.l.bf16 %v13409_v44 }
 0x226   :  { %15009 = vmatmul.mubr.f32.gmra.mrb[66].mxu1 %v12591_v20  ;;  %v13410_v20 = vld [vmem:[%s20607_s3 + $0x158] sm:$0xff]  }
 0x227   :  { %15011 = vmatprep.mubr.f32.mxu1 %v12594_v40  ;;  %v12675_v40 = vunpack.c.h.bf16 %v13409_v44  ;;  %v12678_v47 = vunpack.c.l.bf16 %v13410_v20 }
 0x22a   :  { %15012 = vmatmul.mubr.f32.gmra.mrb[68].mxu1 %v12595_v55  ;;  %v13411_v55 = vld [vmem:[%s20607_s3 + $0x160] sm:$0xff]  }
 0x22b   :  { %15014 = vmatprep.mubr.f32.mxu1 %v12598_v11  ;;  %v12679_v11 = vunpack.c.h.bf16 %v13410_v20  ;;  %v12682_v27 = vunpack.c.l.bf16 %v13411_v55 }
 0x22e   :  { %15015 = vmatmul.mubr.f32.gmra.mrb[70].mxu1 %v12599_v30  ;;  %v13412_v30 = vld [vmem:[%s20607_s3 + $0x168] sm:$0xff]  }
 0x22f   :  { %15017 = vmatprep.mubr.f32.mxu1 %v12602_v50  ;;  %v12683_v50 = vunpack.c.h.bf16 %v13411_v55  ;;  %v12686_v12 = vunpack.c.l.bf16 %v13412_v30  ;;  %v13428_v55 = vld [vmem:[%s20607_s3 + $0x1e8] sm:$0xff]  }
 0x232   :  { %15018 = vmatmul.mubr.f32.gmra.mrb[72].mxu1 %v12603_v22  ;;  %v13413_v22 = vld [vmem:[%s20607_s3 + $0x170] sm:$0xff]  }
 0x233   :  { %15020 = vmatprep.mubr.f32.mxu1 %v12606_v43  ;;  %v12687_v43 = vunpack.c.h.bf16 %v13412_v30  ;;  %v12690_v19 = vunpack.c.l.bf16 %v13413_v22 }
 0x236   :  { %15021 = vmatmul.mubr.f32.gmra.mrb[74].mxu1 %v12607_v16  ;;  %v13414_v16 = vld [vmem:[%s20607_s3 + $0x178] sm:$0xff]  }
 0x237   :  { %15023 = vmatprep.mubr.f32.mxu1 %v12610_v10  ;;  %v12691_v10 = vunpack.c.h.bf16 %v13413_v22  ;;  %v12694_v32 = vunpack.c.l.bf16 %v13414_v16 }
 0x23a   :  { %15024 = vmatmul.mubr.f32.gmra.mrb[76].mxu1 %v12611_v37  ;;  %v13415_v37 = vld [vmem:[%s20607_s3 + $0x180] sm:$0xff]  }
 0x23b   :  { %15026 = vmatprep.mubr.f32.mxu1 %v12614_v52  ;;  %v12695_v52 = vunpack.c.h.bf16 %v13414_v16  ;;  %v12698_v57 = vunpack.c.l.bf16 %v13415_v37 }
 0x23e   :  { %15027 = vmatmul.mubr.f32.gmra.mrb[78].mxu1 %v12615_v25  ;;  %v13416_v25 = vld [vmem:[%s20607_s3 + $0x188] sm:$0xff]  }
 0x23f   :  { %15029 = vmatprep.mubr.f32.mxu1 %v12618_v49  ;;  %v12699_v49 = vunpack.c.h.bf16 %v13415_v37  ;;  %v12702_v5 = vunpack.c.l.bf16 %v13416_v25 }
 0x242   :  { %15030 = vmatmul.mubr.f32.gmra.mrb[80].mxu1 %v12619_v24  ;;  %v13417_v24 = vld [vmem:[%s20607_s3 + $0x190] sm:$0xff]  }
 0x243   :  { %15032 = vmatprep.mubr.f32.mxu1 %v12622_v21  ;;  %v12703_v21 = vunpack.c.h.bf16 %v13416_v25  ;;  %v12706_v53 = vunpack.c.l.bf16 %v13417_v24  ;;  %v18386_v25 = vld [vmem:[%s20608_s4 + $0x10] sm:$0xff] }
 0x246   :  { %15033 = vmatmul.mubr.f32.gmra.mrb[82].mxu1 %v12623_v39  ;;  %v13418_v39 = vld [vmem:[%s20607_s3 + $0x198] sm:$0xff]  }
 0x247   :  { %15035 = vmatprep.mubr.f32.mxu1 %v12626_v18  ;;  %v12707_v18 = vunpack.c.h.bf16 %v13417_v24  ;;  %v12710_v46 = vunpack.c.l.bf16 %v13418_v39 }
 0x24a   :  { %15036 = vmatmul.mubr.f32.gmra.mrb[84].mxu1 %v12627_v23  ;;  %v12711_v23 = vunpack.c.h.bf16 %v13418_v39  ;;  %v13432_v39 = vld [vmem:[%s20607_s3 + $0x208] sm:$0xff]  }
 0x24b   :  { %15038 = vmatprep.mubr.f32.mxu1 %v12630_v31  ;;  %v12714_v31 = vunpack.c.l.bf16 %v13419_v34 }
 0x24e   :  { %15039 = vmatmul.mubr.f32.gmra.mrb[86].mxu1 %v12631_v28  ;;  %v12715_v28 = vunpack.c.h.bf16 %v13419_v34 }
 0x24f   :  { %15041 = vmatprep.mubr.f32.mxu1 %v12634_v51  ;;  %v12718_v51 = vunpack.c.l.bf16 %v13420_v62 }
 0x252   :  { %15042 = vmatmul.mubr.f32.gmra.mrb[88].mxu1 %v12635_v13  ;;  %v12719_v13 = vunpack.c.h.bf16 %v13420_v62 }
 0x253   :  { %15044 = vmatprep.mubr.f32.mxu1 %v12638_v61  ;;  %v12722_v61 = vunpack.c.l.bf16 %v13421_v56  ;;  %v13434_v56 = vld [vmem:[%s20607_s3 + $0x218] sm:$0xff]  }
 0x256   :  { %15045 = vmatmul.mubr.f32.gmra.mrb[90].mxu1 %v12639_v29 }
 0x257   :  { %15047 = vmatprep.mubr.f32.mxu1 %v12642_v9 }
 0x25a   :  { %15048 = vmatmul.mubr.f32.gmra.mrb[92].mxu1 %v12643_v33  ;;  %v12726_v33 = vunpack.c.l.bf16 %v13422_v1 }
 0x25b   :  { %15050 = vmatprep.mubr.f32.mxu1 %v12646_v0  ;;  %v13423_v0 = vld [vmem:[%s20607_s3 + $0x1c0] sm:$0xff]  }
 0x25c   :  { %v12730_v54 = vunpack.c.l.bf16 %v13423_v0 }
 0x25e   :  { %15051 = vmatmul.mubr.f32.gmra.mrb[94].mxu1 %v12647_v63 }
 0x25f   :  { %15053 = vmatprep.mubr.f32.mxu1 %v12650_v58  ;;  %v12727_v58 = vunpack.c.h.bf16 %v13422_v1 }
 0x262   :  { %15054 = vmatmul.mubr.f32.gmra.mrb[96].mxu1 %v12651_v38  ;;  %v13424_v38 = vld [vmem:[%s20607_s3 + $0x1c8] sm:$0xff]  }
 0x263   :  { %15056 = vmatprep.mubr.f32.mxu1 %v12654_v2  ;;  %v12735_v4 = vunpack.c.h.bf16 %v13424_v38 }
 0x266   :  { %15057 = vmatmul.mubr.f32.gmra.mrb[98].mxu1 %v12655_v7  ;;  %v12731_v7 = vunpack.c.h.bf16 %v13423_v0 }
 0x267   :  { %15059 = vmatprep.mubr.f32.mxu1 %v12658_v35  ;;  %v12734_v35 = vunpack.c.l.bf16 %v13424_v38 }
 0x26a   :  { %15060 = vmatmul.mubr.f32.gmra.mrb[100].mxu1 %v12659_v45 }
 0x26b   :  { %15062 = vmatprep.mubr.f32.mxu1 %v12662_v48 }
 0x26e   :  { %15063 = vmatmul.mubr.f32.gmra.mrb[102].mxu1 %v12663_v42  ;;  %v12738_v42 = vunpack.c.l.bf16 %v13425_v41 }
 0x26f   :  { %15065 = vmatprep.mubr.f32.mxu1 %v12666_v3  ;;  %v13426_v3 = vld [vmem:[%s20607_s3 + $0x1d8] sm:$0xff]  }
 0x270   :  { %v12742_v44 = vunpack.c.l.bf16 %v13426_v3 }
 0x272   :  { %15066 = vmatmul.mubr.f32.gmra.mrb[104].mxu1 %v12667_v26 }
 0x273   :  { %15068 = vmatprep.mubr.f32.mxu1 %v12670_v6  ;;  %v12739_v6 = vunpack.c.h.bf16 %v13425_v41 }
 0x276   :  { %15069 = vmatmul.mubr.f32.gmra.mrb[106].mxu1 %v12671_v60  ;;  %v13427_v60 = vld [vmem:[%s20607_s3 + $0x1e0] sm:$0xff]  }
 0x277   :  { %15071 = vmatprep.mubr.f32.mxu1 %v12674_v15  ;;  %v12747_v30 = vunpack.c.h.bf16 %v13427_v60 }
 0x27a   :  { %15072 = vmatmul.mubr.f32.gmra.mrb[108].mxu1 %v12675_v40  ;;  %v12743_v40 = vunpack.c.h.bf16 %v13426_v3  ;;  %v13437_v3 = vld [vmem:[%s20607_s3 + $0x230] sm:$0xff]  }
 0x27b   :  { %15074 = vmatprep.mubr.f32.mxu1 %v12678_v47  ;;  %v12746_v47 = vunpack.c.l.bf16 %v13427_v60 }
 0x27e   :  { %15075 = vmatmul.mubr.f32.gmra.mrb[110].mxu1 %v12679_v11 }
 0x27f   :  { %15077 = vmatprep.mubr.f32.mxu1 %v12682_v27 }
 0x282   :  { %15078 = vmatmul.mubr.f32.gmra.mrb[112].mxu1 %v12683_v50  ;;  %v12750_v50 = vunpack.c.l.bf16 %v13428_v55 }
 0x283   :  { %15080 = vmatprep.mubr.f32.mxu1 %v12686_v12  ;;  %v13429_v12 = vld [vmem:[%s20607_s3 + $0x1f0] sm:$0xff]  }
 0x284   :  { %v12754_v16 = vunpack.c.l.bf16 %v13429_v12 }
 0x286   :  { %15081 = vmatmul.mubr.f32.gmra.mrb[114].mxu1 %v12687_v43 }
 0x287   :  { %15083 = vmatprep.mubr.f32.mxu1 %v12690_v19  ;;  %v12751_v19 = vunpack.c.h.bf16 %v13428_v55 }
 0x28a   :  { %15084 = vmatmul.mubr.f32.gmra.mrb[116].mxu1 %v12691_v10  ;;  %v13430_v10 = vld [vmem:[%s20607_s3 + $0x1f8] sm:$0xff]  }
 0x28b   :  { %15086 = vmatprep.mubr.f32.mxu1 %v12694_v32 }
 0x28e   :  { %15087 = vmatmul.mubr.f32.gmra.mrb[118].mxu1 %v12695_v52  ;;  %v12755_v52 = vunpack.c.h.bf16 %v13429_v12 }
 0x28f   :  { %15089 = vmatprep.mubr.f32.mxu1 %v12698_v57  ;;  %v12758_v57 = vunpack.c.l.bf16 %v13430_v10 }
 0x292   :  { %15090 = vmatmul.mubr.f32.gmra.mrb[120].mxu1 %v12699_v49  ;;  %v13431_v49 = vld [vmem:[%s20607_s3 + $0x200] sm:$0xff]  }
 0x293   :  { %15092 = vmatprep.mubr.f32.mxu1 %v12702_v5  ;;  %v12763_v34 = vunpack.c.h.bf16 %v13431_v49 }
 0x296   :  { %15093 = vmatmul.mubr.f32.gmra.mrb[122].mxu1 %v12703_v21  ;;  %v12759_v21 = vunpack.c.h.bf16 %v13430_v10 }
 0x297   :  { %15095 = vmatprep.mubr.f32.mxu1 %v12706_v53  ;;  %v12762_v53 = vunpack.c.l.bf16 %v13431_v49 }
 0x29a   :  { %15096 = vmatmul.mubr.f32.gmra.mrb[124].mxu1 %v12707_v18 }
 0x29b   :  { %15098 = vmatprep.mubr.f32.mxu1 %v12710_v46 }
 0x29e   :  { %15099 = vmatmul.mubr.f32.gmra.mrb[126].mxu1 %v12711_v23  ;;  %v13433_v23 = vld [vmem:[%s20607_s3 + $0x210] sm:$0xff]  }
 0x29f   :  { %15101 = vmatprep.mubr.f32.mxu1 %v12714_v31  ;;  %v12771_v1 = vunpack.c.h.bf16 %v13433_v23 }
 0x2a2   :  { %15102 = vmatmul.mubr.f32.gmra.mrb[128].mxu1 %v12715_v28  ;;  %v12767_v28 = vunpack.c.h.bf16 %v13432_v39 }
 0x2a3   :  { %15104 = vmatprep.mubr.f32.mxu1 %v12718_v51  ;;  %v12770_v51 = vunpack.c.l.bf16 %v13433_v23 }
 0x2a5   :  { %v18326_v29 = vpop.f32.mrb[24].mxu1 }
 0x2a6   :  { %v18328_v9 = vpop.f32.mrb[25].mxu1  ;;  %15105 = vmatmul.mubr.f32.gmra.mrb[130].mxu1 %v12719_v13 }
 0x2a7   :  { %15107 = vmatprep.mubr.f32.mxu1 %v12722_v61 }
 0x2a9   :  { %v18333_v14 = vpop.f32.mrb[26].mxu1 }
 0x2aa   :  { %v18335_v63 = vpop.f32.mrb[27].mxu1  ;;  %15108 = vmatmul.mubr.f32.gmra.mrb[132].mxu1 %v12723_v59  ;;  %v12774_v59 = vunpack.c.l.bf16 %v13434_v56 }
 0x2ab   :  { %15110 = vmatprep.mubr.f32.mxu1 %v12726_v33  ;;  %v13435_v33 = vld [vmem:[%s20607_s3 + $0x220] sm:$0xff]  }
 0x2ac   :  { %v12778_v38 = vunpack.c.l.bf16 %v13435_v33 }
 0x2ad   :  { %v18340_v2 = vpop.f32.mrb[28].mxu1 }
 0x2ae   :  { %v18342_v36 = vpop.f32.mrb[29].mxu1  ;;  %15111 = vmatmul.mubr.f32.gmra.mrb[134].mxu1 %v12727_v58 }
 0x2af   :  { %15113 = vmatprep.mubr.f32.mxu1 %v12730_v54  ;;  %v12775_v54 = vunpack.c.h.bf16 %v13434_v56 }
 0x2b1   :  { %v18347_v45 = vpop.f32.mrb[30].mxu1 }
 0x2b2   :  { %v18349_v48 = vpop.f32.mrb[31].mxu1  ;;  %15114 = vmatmul.mubr.f32.gmra.mrb[136].mxu1 %v12731_v7  ;;  %v13436_v7 = vld [vmem:[%s20607_s3 + $0x228] sm:$0xff]  }
 0x2b3   :  { %15116 = vmatprep.mubr.f32.mxu1 %v12734_v35  ;;  %v12783_v60 = vunpack.c.h.bf16 %v13436_v7 }
 0x2b5   :  { %v18354_v8 = vpop.f32.mrb[32].mxu1 }
 0x2b6   :  { %v18356_v26 = vpop.f32.mrb[33].mxu1  ;;  %15117 = vmatmul.mubr.f32.gmra.mrb[138].mxu1 %v12735_v4  ;;  %v12779_v4 = vunpack.c.h.bf16 %v13435_v33 }
 0x2b7   :  { %15119 = vmatprep.mubr.f32.mxu1 %v12738_v42  ;;  %v12782_v42 = vunpack.c.l.bf16 %v13436_v7 }
 0x2b9   :  { %v18361_v15 = vpop.f32.mrb[34].mxu1 }
 0x2ba   :  { %v18363_v20 = vpop.f32.mrb[35].mxu1  ;;  %15120 = vmatmul.mubr.f32.gmra.mrb[140].mxu1 %v12739_v6 }
 0x2bb   :  { %15122 = vmatprep.mubr.f32.mxu1 %v12742_v44 }
 0x2bd   :  { %v18368_v11 = vpop.f32.mrb[36].mxu1 }
 0x2be   :  { %v18370_v27 = vpop.f32.mrb[37].mxu1  ;;  %15123 = vmatmul.mubr.f32.gmra.mrb[142].mxu1 %v12743_v40  ;;  %v12786_v40 = vunpack.c.l.bf16 %v13437_v3 }
 0x2bf   :  { %15125 = vmatprep.mubr.f32.mxu1 %v12746_v47  ;;  %v13438_v47 = vld [vmem:[%s20607_s3 + $0x238] sm:$0xff]  }
 0x2c0   :  { %v12790_v12 = vunpack.c.l.bf16 %v13438_v47 }
 0x2c1   :  { %v18375_v22 = vpop.f32.mrb[38].mxu1 }
 0x2c2   :  { %v18377_v43 = vpop.f32.mrb[39].mxu1  ;;  %15126 = vmatmul.mubr.f32.gmra.mrb[144].mxu1 %v12747_v30 }
 0x2c3   :  { %15128 = vmatprep.mubr.f32.mxu1 %v12750_v50  ;;  %v12787_v50 = vunpack.c.h.bf16 %v13437_v3 }
 0x2c5   :  { %v14971_v32 = vpop.f32.mrb[40].mxu1 }
 0x2c6   :  { %v2538_v37 = vpop.f32.mrb[41].mxu1  ;;  %15129 = vmatmul.mubr.f32.gmra.mrb[146].mxu1 %v12751_v19  ;;  %v18438_v19 = vld [vmem:[%s20608_s4 + $0x18] sm:$0xff] }
 0x2c7   :  { %15595 = vmatprep.mubr.msk.f32.mxu0 %vm4620_vm1, %v2538_v37  ;;  %15131 = vmatprep.mubr.f32.mxu1 %v12754_v16 }
 0x2c8   :  { %15596 = vmatmul.mubr.msk.f32.vlgmr.msra.gmra.mrb[104].mxu0 %vm4620_vm1, %v14971_v32  ;;  %v12791_v32 = vunpack.c.h.bf16 %v13438_v47 }
 0x2c9   :  { %v14974_v5 = vpop.f32.mrb[42].mxu1  ;;  %15620 = vmatpush3.msra.mxu0 %v18275_v17  ;;  %v12766_v17 = vunpack.c.l.bf16 %v13432_v39 }
 0x2ca   :  { %v2548_v24 = vpop.f32.mrb[43].mxu1  ;;  %15132 = vmatmul.mubr.f32.gmra.mrb[148].mxu1 %v12755_v52  ;;  %15645 = vmatprep.subr.mxu0 %v18386_v25 }
 0x2cb   :  { %15598 = vmatprep.mubr.msk.f32.mxu0 %vm4620_vm1, %v2548_v24  ;;  %15134 = vmatprep.mubr.f32.mxu1 %v12758_v57 }
 0x2cc   :  { %15599 = vmatmul.mubr.msk.f32.gmra.mrb[106].mxu0 %vm4620_vm1, %v14974_v5 }
 0x2cd   :  { %v14977_v18 = vpop.f32.mrb[44].mxu1 }
 0x2ce   :  { %v2558_v46 = vpop.f32.mrb[45].mxu1  ;;  %15135 = vmatmul.mubr.f32.gmra.mrb[150].mxu1 %v12759_v21 }
 0x2cf   :  { %15601 = vmatprep.mubr.msk.f32.mxu0 %vm4620_vm1, %v2558_v46  ;;  %15137 = vmatprep.mubr.f32.mxu1 %v12762_v53 }
 0x2d0   :  { %15602 = vmatmul.mubr.msk.f32.gmra.mrb[108].mxu0 %vm4620_vm1, %v14977_v18 }
 0x2d1   :  { %v14980_v31 = vpop.f32.mrb[46].mxu1 }
 0x2d2   :  { %v2568_v62 = vpop.f32.mrb[47].mxu1  ;;  %15138 = vmatmul.mubr.f32.gmra.mrb[152].mxu1 %v12763_v34 }
 0x2d3   :  { %15604 = vmatprep.mubr.msk.f32.mxu0 %vm4620_vm1, %v2568_v62  ;;  %15140 = vmatprep.mubr.f32.mxu1 %v12766_v17 }
 0x2d4   :  { %15605 = vmatmul.mubr.msk.f32.gmra.mrb[110].mxu0 %vm4620_vm1, %v14980_v31 }
 0x2d5   :  { %v14983_v13 = vpop.f32.mrb[48].mxu1 }
 0x2d6   :  { %v2578_v61 = vpop.f32.mrb[49].mxu1  ;;  %15141 = vmatmul.mubr.f32.gmra.mrb[154].mxu1 %v12767_v28 }
 0x2d7   :  { %15607 = vmatprep.mubr.msk.f32.mxu0 %vm4620_vm1, %v2578_v61  ;;  %15143 = vmatprep.mubr.f32.mxu1 %v12770_v51 }
 0x2d8   :  { %15608 = vmatmul.mubr.msk.f32.gmra.mrb[112].mxu0 %vm4620_vm1, %v14983_v13 }
 0x2d9   :  { %v14986_v0 = vpop.f32.mrb[50].mxu1 }
 0x2da   :  { %v2588_v58 = vpop.f32.mrb[51].mxu1  ;;  %15144 = vmatmul.mubr.f32.gmra.mrb[156].mxu1 %v12771_v1  ;;  %v18533_v1 = vld [vmem:[%s20608_s4 + $0x20] sm:$0xff] }
 0x2db   :  { %15610 = vmatprep.mubr.msk.f32.mxu0 %vm4620_vm1, %v2588_v58  ;;  %15146 = vmatprep.mubr.f32.mxu1 %v12774_v59 }
 0x2dc   :  { %15611 = vmatmul.mubr.msk.f32.gmra.mrb[114].mxu0 %vm4620_vm1, %v14986_v0 }
 0x2dd   :  { %v14989_v35 = vpop.f32.mrb[52].mxu1 }
 0x2de   :  { %v2598_v41 = vpop.f32.mrb[53].mxu1  ;;  %15147 = vmatmul.mubr.f32.gmra.mrb[158].mxu1 %v12775_v54  ;;  %v13448_v54 = vld [vmem:[%s20607_s3 + $0x288] sm:$0xff]  }
 0x2df   :  { %15613 = vmatprep.mubr.msk.f32.mxu0 %vm4620_vm1, %v2598_v41  ;;  %15149 = vmatprep.mubr.f32.mxu1 %v12778_v38  ;;  %v12830_v41 = vunpack.c.l.bf16 %v13448_v54 }
 0x2e0   :  { %15614 = vmatmul.mubr.msk.f32.gmra.mrb[116].mxu0 %vm4620_vm1, %v14989_v35 }
 0x2e1   :  { %v14992_v6 = vpop.f32.mrb[54].mxu1 }
 0x2e2   :  { %v2608_v44 = vpop.f32.mrb[55].mxu1  ;;  %15150 = vmatmul.mubr.f32.gmra.mrb[160].mxu1 %v12779_v4  ;;  %v13449_v4 = vld [vmem:[%s20607_s3 + $0x290] sm:$0xff]  }
 0x2e3   :  { %15616 = vmatprep.mubr.msk.f32.mxu0 %vm4620_vm1, %v2608_v44  ;;  %15152 = vmatprep.mubr.f32.mxu1 %v12782_v42  ;;  %v12834_v44 = vunpack.c.l.bf16 %v13449_v4 }
 0x2e4   :  { %15617 = vmatmul.mubr.msk.f32.gmra.mrb[118].mxu0 %vm4620_vm1, %v14992_v6  ;;  %v12831_v6 = vunpack.c.h.bf16 %v13448_v54 }
 0x2e5   :  { %15621 = vmatprep.mubr.msk.f32.mxu0 %vm4620_vm1, %v18328_v9  ;;  %v18431_v55 = vpop.f32.mrb[56].mxu1  ;;  %v13439_v9 = vld [vmem:[%s20607_s3 + $0x240] sm:$0xff]  }
 0x2e6   :  { %v18433_v30 = vpop.f32.mrb[57].mxu1  ;;  %15153 = vmatmul.mubr.f32.gmra.mrb[162].mxu1 %v12783_v60  ;;  %v12794_v37 = vunpack.c.l.bf16 %v13439_v9  ;;  %v12795_v57 = vunpack.c.h.bf16 %v13439_v9  ;;  %v13450_v60 = vld [vmem:[%s20607_s3 + $0x298] sm:$0xff]  }
 0x2e7   :  { %15155 = vmatprep.mubr.f32.mxu1 %v12786_v40  ;;  %v12839_v9 = vunpack.c.h.bf16 %v13450_v60 }
 0x2e8   :  { %15622 = vmatmul.mubr.msk.f32.vlgmr.msra.gmra.mrb[104].mxu0 %vm4620_vm1, %v18326_v29  ;;  %v13440_v29 = vld [vmem:[%s20607_s3 + $0x248] sm:$0xff]  }
 0x2e9   :  { %15624 = vmatprep.mubr.msk.f32.mxu0 %vm4620_vm1, %v18335_v63  ;;  %15646 = vmatpush3.msra.mxu0 %v18386_v25  ;;  %v18448_v16 = vpop.f32.mrb[58].mxu1  ;;  %v12798_v25 = vunpack.c.l.bf16 %v13440_v29  ;;  %v12799_v5 = vunpack.c.h.bf16 %v13440_v29 }
 0x2ea   :  { %v18450_v10 = vpop.f32.mrb[59].mxu1  ;;  %15156 = vmatmul.mubr.f32.gmra.mrb[164].mxu1 %v12787_v50  ;;  %15671 = vmatprep.subr.mxu0 %v18438_v19  ;;  %v13451_v50 = vld [vmem:[%s20607_s3 + $0x2a0] sm:$0xff]  }
 0x2eb   :  { %15158 = vmatprep.mubr.f32.mxu1 %v12790_v12  ;;  %v12843_v29 = vunpack.c.h.bf16 %v13451_v50 }
 0x2ec   :  { %15625 = vmatmul.mubr.msk.f32.gmra.mrb[106].mxu0 %vm4620_vm1, %v18333_v14  ;;  %v13441_v14 = vld [vmem:[%s20607_s3 + $0x250] sm:$0xff]  }
 0x2ed   :  { %15627 = vmatprep.mubr.msk.f32.mxu0 %vm4620_vm1, %v18342_v36  ;;  %v18460_v63 = vpop.f32.mrb[60].mxu1  ;;  %v12802_v24 = vunpack.c.l.bf16 %v13441_v14  ;;  %v12803_v53 = vunpack.c.h.bf16 %v13441_v14 }
 0x2ee   :  { %v18462_v52 = vpop.f32.mrb[61].mxu1  ;;  %15159 = vmatmul.mubr.f32.gmra.mrb[166].mxu1 %v12791_v32 }
 0x2ef   :  { %15161 = vmatprep.mubr.f32.mxu1 %v12794_v37 }
 0x2f0   :  { %15628 = vmatmul.mubr.msk.f32.gmra.mrb[108].mxu0 %vm4620_vm1, %v18340_v2  ;;  %v13442_v2 = vld [vmem:[%s20607_s3 + $0x258] sm:$0xff]  }
 0x2f1   :  { %15630 = vmatprep.mubr.msk.f32.mxu0 %vm4620_vm1, %v18349_v48  ;;  %v18471_v49 = vpop.f32.mrb[62].mxu1  ;;  %v12806_v39 = vunpack.c.l.bf16 %v13442_v2  ;;  %v12807_v46 = vunpack.c.h.bf16 %v13442_v2 }
 0x2f2   :  { %v18473_v36 = vpop.f32.mrb[63].mxu1  ;;  %15162 = vmatmul.mubr.f32.gmra.mrb[168].mxu1 %v12795_v57 }
 0x2f3   :  { %15164 = vmatprep.mubr.f32.mxu1 %v12798_v25 }
 0x2f4   :  { %15631 = vmatmul.mubr.msk.f32.gmra.mrb[110].mxu0 %vm4620_vm1, %v18347_v45  ;;  %v13443_v45 = vld [vmem:[%s20607_s3 + $0x260] sm:$0xff]  }
 0x2f5   :  { %15633 = vmatprep.mubr.msk.f32.mxu0 %vm4620_vm1, %v18356_v26  ;;  %v18482_v21 = vpop.f32.mrb[64].mxu1  ;;  %v12810_v34 = vunpack.c.l.bf16 %v13443_v45  ;;  %v12811_v23 = vunpack.c.h.bf16 %v13443_v45 }
 0x2f6   :  { %v18484_v48 = vpop.f32.mrb[65].mxu1  ;;  %15165 = vmatmul.mubr.f32.gmra.mrb[170].mxu1 %v12799_v5 }
 0x2f7   :  { %15167 = vmatprep.mubr.f32.mxu1 %v12802_v24 }
 0x2f8   :  { %15634 = vmatmul.mubr.msk.f32.gmra.mrb[112].mxu0 %vm4620_vm1, %v18354_v8  ;;  %v13444_v8 = vld [vmem:[%s20607_s3 + $0x268] sm:$0xff]  }
 0x2f9   :  { %15636 = vmatprep.mubr.msk.f32.mxu0 %vm4620_vm1, %v18363_v20  ;;  %v18493_v18 = vpop.f32.mrb[66].mxu1  ;;  %v12814_v31 = vunpack.c.l.bf16 %v13444_v8  ;;  %v12815_v28 = vunpack.c.h.bf16 %v13444_v8 }
 0x2fa   :  { %v18495_v26 = vpop.f32.mrb[67].mxu1  ;;  %15168 = vmatmul.mubr.f32.gmra.mrb[172].mxu1 %v12803_v53  ;;  %v13455_v53 = vld [vmem:[%s20607_s3 + $0x2c0] sm:$0xff]  }
 0x2fb   :  { %15170 = vmatprep.mubr.f32.mxu1 %v12806_v39 }
 0x2fc   :  { %15637 = vmatmul.mubr.msk.f32.gmra.mrb[114].mxu0 %vm4620_vm1, %v18361_v15  ;;  %v13445_v15 = vld [vmem:[%s20607_s3 + $0x270] sm:$0xff]  }
 0x2fd   :  { %15639 = vmatprep.mubr.msk.f32.mxu0 %vm4620_vm1, %v18370_v27  ;;  %v18504_v17 = vpop.f32.mrb[68].mxu1  ;;  %v12818_v51 = vunpack.c.l.bf16 %v13445_v15  ;;  %v12819_v13 = vunpack.c.h.bf16 %v13445_v15 }
 0x2fe   :  { %v18506_v20 = vpop.f32.mrb[69].mxu1  ;;  %15171 = vmatmul.mubr.f32.gmra.mrb[174].mxu1 %v12807_v46  ;;  %v13456_v46 = vld [vmem:[%s20607_s3 + $0x2c8] sm:$0xff]  }
 0x2ff   :  { %15173 = vmatprep.mubr.f32.mxu1 %v12810_v34 }
 0x300   :  { %15640 = vmatmul.mubr.msk.f32.gmra.mrb[116].mxu0 %vm4620_vm1, %v18368_v11  ;;  %v13446_v11 = vld [vmem:[%s20607_s3 + $0x278] sm:$0xff]  }
 0x301   :  { %15642 = vmatprep.mubr.msk.f32.mxu0 %vm4620_vm1, %v18377_v43  ;;  %v18515_v62 = vpop.f32.mrb[70].mxu1  ;;  %v12822_v61 = vunpack.c.l.bf16 %v13446_v11  ;;  %v12823_v0 = vunpack.c.h.bf16 %v13446_v11 }
 0x302   :  { %v18517_v27 = vpop.f32.mrb[71].mxu1  ;;  %15174 = vmatmul.mubr.f32.gmra.mrb[176].mxu1 %v12811_v23  ;;  %v13457_v23 = vld [vmem:[%s20607_s3 + $0x2d0] sm:$0xff]  }
 0x303   :  { %15176 = vmatprep.mubr.f32.mxu1 %v12814_v31 }
 0x304   :  { %15643 = vmatmul.mubr.msk.f32.gmra.mrb[118].mxu0 %vm4620_vm1, %v18375_v22  ;;  %v13447_v22 = vld [vmem:[%s20607_s3 + $0x280] sm:$0xff]  }
 0x305   :  { %15647 = vmatprep.mubr.msk.f32.mxu0 %vm4620_vm1, %v18433_v30  ;;  %v18526_v56 = vpop.f32.mrb[72].mxu1  ;;  %v12826_v58 = vunpack.c.l.bf16 %v13447_v22  ;;  %v12827_v35 = vunpack.c.h.bf16 %v13447_v22  ;;  %v12838_v30 = vunpack.c.l.bf16 %v13450_v60 }
 0x306   :  { %v18528_v43 = vpop.f32.mrb[73].mxu1  ;;  %15177 = vmatmul.mubr.f32.gmra.mrb[178].mxu1 %v12815_v28  ;;  %v13458_v28 = vld [vmem:[%s20607_s3 + $0x2d8] sm:$0xff]  }
 0x307   :  { %15179 = vmatprep.mubr.f32.mxu1 %v12818_v51  ;;  %v12871_v22 = vunpack.c.h.bf16 %v13458_v28 }
 0x308   :  { %15648 = vmatmul.mubr.msk.f32.vlgmr.msra.gmra.mrb[104].mxu0 %vm4620_vm1, %v18431_v55  ;;  %v12835_v55 = vunpack.c.h.bf16 %v13449_v4 }
 0x309   :  { %15650 = vmatprep.mubr.msk.f32.mxu0 %vm4620_vm1, %v18450_v10  ;;  %15672 = vmatpush3.msra.mxu0 %v18438_v19  ;;  %v18543_v59 = vpop.f32.mrb[74].mxu1  ;;  %v13452_v10 = vld [vmem:[%s20607_s3 + $0x2a8] sm:$0xff]  }
 0x30a   :  { %v18545_v33 = vpop.f32.mrb[75].mxu1  ;;  %15180 = vmatmul.mubr.f32.gmra.mrb[180].mxu1 %v12819_v13  ;;  %15697 = vmatprep.subr.mxu0 %v18533_v1  ;;  %v12847_v14 = vunpack.c.h.bf16 %v13452_v10  ;;  %v13459_v13 = vld [vmem:[%s20607_s3 + $0x2e0] sm:$0xff]  }
 0x30b   :  { %15182 = vmatprep.mubr.f32.mxu1 %v12822_v61  ;;  %v12875_v54 = vunpack.c.h.bf16 %v13459_v13 }
 0x30c   :  { %15651 = vmatmul.mubr.msk.f32.gmra.mrb[106].mxu0 %vm4620_vm1, %v18448_v16  ;;  %v12842_v16 = vunpack.c.l.bf16 %v13451_v50 }
 0x30d   :  { %15653 = vmatprep.mubr.msk.f32.mxu0 %vm4620_vm1, %v18462_v52  ;;  %v18555_v38 = vpop.f32.mrb[76].mxu1  ;;  %v13453_v52 = vld [vmem:[%s20607_s3 + $0x2b0] sm:$0xff]  }
 0x30e   :  { %v18557_v7 = vpop.f32.mrb[77].mxu1  ;;  %15183 = vmatmul.mubr.f32.gmra.mrb[182].mxu1 %v12823_v0  ;;  %v12851_v2 = vunpack.c.h.bf16 %v13453_v52 }
 0x30f   :  { %15185 = vmatprep.mubr.f32.mxu1 %v12826_v58 }
 0x310   :  { %15654 = vmatmul.mubr.msk.f32.gmra.mrb[108].mxu0 %vm4620_vm1, %v18460_v63  ;;  %v12846_v63 = vunpack.c.l.bf16 %v13452_v10 }
 0x311   :  { %15656 = vmatprep.mubr.msk.f32.mxu0 %vm4620_vm1, %v18473_v36  ;;  %v18566_v42 = vpop.f32.mrb[78].mxu1  ;;  %v13454_v36 = vld [vmem:[%s20607_s3 + $0x2b8] sm:$0xff]  }
 0x312   :  { %v18568_v3 = vpop.f32.mrb[79].mxu1  ;;  %15186 = vmatmul.mubr.f32.gmra.mrb[184].mxu1 %v12827_v35 }
 0x313   :  { %15188 = vmatprep.mubr.f32.mxu1 %v12830_v41 }
 0x314   :  { %15657 = vmatmul.mubr.msk.f32.gmra.mrb[110].mxu0 %vm4620_vm1, %v18471_v49  ;;  %v12850_v49 = vunpack.c.l.bf16 %v13453_v52 }
 0x315   :  { %15659 = vmatprep.mubr.msk.f32.mxu0 %vm4620_vm1, %v18484_v48  ;;  %v18577_v40 = vpop.f32.mrb[80].mxu1  ;;  %v18628_v48 = vld [vmem:[%s20608_s4 + $0x28] sm:$0xff] }
 0x316   :  { %v18579_v47 = vpop.f32.mrb[81].mxu1  ;;  %15189 = vmatmul.mubr.f32.gmra.mrb[186].mxu1 %v12831_v6 }
 0x317   :  { %15191 = vmatprep.mubr.f32.mxu1 %v12834_v44 }
 0x318   :  { %15660 = vmatmul.mubr.msk.f32.gmra.mrb[112].mxu0 %vm4620_vm1, %v18482_v21  ;;  %v12854_v21 = vunpack.c.l.bf16 %v13454_v36 }
 0x319   :  { %15662 = vmatprep.mubr.msk.f32.mxu0 %vm4620_vm1, %v18495_v26  ;;  %v18588_v12 = vpop.f32.mrb[82].mxu1  ;;  %v12858_v26 = vunpack.c.l.bf16 %v13455_v53 }
 0x31a   :  { %v18590_v19 = vpop.f32.mrb[83].mxu1  ;;  %15192 = vmatmul.mubr.f32.gmra.mrb[188].mxu1 %v12835_v55  ;;  %v13463_v55 = vld [vmem:[%s20607_s3 + $0x300] sm:$0xff]  }
 0x31b   :  { %15194 = vmatprep.mubr.f32.mxu1 %v12838_v30 }
 0x31c   :  { %15663 = vmatmul.mubr.msk.f32.gmra.mrb[114].mxu0 %vm4620_vm1, %v18493_v18  ;;  %v12855_v18 = vunpack.c.h.bf16 %v13454_v36 }
 0x31d   :  { %15665 = vmatprep.mubr.msk.f32.mxu0 %vm4620_vm1, %v18506_v20  ;;  %v18599_v32 = vpop.f32.mrb[84].mxu1  ;;  %v12862_v20 = vunpack.c.l.bf16 %v13456_v46 }
 0x31e   :  { %v18601_v37 = vpop.f32.mrb[85].mxu1  ;;  %15195 = vmatmul.mubr.f32.gmra.mrb[190].mxu1 %v12839_v9  ;;  %v13464_v9 = vld [vmem:[%s20607_s3 + $0x308] sm:$0xff]  }
 0x31f   :  { %15197 = vmatprep.mubr.f32.mxu1 %v12842_v16 }
 0x320   :  { %15666 = vmatmul.mubr.msk.f32.gmra.mrb[116].mxu0 %vm4620_vm1, %v18504_v17  ;;  %v12859_v17 = vunpack.c.h.bf16 %v13455_v53 }
 0x321   :  { %15668 = vmatprep.mubr.msk.f32.mxu0 %vm4620_vm1, %v18517_v27  ;;  %v18610_v57 = vpop.f32.mrb[86].mxu1  ;;  %v12866_v27 = vunpack.c.l.bf16 %v13457_v23 }
 0x322   :  { %v18612_v25 = vpop.f32.mrb[87].mxu1  ;;  %15198 = vmatmul.mubr.f32.gmra.mrb[192].mxu1 %v12843_v29  ;;  %v13465_v29 = vld [vmem:[%s20607_s3 + $0x310] sm:$0xff]  }
 0x323   :  { %15200 = vmatprep.mubr.f32.mxu1 %v12846_v63 }
 0x324   :  { %15669 = vmatmul.mubr.msk.f32.gmra.mrb[118].mxu0 %vm4620_vm1, %v18515_v62  ;;  %v12863_v62 = vunpack.c.h.bf16 %v13456_v46 }
 0x325   :  { %15673 = vmatprep.mubr.msk.f32.mxu0 %vm4620_vm1, %v18528_v43  ;;  %v18621_v5 = vpop.f32.mrb[88].mxu1  ;;  %v12870_v43 = vunpack.c.l.bf16 %v13458_v28 }
 0x326   :  { %v18623_v24 = vpop.f32.mrb[89].mxu1  ;;  %15201 = vmatmul.mubr.f32.gmra.mrb[194].mxu1 %v12847_v14  ;;  %v13466_v14 = vld [vmem:[%s20607_s3 + $0x318] sm:$0xff]  }
 0x327   :  { %15203 = vmatprep.mubr.f32.mxu1 %v12850_v49  ;;  %v12903_v53 = vunpack.c.h.bf16 %v13466_v14 }
 0x328   :  { %15674 = vmatmul.mubr.msk.f32.vlgmr.msra.gmra.mrb[104].mxu0 %vm4620_vm1, %v18526_v56  ;;  %v12867_v56 = vunpack.c.h.bf16 %v13457_v23 }
 0x329   :  { %15676 = vmatprep.mubr.msk.f32.mxu0 %vm4620_vm1, %v18545_v33  ;;  %15698 = vmatpush3.msra.mxu0 %v18533_v1  ;;  %v18638_v39 = vpop.f32.mrb[90].mxu1  ;;  %v13460_v33 = vld [vmem:[%s20607_s3 + $0x2e8] sm:$0xff]  }
 0x32a   :  { %v18640_v45 = vpop.f32.mrb[91].mxu1  ;;  %15204 = vmatmul.mubr.f32.gmra.mrb[196].mxu1 %v12851_v2  ;;  %15723 = vmatprep.subr.mxu0 %v18628_v48  ;;  %v12879_v4 = vunpack.c.h.bf16 %v13460_v33  ;;  %v13467_v2 = vld [vmem:[%s20607_s3 + $0x320] sm:$0xff]  }
 0x32b   :  { %15206 = vmatprep.mubr.f32.mxu1 %v12854_v21  ;;  %v12907_v46 = vunpack.c.h.bf16 %v13467_v2 }
 0x32c   :  { %15677 = vmatmul.mubr.msk.f32.gmra.mrb[106].mxu0 %vm4620_vm1, %v18543_v59  ;;  %v12874_v59 = vunpack.c.l.bf16 %v13459_v13 }
 0x32d   :  { %15679 = vmatprep.mubr.msk.f32.mxu0 %vm4620_vm1, %v18557_v7  ;;  %v18650_v34 = vpop.f32.mrb[92].mxu1  ;;  %v13461_v7 = vld [vmem:[%s20607_s3 + $0x2f0] sm:$0xff]  }
 0x32e   :  { %v18652_v8 = vpop.f32.mrb[93].mxu1  ;;  %15207 = vmatmul.mubr.f32.gmra.mrb[198].mxu1 %v12855_v18  ;;  %v12883_v60 = vunpack.c.h.bf16 %v13461_v7 }
 0x32f   :  { %15209 = vmatprep.mubr.f32.mxu1 %v12858_v26 }
 0x330   :  { %15680 = vmatmul.mubr.msk.f32.gmra.mrb[108].mxu0 %vm4620_vm1, %v18555_v38  ;;  %v12878_v38 = vunpack.c.l.bf16 %v13460_v33 }
 0x331   :  { %15682 = vmatprep.mubr.msk.f32.mxu0 %vm4620_vm1, %v18568_v3  ;;  %v18661_v31 = vpop.f32.mrb[94].mxu1  ;;  %v13462_v3 = vld [vmem:[%s20607_s3 + $0x2f8] sm:$0xff]  }
 0x332   :  { %v18663_v15 = vpop.f32.mrb[95].mxu1  ;;  %15210 = vmatmul.mubr.f32.gmra.mrb[200].mxu1 %v12859_v17 }
 0x333   :  { %15212 = vmatprep.mubr.f32.mxu1 %v12862_v20 }
 0x334   :  { %15683 = vmatmul.mubr.msk.f32.gmra.mrb[110].mxu0 %vm4620_vm1, %v18566_v42  ;;  %v12882_v42 = vunpack.c.l.bf16 %v13461_v7 }
 0x335   :  { %15685 = vmatprep.mubr.msk.f32.mxu0 %vm4620_vm1, %v18579_v47  ;;  %v18672_v51 = vpop.f32.mrb[96].mxu1  ;;  %v18723_v47 = vld [vmem:[%s20608_s4 + $0x30] sm:$0xff] }
 0x336   :  { %v18674_v11 = vpop.f32.mrb[97].mxu1  ;;  %15213 = vmatmul.mubr.f32.gmra.mrb[202].mxu1 %v12863_v62 }
 0x337   :  { %15215 = vmatprep.mubr.f32.mxu1 %v12866_v27 }
 0x338   :  { %15686 = vmatmul.mubr.msk.f32.gmra.mrb[112].mxu0 %vm4620_vm1, %v18577_v40  ;;  %v12886_v40 = vunpack.c.l.bf16 %v13462_v3 }
 0x339   :  { %15688 = vmatprep.mubr.msk.f32.mxu0 %vm4620_vm1, %v18590_v19  ;;  %v18683_v61 = vpop.f32.mrb[98].mxu1  ;;  %v12890_v19 = vunpack.c.l.bf16 %v13463_v55 }
 0x33a   :  { %v18685_v1 = vpop.f32.mrb[99].mxu1  ;;  %15216 = vmatmul.mubr.f32.gmra.mrb[204].mxu1 %v12867_v56  ;;  %v13471_v56 = vld [vmem:[%s20607_s3 + $0x340] sm:$0xff]  }
 0x33b   :  { %15218 = vmatprep.mubr.f32.mxu1 %v12870_v43 }
 0x33c   :  { %15689 = vmatmul.mubr.msk.f32.gmra.mrb[114].mxu0 %vm4620_vm1, %v18588_v12  ;;  %v12887_v12 = vunpack.c.h.bf16 %v13462_v3 }
 0x33d   :  { %15691 = vmatprep.mubr.msk.f32.mxu0 %vm4620_vm1, %v18601_v37  ;;  %v18694_v0 = vpop.f32.mrb[100].mxu1  ;;  %v12894_v37 = vunpack.c.l.bf16 %v13464_v9 }
 0x33e   :  { %v18696_v58 = vpop.f32.mrb[101].mxu1  ;;  %15219 = vmatmul.mubr.f32.gmra.mrb[206].mxu1 %v12871_v22  ;;  %v13472_v22 = vld [vmem:[%s20607_s3 + $0x348] sm:$0xff]  }
 0x33f   :  { %15221 = vmatprep.mubr.f32.mxu1 %v12874_v59 }
 0x340   :  { %15692 = vmatmul.mubr.msk.f32.gmra.mrb[116].mxu0 %vm4620_vm1, %v18599_v32  ;;  %v12891_v32 = vunpack.c.h.bf16 %v13463_v55 }
 0x341   :  { %15694 = vmatprep.mubr.msk.f32.mxu0 %vm4620_vm1, %v18612_v25  ;;  %v18705_v35 = vpop.f32.mrb[102].mxu1  ;;  %v12898_v25 = vunpack.c.l.bf16 %v13465_v29 }
 0x342   :  { %v18707_v41 = vpop.f32.mrb[103].mxu1  ;;  %15222 = vmatmul.mubr.f32.gmra.mrb[208].mxu1 %v12875_v54  ;;  %v13473_v54 = vld [vmem:[%s20607_s3 + $0x350] sm:$0xff]  }
 0x343   :  { %15224 = vmatprep.mubr.f32.mxu1 %v12878_v38 }
 0x344   :  { %15695 = vmatmul.mubr.msk.f32.gmra.mrb[118].mxu0 %vm4620_vm1, %v18610_v57  ;;  %v12895_v57 = vunpack.c.h.bf16 %v13464_v9 }
 0x345   :  { %15699 = vmatprep.mubr.msk.f32.mxu0 %vm4620_vm1, %v18623_v24  ;;  %v18716_v6 = vpop.f32.mrb[104].mxu1  ;;  %v12902_v24 = vunpack.c.l.bf16 %v13466_v14 }
 0x346   :  { %v18718_v44 = vpop.f32.mrb[105].mxu1  ;;  %15225 = vmatmul.mubr.f32.gmra.mrb[210].mxu1 %v12879_v4  ;;  %v13474_v4 = vld [vmem:[%s20607_s3 + $0x358] sm:$0xff]  }
 0x347   :  { %15227 = vmatprep.mubr.f32.mxu1 %v12882_v42  ;;  %v12935_v55 = vunpack.c.h.bf16 %v13474_v4 }
 0x348   :  { %15700 = vmatmul.mubr.msk.f32.vlgmr.msra.gmra.mrb[104].mxu0 %vm4620_vm1, %v18621_v5  ;;  %v12899_v5 = vunpack.c.h.bf16 %v13465_v29 }
 0x349   :  { %15702 = vmatprep.mubr.msk.f32.mxu0 %vm4620_vm1, %v18640_v45  ;;  %15724 = vmatpush3.msra.mxu0 %v18628_v48  ;;  %v18733_v30 = vpop.f32.mrb[106].mxu1  ;;  %v13468_v45 = vld [vmem:[%s20607_s3 + $0x328] sm:$0xff]  }
 0x34a   :  { %v18735_v50 = vpop.f32.mrb[107].mxu1  ;;  %15228 = vmatmul.mubr.f32.gmra.mrb[212].mxu1 %v12883_v60  ;;  %15749 = vmatprep.subr.mxu0 %v18723_v47  ;;  %v12911_v23 = vunpack.c.h.bf16 %v13468_v45  ;;  %v13475_v60 = vld [vmem:[%s20607_s3 + $0x360] sm:$0xff]  }
 0x34b   :  { %15230 = vmatprep.mubr.f32.mxu1 %v12886_v40  ;;  %v12939_v9 = vunpack.c.h.bf16 %v13475_v60 }
 0x34c   :  { %15703 = vmatmul.mubr.msk.f32.gmra.mrb[106].mxu0 %vm4620_vm1, %v18638_v39  ;;  %v12906_v39 = vunpack.c.l.bf16 %v13467_v2 }
 0x34d   :  { %15705 = vmatprep.mubr.msk.f32.mxu0 %vm4620_vm1, %v18652_v8  ;;  %v18745_v16 = vpop.f32.mrb[108].mxu1  ;;  %v13469_v8 = vld [vmem:[%s20607_s3 + $0x330] sm:$0xff]  }
 0x34e   :  { %v18747_v10 = vpop.f32.mrb[109].mxu1  ;;  %15231 = vmatmul.mubr.f32.gmra.mrb[214].mxu1 %v12887_v12  ;;  %v12915_v28 = vunpack.c.h.bf16 %v13469_v8 }
 0x34f   :  { %15233 = vmatprep.mubr.f32.mxu1 %v12890_v19 }
 0x350   :  { %15706 = vmatmul.mubr.msk.f32.gmra.mrb[108].mxu0 %vm4620_vm1, %v18650_v34  ;;  %v12910_v34 = vunpack.c.l.bf16 %v13468_v45 }
 0x351   :  { %15708 = vmatprep.mubr.msk.f32.mxu0 %vm4620_vm1, %v18663_v15  ;;  %v18756_v63 = vpop.f32.mrb[110].mxu1  ;;  %v13470_v15 = vld [vmem:[%s20607_s3 + $0x338] sm:$0xff]  }
 0x352   :  { %v18758_v52 = vpop.f32.mrb[111].mxu1  ;;  %15234 = vmatmul.mubr.f32.gmra.mrb[216].mxu1 %v12891_v32 }
 0x353   :  { %15236 = vmatprep.mubr.f32.mxu1 %v12894_v37 }
 0x354   :  { %15709 = vmatmul.mubr.msk.f32.gmra.mrb[110].mxu0 %vm4620_vm1, %v18661_v31  ;;  %v12914_v31 = vunpack.c.l.bf16 %v13469_v8 }
 0x355   :  { %15711 = vmatprep.mubr.msk.f32.mxu0 %vm4620_vm1, %v18674_v11  ;;  %v18767_v49 = vpop.f32.mrb[112].mxu1  ;;  %v18818_v11 = vld [vmem:[%s20608_s4 + $0x38] sm:$0xff] }
 0x356   :  { %v18769_v36 = vpop.f32.mrb[113].mxu1  ;;  %15237 = vmatmul.mubr.f32.gmra.mrb[218].mxu1 %v12895_v57 }
 0x357   :  { %15239 = vmatprep.mubr.f32.mxu1 %v12898_v25 }
 0x358   :  { %15712 = vmatmul.mubr.msk.f32.gmra.mrb[112].mxu0 %vm4620_vm1, %v18672_v51  ;;  %v12918_v51 = vunpack.c.l.bf16 %v13470_v15 }
 0x359   :  { %15714 = vmatprep.mubr.msk.f32.mxu0 %vm4620_vm1, %v18685_v1  ;;  %v18778_v21 = vpop.f32.mrb[114].mxu1  ;;  %v12922_v1 = vunpack.c.l.bf16 %v13471_v56 }
 0x35a   :  { %v18780_v48 = vpop.f32.mrb[115].mxu1  ;;  %15240 = vmatmul.mubr.f32.gmra.mrb[220].mxu1 %v12899_v5  ;;  %v13479_v5 = vld [vmem:[%s20607_s3 + $0x380] sm:$0xff]  }
 0x35b   :  { %15242 = vmatprep.mubr.f32.mxu1 %v12902_v24 }
 0x35c   :  { %15715 = vmatmul.mubr.msk.f32.gmra.mrb[114].mxu0 %vm4620_vm1, %v18683_v61  ;;  %v12919_v61 = vunpack.c.h.bf16 %v13470_v15 }
 0x35d   :  { %15717 = vmatprep.mubr.msk.f32.mxu0 %vm4620_vm1, %v18696_v58  ;;  %v18789_v18 = vpop.f32.mrb[116].mxu1  ;;  %v12926_v58 = vunpack.c.l.bf16 %v13472_v22 }
 0x35e   :  { %v18791_v26 = vpop.f32.mrb[117].mxu1  ;;  %15243 = vmatmul.mubr.f32.gmra.mrb[222].mxu1 %v12903_v53  ;;  %v13480_v53 = vld [vmem:[%s20607_s3 + $0x388] sm:$0xff]  }
 0x35f   :  { %15245 = vmatprep.mubr.f32.mxu1 %v12906_v39 }
 0x360   :  { %15718 = vmatmul.mubr.msk.f32.gmra.mrb[116].mxu0 %vm4620_vm1, %v18694_v0  ;;  %v12923_v0 = vunpack.c.h.bf16 %v13471_v56 }
 0x361   :  { %15720 = vmatprep.mubr.msk.f32.mxu0 %vm4620_vm1, %v18707_v41  ;;  %v18800_v17 = vpop.f32.mrb[118].mxu1  ;;  %v12930_v41 = vunpack.c.l.bf16 %v13473_v54 }
 0x362   :  { %v18802_v20 = vpop.f32.mrb[119].mxu1  ;;  %15246 = vmatmul.mubr.f32.gmra.mrb[224].mxu1 %v12907_v46  ;;  %v13481_v46 = vld [vmem:[%s20607_s3 + $0x390] sm:$0xff]  }
 0x363   :  { %15248 = vmatprep.mubr.f32.mxu1 %v12910_v34 }
 0x364   :  { %15721 = vmatmul.mubr.msk.f32.gmra.mrb[118].mxu0 %vm4620_vm1, %v18705_v35  ;;  %v12927_v35 = vunpack.c.h.bf16 %v13472_v22 }
 0x365   :  { %15725 = vmatprep.mubr.msk.f32.mxu0 %vm4620_vm1, %v18718_v44  ;;  %v18811_v62 = vpop.f32.mrb[120].mxu1  ;;  %v12934_v44 = vunpack.c.l.bf16 %v13474_v4 }
 0x366   :  { %v18813_v27 = vpop.f32.mrb[121].mxu1  ;;  %15249 = vmatmul.mubr.f32.gmra.mrb[226].mxu1 %v12911_v23  ;;  %v13482_v23 = vld [vmem:[%s20607_s3 + $0x398] sm:$0xff]  }
 0x367   :  { %15251 = vmatprep.mubr.f32.mxu1 %v12914_v31  ;;  %v12967_v56 = vunpack.c.h.bf16 %v13482_v23 }
 0x368   :  { %15726 = vmatmul.mubr.msk.f32.vlgmr.msra.gmra.mrb[104].mxu0 %vm4620_vm1, %v18716_v6  ;;  %v12931_v6 = vunpack.c.h.bf16 %v13473_v54 }
 0x369   :  { %15728 = vmatprep.mubr.msk.f32.mxu0 %vm4620_vm1, %v18735_v50  ;;  %15750 = vmatpush3.msra.mxu0 %v18723_v47  ;;  %v18828_v43 = vpop.f32.mrb[122].mxu1  ;;  %v13476_v50 = vld [vmem:[%s20607_s3 + $0x368] sm:$0xff]  }
 0x36a   :  { %v18830_v13 = vpop.f32.mrb[123].mxu1  ;;  %15252 = vmatmul.mubr.f32.gmra.mrb[228].mxu1 %v12915_v28  ;;  %15775 = vmatprep.subr.mxu0 %v18818_v11  ;;  %v12943_v29 = vunpack.c.h.bf16 %v13476_v50  ;;  %v13483_v28 = vld [vmem:[%s20607_s3 + $0x3a0] sm:$0xff]  }
 0x36b   :  { %15254 = vmatprep.mubr.f32.mxu1 %v12918_v51  ;;  %v12971_v22 = vunpack.c.h.bf16 %v13483_v28 }
 0x36c   :  { %15729 = vmatmul.mubr.msk.f32.gmra.mrb[106].mxu0 %vm4620_vm1, %v18733_v30  ;;  %v12938_v30 = vunpack.c.l.bf16 %v13475_v60 }
 0x36d   :  { %15731 = vmatprep.mubr.msk.f32.mxu0 %vm4620_vm1, %v18747_v10  ;;  %v18840_v59 = vpop.f32.mrb[124].mxu1  ;;  %v13477_v10 = vld [vmem:[%s20607_s3 + $0x370] sm:$0xff]  }
 0x36e   :  { %v18842_v33 = vpop.f32.mrb[125].mxu1  ;;  %15255 = vmatmul.mubr.f32.gmra.mrb[230].mxu1 %v12919_v61  ;;  %v12947_v14 = vunpack.c.h.bf16 %v13477_v10 }
 0x36f   :  { %15257 = vmatprep.mubr.f32.mxu1 %v12922_v1 }
 0x370   :  { %15732 = vmatmul.mubr.msk.f32.gmra.mrb[108].mxu0 %vm4620_vm1, %v18745_v16  ;;  %v12942_v16 = vunpack.c.l.bf16 %v13476_v50 }
 0x371   :  { %15734 = vmatprep.mubr.msk.f32.mxu0 %vm4620_vm1, %v18758_v52  ;;  %v18851_v38 = vpop.f32.mrb[126].mxu1  ;;  %v13478_v52 = vld [vmem:[%s20607_s3 + $0x378] sm:$0xff]  }
 0x372   :  { %v18853_v7 = vpop.f32.mrb[127].mxu1  ;;  %15258 = vmatmul.mubr.f32.gmra.mrb[232].mxu1 %v12923_v0 }
 0x373   :  { %15260 = vmatprep.mubr.f32.mxu1 %v12926_v58 }
 0x374   :  { %15735 = vmatmul.mubr.msk.f32.gmra.mrb[110].mxu0 %vm4620_vm1, %v18756_v63  ;;  %v12946_v63 = vunpack.c.l.bf16 %v13477_v10 }
 0x375   :  { %15737 = vmatprep.mubr.msk.f32.mxu0 %vm4620_vm1, %v18769_v36  ;;  %v18862_v42 = vpop.f32.mrb[128].mxu1  ;;  %v18913_v36 = vld [vmem:[%s20608_s4 + $0x40] sm:$0xff] }
 0x376   :  { %v18864_v3 = vpop.f32.mrb[129].mxu1  ;;  %15261 = vmatmul.mubr.f32.gmra.mrb[234].mxu1 %v12927_v35 }
 0x377   :  { %15263 = vmatprep.mubr.f32.mxu1 %v12930_v41 }
 0x378   :  { %15738 = vmatmul.mubr.msk.f32.gmra.mrb[112].mxu0 %vm4620_vm1, %v18767_v49  ;;  %v12950_v49 = vunpack.c.l.bf16 %v13478_v52 }
 0x379   :  { %15740 = vmatprep.mubr.msk.f32.mxu0 %vm4620_vm1, %v18780_v48  ;;  %v18873_v40 = vpop.f32.mrb[130].mxu1  ;;  %v12954_v48 = vunpack.c.l.bf16 %v13479_v5 }
 0x37a   :  { %v18875_v47 = vpop.f32.mrb[131].mxu1  ;;  %15264 = vmatmul.mubr.f32.gmra.mrb[236].mxu1 %v12931_v6  ;;  %v13487_v6 = vld [vmem:[%s20607_s3 + $0x3c0] sm:$0xff]  }
 0x37b   :  { %15266 = vmatprep.mubr.f32.mxu1 %v12934_v44 }
 0x37c   :  { %15741 = vmatmul.mubr.msk.f32.gmra.mrb[114].mxu0 %vm4620_vm1, %v18778_v21  ;;  %v12951_v21 = vunpack.c.h.bf16 %v13478_v52 }
 0x37d   :  { %15743 = vmatprep.mubr.msk.f32.mxu0 %vm4620_vm1, %v18791_v26  ;;  %v18884_v12 = vpop.f32.mrb[132].mxu1  ;;  %v12958_v26 = vunpack.c.l.bf16 %v13480_v53 }
 0x37e   :  { %v18886_v19 = vpop.f32.mrb[133].mxu1  ;;  %15267 = vmatmul.mubr.f32.gmra.mrb[238].mxu1 %v12935_v55  ;;  %v13488_v55 = vld [vmem:[%s20607_s3 + $0x3c8] sm:$0xff]  }
 0x37f   :  { %15269 = vmatprep.mubr.f32.mxu1 %v12938_v30 }
 0x380   :  { %15744 = vmatmul.mubr.msk.f32.gmra.mrb[116].mxu0 %vm4620_vm1, %v18789_v18  ;;  %v12955_v18 = vunpack.c.h.bf16 %v13479_v5 }
 0x381   :  { %15746 = vmatprep.mubr.msk.f32.mxu0 %vm4620_vm1, %v18802_v20  ;;  %v18895_v32 = vpop.f32.mrb[134].mxu1  ;;  %v12962_v20 = vunpack.c.l.bf16 %v13481_v46 }
 0x382   :  { %v18897_v37 = vpop.f32.mrb[135].mxu1  ;;  %15270 = vmatmul.mubr.f32.gmra.mrb[240].mxu1 %v12939_v9  ;;  %v13489_v9 = vld [vmem:[%s20607_s3 + $0x3d0] sm:$0xff]  }
 0x383   :  { %15272 = vmatprep.mubr.f32.mxu1 %v12942_v16 }
 0x384   :  { %15747 = vmatmul.mubr.msk.f32.gmra.mrb[118].mxu0 %vm4620_vm1, %v18800_v17  ;;  %v12959_v17 = vunpack.c.h.bf16 %v13480_v53 }
 0x385   :  { %15751 = vmatprep.mubr.msk.f32.mxu0 %vm4620_vm1, %v18813_v27  ;;  %v18906_v57 = vpop.f32.mrb[136].mxu1  ;;  %v12966_v27 = vunpack.c.l.bf16 %v13482_v23 }
 0x386   :  { %v18908_v25 = vpop.f32.mrb[137].mxu1  ;;  %15273 = vmatmul.mubr.f32.gmra.mrb[242].mxu1 %v12943_v29  ;;  %v13490_v29 = vld [vmem:[%s20607_s3 + $0x3d8] sm:$0xff]  }
 0x387   :  { %15275 = vmatprep.mubr.f32.mxu1 %v12946_v63  ;;  %v12999_v5 = vunpack.c.h.bf16 %v13490_v29 }
 0x388   :  { %15752 = vmatmul.mubr.msk.f32.vlgmr.msra.gmra.mrb[104].mxu0 %vm4620_vm1, %v18811_v62  ;;  %v12963_v62 = vunpack.c.h.bf16 %v13481_v46 }
 0x389   :  { %15754 = vmatprep.mubr.msk.f32.mxu0 %vm4620_vm1, %v18830_v13  ;;  %15776 = vmatpush3.msra.mxu0 %v18818_v11  ;;  %v18923_v24 = vpop.f32.mrb[138].mxu1  ;;  %v13484_v13 = vld [vmem:[%s20607_s3 + $0x3a8] sm:$0xff]  }
 0x38a   :  { %v18925_v2 = vpop.f32.mrb[139].mxu1  ;;  %15276 = vmatmul.mubr.f32.gmra.mrb[244].mxu1 %v12947_v14  ;;  %15801 = vmatprep.subr.mxu0 %v18913_v36  ;;  %v12975_v54 = vunpack.c.h.bf16 %v13484_v13  ;;  %v13491_v14 = vld [vmem:[%s20607_s3 + $0x3e0] sm:$0xff]  }
 0x38b   :  { %15278 = vmatprep.mubr.f32.mxu1 %v12950_v49  ;;  %v13003_v53 = vunpack.c.h.bf16 %v13491_v14 }
 0x38c   :  { %15755 = vmatmul.mubr.msk.f32.gmra.mrb[106].mxu0 %vm4620_vm1, %v18828_v43  ;;  %v12970_v43 = vunpack.c.l.bf16 %v13483_v28 }
 0x38d   :  { %15757 = vmatprep.mubr.msk.f32.mxu0 %vm4620_vm1, %v18842_v33  ;;  %v18935_v39 = vpop.f32.mrb[140].mxu1  ;;  %v13485_v33 = vld [vmem:[%s20607_s3 + $0x3b0] sm:$0xff]  }
 0x38e   :  { %v18937_v45 = vpop.f32.mrb[141].mxu1  ;;  %15279 = vmatmul.mubr.f32.gmra.mrb[246].mxu1 %v12951_v21  ;;  %v12979_v4 = vunpack.c.h.bf16 %v13485_v33 }
 0x38f   :  { %15281 = vmatprep.mubr.f32.mxu1 %v12954_v48 }
 0x390   :  { %15758 = vmatmul.mubr.msk.f32.gmra.mrb[108].mxu0 %vm4620_vm1, %v18840_v59  ;;  %v12974_v59 = vunpack.c.l.bf16 %v13484_v13 }
 0x391   :  { %15760 = vmatprep.mubr.msk.f32.mxu0 %vm4620_vm1, %v18853_v7  ;;  %v18946_v34 = vpop.f32.mrb[142].mxu1  ;;  %v13486_v7 = vld [vmem:[%s20607_s3 + $0x3b8] sm:$0xff]  }
 0x392   :  { %v18948_v8 = vpop.f32.mrb[143].mxu1  ;;  %15282 = vmatmul.mubr.f32.gmra.mrb[248].mxu1 %v12955_v18 }
 0x393   :  { %15284 = vmatprep.mubr.f32.mxu1 %v12958_v26 }
 0x394   :  { %15761 = vmatmul.mubr.msk.f32.gmra.mrb[110].mxu0 %vm4620_vm1, %v18851_v38  ;;  %v12978_v38 = vunpack.c.l.bf16 %v13485_v33 }
 0x395   :  { %15763 = vmatprep.mubr.msk.f32.mxu0 %vm4620_vm1, %v18864_v3  ;;  %v18957_v31 = vpop.f32.mrb[144].mxu1  ;;  %v19008_v3 = vld [vmem:[%s20608_s4 + $0x48] sm:$0xff] }
 0x396   :  { %v18959_v15 = vpop.f32.mrb[145].mxu1  ;;  %15285 = vmatmul.mubr.f32.gmra.mrb[250].mxu1 %v12959_v17 }
 0x397   :  { %15287 = vmatprep.mubr.f32.mxu1 %v12962_v20 }
 0x398   :  { %15764 = vmatmul.mubr.msk.f32.gmra.mrb[112].mxu0 %vm4620_vm1, %v18862_v42  ;;  %v12982_v42 = vunpack.c.l.bf16 %v13486_v7 }
 0x399   :  { %15766 = vmatprep.mubr.msk.f32.mxu0 %vm4620_vm1, %v18875_v47  ;;  %v18968_v51 = vpop.f32.mrb[146].mxu1  ;;  %v12986_v47 = vunpack.c.l.bf16 %v13487_v6 }
 0x39a   :  { %v18970_v11 = vpop.f32.mrb[147].mxu1  ;;  %15288 = vmatmul.mubr.f32.gmra.mrb[252].mxu1 %v12963_v62  ;;  %v13495_v62 = vld [vmem:[%s20607_s3 + $0x400] sm:$0xff]  }
 0x39b   :  { %15290 = vmatprep.mubr.f32.mxu1 %v12966_v27 }
 0x39c   :  { %15767 = vmatmul.mubr.msk.f32.gmra.mrb[114].mxu0 %vm4620_vm1, %v18873_v40  ;;  %v12983_v40 = vunpack.c.h.bf16 %v13486_v7 }
 0x39d   :  { %15769 = vmatprep.mubr.msk.f32.mxu0 %vm4620_vm1, %v18886_v19  ;;  %v18979_v61 = vpop.f32.mrb[148].mxu1  ;;  %v12990_v19 = vunpack.c.l.bf16 %v13488_v55 }
 0x39e   :  { %v18981_v1 = vpop.f32.mrb[149].mxu1  ;;  %15291 = vmatmul.mubr.f32.gmra.mrb[254].mxu1 %v12967_v56  ;;  %v13496_v56 = vld [vmem:[%s20607_s3 + $0x408] sm:$0xff]  }
 0x39f   :  { %15293 = vmatprep.mubr.f32.mxu1 %v12970_v43 }
 0x3a0   :  { %15770 = vmatmul.mubr.msk.f32.gmra.mrb[116].mxu0 %vm4620_vm1, %v18884_v12  ;;  %v12987_v12 = vunpack.c.h.bf16 %v13487_v6 }
 0x3a1   :  { %15772 = vmatprep.mubr.msk.f32.mxu0 %vm4620_vm1, %v18897_v37  ;;  %v18990_v0 = vpop.f32.mrb[150].mxu1  ;;  %v12994_v37 = vunpack.c.l.bf16 %v13489_v9 }
 0x3a2   :  { %v18992_v58 = vpop.f32.mrb[151].mxu1  ;;  %15294 = vmatmul.mubr.f32.gmra.mrb[0].mxu1 %v12971_v22  ;;  %v13497_v22 = vld [vmem:[%s20607_s3 + $0x410] sm:$0xff]  }
 0x3a3   :  { %15296 = vmatprep.mubr.f32.mxu1 %v12974_v59 }
 0x3a4   :  { %15773 = vmatmul.mubr.msk.f32.gmra.mrb[118].mxu0 %vm4620_vm1, %v18895_v32  ;;  %v12991_v32 = vunpack.c.h.bf16 %v13488_v55 }
 0x3a5   :  { %15777 = vmatprep.mubr.msk.f32.mxu0 %vm4620_vm1, %v18908_v25  ;;  %v19001_v35 = vpop.f32.mrb[152].mxu1  ;;  %v12998_v25 = vunpack.c.l.bf16 %v13490_v29 }
 0x3a6   :  { %v19003_v41 = vpop.f32.mrb[153].mxu1  ;;  %15297 = vmatmul.mubr.f32.gmra.mrb[2].mxu1 %v12975_v54  ;;  %v13498_v54 = vld [vmem:[%s20607_s3 + $0x418] sm:$0xff]  }
 0x3a7   :  { %15299 = vmatprep.mubr.f32.mxu1 %v12978_v38  ;;  %v13031_v6 = vunpack.c.h.bf16 %v13498_v54 }
 0x3a8   :  { %15778 = vmatmul.mubr.msk.f32.vlgmr.msra.gmra.mrb[104].mxu0 %vm4620_vm1, %v18906_v57  ;;  %v12995_v57 = vunpack.c.h.bf16 %v13489_v9 }
 0x3a9   :  { %15780 = vmatprep.mubr.msk.f32.mxu0 %vm4620_vm1, %v18925_v2  ;;  %15802 = vmatpush3.msra.mxu0 %v18913_v36  ;;  %v19018_v44 = vpop.f32.mrb[154].mxu1  ;;  %v13492_v2 = vld [vmem:[%s20607_s3 + $0x3e8] sm:$0xff]  }
 0x3aa   :  { %v19020_v60 = vpop.f32.mrb[155].mxu1  ;;  %15300 = vmatmul.mubr.f32.gmra.mrb[4].mxu1 %v12979_v4  ;;  %15827 = vmatprep.subr.mxu0 %v19008_v3  ;;  %v13007_v46 = vunpack.c.h.bf16 %v13492_v2  ;;  %v13499_v4 = vld [vmem:[%s20607_s3 + $0x420] sm:$0xff]  }
 0x3ab   :  { %15302 = vmatprep.mubr.f32.mxu1 %v12982_v42  ;;  %v13035_v55 = vunpack.c.h.bf16 %v13499_v4 }
 0x3ac   :  { %15781 = vmatmul.mubr.msk.f32.gmra.mrb[106].mxu0 %vm4620_vm1, %v18923_v24  ;;  %v13002_v24 = vunpack.c.l.bf16 %v13491_v14 }
 0x3ad   :  { %15783 = vmatprep.mubr.msk.f32.mxu0 %vm4620_vm1, %v18937_v45  ;;  %v19030_v30 = vpop.f32.mrb[156].mxu1  ;;  %v13493_v45 = vld [vmem:[%s20607_s3 + $0x3f0] sm:$0xff]  }
 0x3ae   :  { %v19032_v50 = vpop.f32.mrb[157].mxu1  ;;  %15303 = vmatmul.mubr.f32.gmra.mrb[6].mxu1 %v12983_v40  ;;  %v13011_v23 = vunpack.c.h.bf16 %v13493_v45 }
 0x3af   :  { %15305 = vmatprep.mubr.f32.mxu1 %v12986_v47 }
 0x3b0   :  { %15784 = vmatmul.mubr.msk.f32.gmra.mrb[108].mxu0 %vm4620_vm1, %v18935_v39  ;;  %v13006_v39 = vunpack.c.l.bf16 %v13492_v2 }
 0x3b1   :  { %15786 = vmatprep.mubr.msk.f32.mxu0 %vm4620_vm1, %v18948_v8  ;;  %v19041_v16 = vpop.f32.mrb[158].mxu1  ;;  %v13494_v8 = vld [vmem:[%s20607_s3 + $0x3f8] sm:$0xff]  }
 0x3b2   :  { %v19043_v10 = vpop.f32.mrb[159].mxu1  ;;  %15306 = vmatmul.mubr.f32.gmra.mrb[8].mxu1 %v12987_v12 }
 0x3b3   :  { %15308 = vmatprep.mubr.f32.mxu1 %v12990_v19 }
 0x3b4   :  { %15787 = vmatmul.mubr.msk.f32.gmra.mrb[110].mxu0 %vm4620_vm1, %v18946_v34  ;;  %v13010_v34 = vunpack.c.l.bf16 %v13493_v45 }
 0x3b5   :  { %15789 = vmatprep.mubr.msk.f32.mxu0 %vm4620_vm1, %v18959_v15  ;;  %v19052_v63 = vpop.f32.mrb[160].mxu1  ;;  %v19103_v15 = vld [vmem:[%s20608_s4 + $0x50] sm:$0xff] }
 0x3b6   :  { %v19054_v52 = vpop.f32.mrb[161].mxu1  ;;  %15309 = vmatmul.mubr.f32.gmra.mrb[10].mxu1 %v12991_v32 }
 0x3b7   :  { %15311 = vmatprep.mubr.f32.mxu1 %v12994_v37 }
 0x3b8   :  { %15790 = vmatmul.mubr.msk.f32.gmra.mrb[112].mxu0 %vm4620_vm1, %v18957_v31  ;;  %v13014_v31 = vunpack.c.l.bf16 %v13494_v8 }
 0x3b9   :  { %15792 = vmatprep.mubr.msk.f32.mxu0 %vm4620_vm1, %v18970_v11  ;;  %v19063_v49 = vpop.f32.mrb[162].mxu1  ;;  %v13018_v11 = vunpack.c.l.bf16 %v13495_v62 }
 0x3ba   :  { %v19065_v36 = vpop.f32.mrb[163].mxu1  ;;  %15312 = vmatmul.mubr.f32.gmra.mrb[12].mxu1 %v12995_v57  ;;  %v13503_v57 = vld [vmem:[%s20607_s3 + $0x440] sm:$0xff]  }
 0x3bb   :  { %15314 = vmatprep.mubr.f32.mxu1 %v12998_v25 }
 0x3bc   :  { %15793 = vmatmul.mubr.msk.f32.gmra.mrb[114].mxu0 %vm4620_vm1, %v18968_v51  ;;  %v13015_v51 = vunpack.c.h.bf16 %v13494_v8 }
 0x3bd   :  { %15795 = vmatprep.mubr.msk.f32.mxu0 %vm4620_vm1, %v18981_v1  ;;  %v19074_v21 = vpop.f32.mrb[164].mxu1  ;;  %v13022_v1 = vunpack.c.l.bf16 %v13496_v56 }
 0x3be   :  { %v19076_v48 = vpop.f32.mrb[165].mxu1  ;;  %15315 = vmatmul.mubr.f32.gmra.mrb[14].mxu1 %v12999_v5  ;;  %v13504_v5 = vld [vmem:[%s20607_s3 + $0x448] sm:$0xff]  }
 0x3bf   :  { %15317 = vmatprep.mubr.f32.mxu1 %v13002_v24 }
 0x3c0   :  { %15796 = vmatmul.mubr.msk.f32.gmra.mrb[116].mxu0 %vm4620_vm1, %v18979_v61  ;;  %v13019_v61 = vunpack.c.h.bf16 %v13495_v62 }
 0x3c1   :  { %15798 = vmatprep.mubr.msk.f32.mxu0 %vm4620_vm1, %v18992_v58  ;;  %v19085_v18 = vpop.f32.mrb[166].mxu1  ;;  %v13026_v58 = vunpack.c.l.bf16 %v13497_v22 }
 0x3c2   :  { %v19087_v26 = vpop.f32.mrb[167].mxu1  ;;  %15318 = vmatmul.mubr.f32.gmra.mrb[16].mxu1 %v13003_v53  ;;  %v13505_v53 = vld [vmem:[%s20607_s3 + $0x450] sm:$0xff]  }
 0x3c3   :  { %15320 = vmatprep.mubr.f32.mxu1 %v13006_v39 }
 0x3c4   :  { %15799 = vmatmul.mubr.msk.f32.gmra.mrb[118].mxu0 %vm4620_vm1, %v18990_v0  ;;  %v13023_v0 = vunpack.c.h.bf16 %v13496_v56 }
 0x3c5   :  { %15803 = vmatprep.mubr.msk.f32.mxu0 %vm4620_vm1, %v19003_v41  ;;  %v19096_v17 = vpop.f32.mrb[168].mxu1  ;;  %v13030_v41 = vunpack.c.l.bf16 %v13498_v54 }
 0x3c6   :  { %v19098_v20 = vpop.f32.mrb[169].mxu1  ;;  %15321 = vmatmul.mubr.f32.gmra.mrb[18].mxu1 %v13007_v46  ;;  %v13506_v46 = vld [vmem:[%s20607_s3 + $0x458] sm:$0xff]  }
 0x3c7   :  { %15323 = vmatprep.mubr.f32.mxu1 %v13010_v34  ;;  %v13063_v62 = vunpack.c.h.bf16 %v13506_v46 }
 0x3c8   :  { %15804 = vmatmul.mubr.msk.f32.vlgmr.msra.gmra.mrb[104].mxu0 %vm4620_vm1, %v19001_v35  ;;  %v13027_v35 = vunpack.c.h.bf16 %v13497_v22 }
 0x3c9   :  { %15806 = vmatprep.mubr.msk.f32.mxu0 %vm4620_vm1, %v19020_v60  ;;  %15828 = vmatpush3.msra.mxu0 %v19008_v3  ;;  %v19113_v27 = vpop.f32.mrb[170].mxu1  ;;  %v13500_v60 = vld [vmem:[%s20607_s3 + $0x428] sm:$0xff]  }
 0x3ca   :  { %v19115_v28 = vpop.f32.mrb[171].mxu1  ;;  %15324 = vmatmul.mubr.f32.gmra.mrb[20].mxu1 %v13011_v23  ;;  %15853 = vmatprep.subr.mxu0 %v19103_v15  ;;  %v13039_v9 = vunpack.c.h.bf16 %v13500_v60  ;;  %v13507_v23 = vld [vmem:[%s20607_s3 + $0x460] sm:$0xff]  }
 0x3cb   :  { %15326 = vmatprep.mubr.f32.mxu1 %v13014_v31  ;;  %v13067_v56 = vunpack.c.h.bf16 %v13507_v23 }
 0x3cc   :  { %15807 = vmatmul.mubr.msk.f32.gmra.mrb[106].mxu0 %vm4620_vm1, %v19018_v44  ;;  %v13034_v44 = vunpack.c.l.bf16 %v13499_v4 }
 0x3cd   :  { %15809 = vmatprep.mubr.msk.f32.mxu0 %vm4620_vm1, %v19032_v50  ;;  %v19125_v43 = vpop.f32.mrb[172].mxu1  ;;  %v13501_v50 = vld [vmem:[%s20607_s3 + $0x430] sm:$0xff]  }
 0x3ce   :  { %v19127_v13 = vpop.f32.mrb[173].mxu1  ;;  %15327 = vmatmul.mubr.f32.gmra.mrb[22].mxu1 %v13015_v51  ;;  %v13043_v29 = vunpack.c.h.bf16 %v13501_v50 }
 0x3cf   :  { %15329 = vmatprep.mubr.f32.mxu1 %v13018_v11 }
 0x3d0   :  { %15810 = vmatmul.mubr.msk.f32.gmra.mrb[108].mxu0 %vm4620_vm1, %v19030_v30  ;;  %v13038_v30 = vunpack.c.l.bf16 %v13500_v60 }
 0x3d1   :  { %15812 = vmatprep.mubr.msk.f32.mxu0 %vm4620_vm1, %v19043_v10  ;;  %v19136_v59 = vpop.f32.mrb[174].mxu1  ;;  %v13502_v10 = vld [vmem:[%s20607_s3 + $0x438] sm:$0xff]  }
 0x3d2   :  { %v19138_v33 = vpop.f32.mrb[175].mxu1  ;;  %15330 = vmatmul.mubr.f32.gmra.mrb[24].mxu1 %v13019_v61 }
 0x3d3   :  { %15332 = vmatprep.mubr.f32.mxu1 %v13022_v1 }
 0x3d4   :  { %15813 = vmatmul.mubr.msk.f32.gmra.mrb[110].mxu0 %vm4620_vm1, %v19041_v16  ;;  %v13042_v16 = vunpack.c.l.bf16 %v13501_v50 }
 0x3d5   :  { %15815 = vmatprep.mubr.msk.f32.mxu0 %vm4620_vm1, %v19054_v52  ;;  %v19147_v38 = vpop.f32.mrb[176].mxu1  ;;  %v19198_v52 = vld [vmem:[%s20608_s4 + $0x58] sm:$0xff] }
 0x3d6   :  { %v19149_v7 = vpop.f32.mrb[177].mxu1  ;;  %15333 = vmatmul.mubr.f32.gmra.mrb[26].mxu1 %v13023_v0 }
 0x3d7   :  { %15335 = vmatprep.mubr.f32.mxu1 %v13026_v58 }
 0x3d8   :  { %15816 = vmatmul.mubr.msk.f32.gmra.mrb[112].mxu0 %vm4620_vm1, %v19052_v63  ;;  %v13046_v63 = vunpack.c.l.bf16 %v13502_v10 }
 0x3d9   :  { %15818 = vmatprep.mubr.msk.f32.mxu0 %vm4620_vm1, %v19065_v36  ;;  %v19158_v42 = vpop.f32.mrb[178].mxu1  ;;  %v13050_v36 = vunpack.c.l.bf16 %v13503_v57 }
 0x3da   :  { %v19160_v3 = vpop.f32.mrb[179].mxu1  ;;  %15336 = vmatmul.mubr.f32.gmra.mrb[28].mxu1 %v13027_v35  ;;  %v13511_v35 = vld [vmem:[%s20607_s3 + $0x480] sm:$0xff]  }
 0x3db   :  { %15338 = vmatprep.mubr.f32.mxu1 %v13030_v41 }
 0x3dc   :  { %15819 = vmatmul.mubr.msk.f32.gmra.mrb[114].mxu0 %vm4620_vm1, %v19063_v49  ;;  %v13047_v49 = vunpack.c.h.bf16 %v13502_v10 }
 0x3dd   :  { %15821 = vmatprep.mubr.msk.f32.mxu0 %vm4620_vm1, %v19076_v48  ;;  %v19169_v40 = vpop.f32.mrb[180].mxu1  ;;  %v13054_v48 = vunpack.c.l.bf16 %v13504_v5 }
 0x3de   :  { %v19171_v47 = vpop.f32.mrb[181].mxu1  ;;  %15339 = vmatmul.mubr.f32.gmra.mrb[30].mxu1 %v13031_v6  ;;  %v13512_v6 = vld [vmem:[%s20607_s3 + $0x488] sm:$0xff]  }
 0x3df   :  { %15341 = vmatprep.mubr.f32.mxu1 %v13034_v44 }
 0x3e0   :  { %15822 = vmatmul.mubr.msk.f32.gmra.mrb[116].mxu0 %vm4620_vm1, %v19074_v21  ;;  %v13051_v21 = vunpack.c.h.bf16 %v13503_v57 }
 0x3e1   :  { %15824 = vmatprep.mubr.msk.f32.mxu0 %vm4620_vm1, %v19087_v26  ;;  %v19180_v12 = vpop.f32.mrb[182].mxu1  ;;  %v13058_v26 = vunpack.c.l.bf16 %v13505_v53 }
 0x3e2   :  { %v19182_v19 = vpop.f32.mrb[183].mxu1  ;;  %15342 = vmatmul.mubr.f32.gmra.mrb[32].mxu1 %v13035_v55  ;;  %v13513_v55 = vld [vmem:[%s20607_s3 + $0x490] sm:$0xff]  }
 0x3e3   :  { %15344 = vmatprep.mubr.f32.mxu1 %v13038_v30 }
 0x3e4   :  { %15825 = vmatmul.mubr.msk.f32.gmra.mrb[118].mxu0 %vm4620_vm1, %v19085_v18  ;;  %v13055_v18 = vunpack.c.h.bf16 %v13504_v5 }
 0x3e5   :  { %15829 = vmatprep.mubr.msk.f32.mxu0 %vm4620_vm1, %v19098_v20  ;;  %v19191_v32 = vpop.f32.mrb[184].mxu1  ;;  %v13062_v20 = vunpack.c.l.bf16 %v13506_v46 }
 0x3e6   :  { %v19193_v37 = vpop.f32.mrb[185].mxu1  ;;  %15345 = vmatmul.mubr.f32.gmra.mrb[34].mxu1 %v13039_v9  ;;  %v13514_v9 = vld [vmem:[%s20607_s3 + $0x498] sm:$0xff]  }
 0x3e7   :  { %15347 = vmatprep.mubr.f32.mxu1 %v13042_v16  ;;  %v13095_v57 = vunpack.c.h.bf16 %v13514_v9 }
 0x3e8   :  { %15830 = vmatmul.mubr.msk.f32.vlgmr.msra.gmra.mrb[104].mxu0 %vm4620_vm1, %v19096_v17  ;;  %v13059_v17 = vunpack.c.h.bf16 %v13505_v53 }
 0x3e9   :  { %15832 = vmatprep.mubr.msk.f32.mxu0 %vm4620_vm1, %v19115_v28  ;;  %15854 = vmatpush3.msra.mxu0 %v19103_v15  ;;  %v19208_v25 = vpop.f32.mrb[186].mxu1  ;;  %v13508_v28 = vld [vmem:[%s20607_s3 + $0x468] sm:$0xff]  }
 0x3ea   :  { %v19210_v14 = vpop.f32.mrb[187].mxu1  ;;  %15348 = vmatmul.mubr.f32.gmra.mrb[36].mxu1 %v13043_v29  ;;  %15879 = vmatprep.subr.mxu0 %v19198_v52  ;;  %v13071_v22 = vunpack.c.h.bf16 %v13508_v28  ;;  %v13515_v29 = vld [vmem:[%s20607_s3 + $0x4a0] sm:$0xff]  }
 0x3eb   :  { %15350 = vmatprep.mubr.f32.mxu1 %v13046_v63  ;;  %v13099_v5 = vunpack.c.h.bf16 %v13515_v29 }
 0x3ec   :  { %15833 = vmatmul.mubr.msk.f32.gmra.mrb[106].mxu0 %vm4620_vm1, %v19113_v27  ;;  %v13066_v27 = vunpack.c.l.bf16 %v13507_v23 }
 0x3ed   :  { %15835 = vmatprep.mubr.msk.f32.mxu0 %vm4620_vm1, %v19127_v13  ;;  %v19220_v24 = vpop.f32.mrb[188].mxu1  ;;  %v13509_v13 = vld [vmem:[%s20607_s3 + $0x470] sm:$0xff]  }
 0x3ee   :  { %v19222_v2 = vpop.f32.mrb[189].mxu1  ;;  %15351 = vmatmul.mubr.f32.gmra.mrb[38].mxu1 %v13047_v49  ;;  %v13075_v54 = vunpack.c.h.bf16 %v13509_v13 }
 0x3ef   :  { %15353 = vmatprep.mubr.f32.mxu1 %v13050_v36 }
 0x3f0   :  { %15836 = vmatmul.mubr.msk.f32.gmra.mrb[108].mxu0 %vm4620_vm1, %v19125_v43  ;;  %v13070_v43 = vunpack.c.l.bf16 %v13508_v28 }
 0x3f1   :  { %15838 = vmatprep.mubr.msk.f32.mxu0 %vm4620_vm1, %v19138_v33  ;;  %v19231_v39 = vpop.f32.mrb[190].mxu1  ;;  %v13510_v33 = vld [vmem:[%s20607_s3 + $0x478] sm:$0xff]  }
 0x3f2   :  { %v19233_v45 = vpop.f32.mrb[191].mxu1  ;;  %15354 = vmatmul.mubr.f32.gmra.mrb[40].mxu1 %v13051_v21 }
 0x3f3   :  { %15356 = vmatprep.mubr.f32.mxu1 %v13054_v48 }
 0x3f4   :  { %15839 = vmatmul.mubr.msk.f32.gmra.mrb[110].mxu0 %vm4620_vm1, %v19136_v59  ;;  %v13074_v59 = vunpack.c.l.bf16 %v13509_v13 }
 0x3f5   :  { %15841 = vmatprep.mubr.msk.f32.mxu0 %vm4620_vm1, %v19149_v7  ;;  %v19242_v34 = vpop.f32.mrb[192].mxu1  ;;  %v19293_v7 = vld [vmem:[%s20608_s4 + $0x60] sm:$0xff] }
 0x3f6   :  { %v19244_v8 = vpop.f32.mrb[193].mxu1  ;;  %15357 = vmatmul.mubr.f32.gmra.mrb[42].mxu1 %v13055_v18 }
 0x3f7   :  { %15359 = vmatprep.mubr.f32.mxu1 %v13058_v26 }
 0x3f8   :  { %15842 = vmatmul.mubr.msk.f32.gmra.mrb[112].mxu0 %vm4620_vm1, %v19147_v38  ;;  %v13078_v38 = vunpack.c.l.bf16 %v13510_v33 }
 0x3f9   :  { %15844 = vmatprep.mubr.msk.f32.mxu0 %vm4620_vm1, %v19160_v3  ;;  %v19253_v31 = vpop.f32.mrb[194].mxu1  ;;  %v13082_v3 = vunpack.c.l.bf16 %v13511_v35 }
 0x3fa   :  { %v19255_v15 = vpop.f32.mrb[195].mxu1  ;;  %15360 = vmatmul.mubr.f32.gmra.mrb[44].mxu1 %v13059_v17  ;;  %v13519_v17 = vld [vmem:[%s20607_s3 + $0x4c0] sm:$0xff]  }
 0x3fb   :  { %15362 = vmatprep.mubr.f32.mxu1 %v13062_v20 }
 0x3fc   :  { %15845 = vmatmul.mubr.msk.f32.gmra.mrb[114].mxu0 %vm4620_vm1, %v19158_v42  ;;  %v13079_v42 = vunpack.c.h.bf16 %v13510_v33 }
 0x3fd   :  { %15847 = vmatprep.mubr.msk.f32.mxu0 %vm4620_vm1, %v19171_v47  ;;  %v19264_v51 = vpop.f32.mrb[196].mxu1  ;;  %v13086_v47 = vunpack.c.l.bf16 %v13512_v6 }
 0x3fe   :  { %v19266_v11 = vpop.f32.mrb[197].mxu1  ;;  %15363 = vmatmul.mubr.f32.gmra.mrb[46].mxu1 %v13063_v62  ;;  %v13520_v62 = vld [vmem:[%s20607_s3 + $0x4c8] sm:$0xff]  }
 0x3ff   :  { %15365 = vmatprep.mubr.f32.mxu1 %v13066_v27 }
 0x400   :  { %15848 = vmatmul.mubr.msk.f32.gmra.mrb[116].mxu0 %vm4620_vm1, %v19169_v40  ;;  %v13083_v40 = vunpack.c.h.bf16 %v13511_v35 }
 0x401   :  { %15850 = vmatprep.mubr.msk.f32.mxu0 %vm4620_vm1, %v19182_v19  ;;  %v19275_v61 = vpop.f32.mrb[198].mxu1  ;;  %v13090_v19 = vunpack.c.l.bf16 %v13513_v55 }
 0x402   :  { %v19277_v1 = vpop.f32.mrb[199].mxu1  ;;  %15366 = vmatmul.mubr.f32.gmra.mrb[48].mxu1 %v13067_v56  ;;  %v13521_v56 = vld [vmem:[%s20607_s3 + $0x4d0] sm:$0xff]  }
 0x403   :  { %15368 = vmatprep.mubr.f32.mxu1 %v13070_v43 }
 0x404   :  { %15851 = vmatmul.mubr.msk.f32.gmra.mrb[118].mxu0 %vm4620_vm1, %v19180_v12  ;;  %v13087_v12 = vunpack.c.h.bf16 %v13512_v6 }
 0x405   :  { %15855 = vmatprep.mubr.msk.f32.mxu0 %vm4620_vm1, %v19193_v37  ;;  %v19286_v0 = vpop.f32.mrb[200].mxu1  ;;  %v13094_v37 = vunpack.c.l.bf16 %v13514_v9 }
 0x406   :  { %v19288_v58 = vpop.f32.mrb[201].mxu1  ;;  %15369 = vmatmul.mubr.f32.gmra.mrb[50].mxu1 %v13071_v22  ;;  %v13522_v22 = vld [vmem:[%s20607_s3 + $0x4d8] sm:$0xff]  }
 0x407   :  { %15371 = vmatprep.mubr.f32.mxu1 %v13074_v59  ;;  %v13127_v35 = vunpack.c.h.bf16 %v13522_v22 }
 0x408   :  { %15856 = vmatmul.mubr.msk.f32.vlgmr.msra.gmra.mrb[104].mxu0 %vm4620_vm1, %v19191_v32  ;;  %v13091_v32 = vunpack.c.h.bf16 %v13513_v55 }
 0x409   :  { %15858 = vmatprep.mubr.msk.f32.mxu0 %vm4620_vm1, %v19210_v14  ;;  %15880 = vmatpush3.msra.mxu0 %v19198_v52  ;;  %v19303_v41 = vpop.f32.mrb[202].mxu1  ;;  %v13516_v14 = vld [vmem:[%s20607_s3 + $0x4a8] sm:$0xff]  }
 0x40a   :  { %v19305_v4 = vpop.f32.mrb[203].mxu1  ;;  %15372 = vmatmul.mubr.f32.gmra.mrb[52].mxu1 %v13075_v54  ;;  %15905 = vmatprep.subr.mxu0 %v19293_v7  ;;  %v13103_v53 = vunpack.c.h.bf16 %v13516_v14  ;;  %v13523_v54 = vld [vmem:[%s20607_s3 + $0x4e0] sm:$0xff]  }
 0x40b   :  { %15374 = vmatprep.mubr.f32.mxu1 %v13078_v38  ;;  %v13131_v6 = vunpack.c.h.bf16 %v13523_v54 }
 0x40c   :  { %15859 = vmatmul.mubr.msk.f32.gmra.mrb[106].mxu0 %vm4620_vm1, %v19208_v25  ;;  %v13098_v25 = vunpack.c.l.bf16 %v13515_v29 }
 0x40d   :  { %15861 = vmatprep.mubr.msk.f32.mxu0 %vm4620_vm1, %v19222_v2  ;;  %v19315_v44 = vpop.f32.mrb[204].mxu1  ;;  %v13517_v2 = vld [vmem:[%s20607_s3 + $0x4b0] sm:$0xff]  }
 0x40e   :  { %v19317_v60 = vpop.f32.mrb[205].mxu1  ;;  %15375 = vmatmul.mubr.f32.gmra.mrb[54].mxu1 %v13079_v42  ;;  %v13107_v46 = vunpack.c.h.bf16 %v13517_v2 }
 0x40f   :  { %15377 = vmatprep.mubr.f32.mxu1 %v13082_v3 }
 0x410   :  { %15862 = vmatmul.mubr.msk.f32.gmra.mrb[108].mxu0 %vm4620_vm1, %v19220_v24  ;;  %v13102_v24 = vunpack.c.l.bf16 %v13516_v14 }
 0x411   :  { %15864 = vmatprep.mubr.msk.f32.mxu0 %vm4620_vm1, %v19233_v45  ;;  %v19326_v30 = vpop.f32.mrb[206].mxu1  ;;  %v13518_v45 = vld [vmem:[%s20607_s3 + $0x4b8] sm:$0xff]  }
 0x412   :  { %v19328_v50 = vpop.f32.mrb[207].mxu1  ;;  %15378 = vmatmul.mubr.f32.gmra.mrb[56].mxu1 %v13083_v40 }
 0x413   :  { %15380 = vmatprep.mubr.f32.mxu1 %v13086_v47 }
 0x414   :  { %15865 = vmatmul.mubr.msk.f32.gmra.mrb[110].mxu0 %vm4620_vm1, %v19231_v39  ;;  %v13106_v39 = vunpack.c.l.bf16 %v13517_v2 }
 0x415   :  { %15867 = vmatprep.mubr.msk.f32.mxu0 %vm4620_vm1, %v19244_v8  ;;  %v19337_v16 = vpop.f32.mrb[208].mxu1  ;;  %v19388_v8 = vld [vmem:[%s20608_s4 + $0x68] sm:$0xff] }
 0x416   :  { %v19339_v10 = vpop.f32.mrb[209].mxu1  ;;  %15381 = vmatmul.mubr.f32.gmra.mrb[58].mxu1 %v13087_v12 }
 0x417   :  { %15383 = vmatprep.mubr.f32.mxu1 %v13090_v19 }
 0x418   :  { %15868 = vmatmul.mubr.msk.f32.gmra.mrb[112].mxu0 %vm4620_vm1, %v19242_v34  ;;  %v13110_v34 = vunpack.c.l.bf16 %v13518_v45 }
 0x419   :  { %15870 = vmatprep.mubr.msk.f32.mxu0 %vm4620_vm1, %v19255_v15  ;;  %v19348_v63 = vpop.f32.mrb[210].mxu1  ;;  %v13114_v15 = vunpack.c.l.bf16 %v13519_v17 }
 0x41a   :  { %v19350_v52 = vpop.f32.mrb[211].mxu1  ;;  %15384 = vmatmul.mubr.f32.gmra.mrb[60].mxu1 %v13091_v32  ;;  %v13527_v32 = vld [vmem:[%s20607_s3 + $0x500] sm:$0xff]  }
 0x41b   :  { %15386 = vmatprep.mubr.f32.mxu1 %v13094_v37 }
 0x41c   :  { %15871 = vmatmul.mubr.msk.f32.gmra.mrb[114].mxu0 %vm4620_vm1, %v19253_v31  ;;  %v13111_v31 = vunpack.c.h.bf16 %v13518_v45 }
 0x41d   :  { %15873 = vmatprep.mubr.msk.f32.mxu0 %vm4620_vm1, %v19266_v11  ;;  %v19359_v49 = vpop.f32.mrb[212].mxu1  ;;  %v13118_v11 = vunpack.c.l.bf16 %v13520_v62 }
 0x41e   :  { %v19361_v36 = vpop.f32.mrb[213].mxu1  ;;  %15387 = vmatmul.mubr.f32.gmra.mrb[62].mxu1 %v13095_v57  ;;  %v13528_v57 = vld [vmem:[%s20607_s3 + $0x508] sm:$0xff]  }
 0x41f   :  { %15389 = vmatprep.mubr.f32.mxu1 %v13098_v25 }
 0x420   :  { %15874 = vmatmul.mubr.msk.f32.gmra.mrb[116].mxu0 %vm4620_vm1, %v19264_v51  ;;  %v13115_v51 = vunpack.c.h.bf16 %v13519_v17 }
 0x421   :  { %15876 = vmatprep.mubr.msk.f32.mxu0 %vm4620_vm1, %v19277_v1  ;;  %v19370_v21 = vpop.f32.mrb[214].mxu1  ;;  %v13122_v1 = vunpack.c.l.bf16 %v13521_v56 }
 0x422   :  { %v19372_v48 = vpop.f32.mrb[215].mxu1  ;;  %15390 = vmatmul.mubr.f32.gmra.mrb[64].mxu1 %v13099_v5  ;;  %v13529_v5 = vld [vmem:[%s20607_s3 + $0x510] sm:$0xff]  }
 0x423   :  { %15392 = vmatprep.mubr.f32.mxu1 %v13102_v24 }
 0x424   :  { %15877 = vmatmul.mubr.msk.f32.gmra.mrb[118].mxu0 %vm4620_vm1, %v19275_v61  ;;  %v13119_v61 = vunpack.c.h.bf16 %v13520_v62 }
 0x425   :  { %15881 = vmatprep.mubr.msk.f32.mxu0 %vm4620_vm1, %v19288_v58  ;;  %v19381_v18 = vpop.f32.mrb[216].mxu1  ;;  %v13126_v58 = vunpack.c.l.bf16 %v13522_v22 }
 0x426   :  { %v19383_v26 = vpop.f32.mrb[217].mxu1  ;;  %15393 = vmatmul.mubr.f32.gmra.mrb[66].mxu1 %v13103_v53  ;;  %v13530_v53 = vld [vmem:[%s20607_s3 + $0x518] sm:$0xff]  }
 0x427   :  { %15395 = vmatprep.mubr.f32.mxu1 %v13106_v39  ;;  %v13159_v17 = vunpack.c.h.bf16 %v13530_v53 }
 0x428   :  { %15882 = vmatmul.mubr.msk.f32.vlgmr.msra.gmra.mrb[104].mxu0 %vm4620_vm1, %v19286_v0  ;;  %v13123_v0 = vunpack.c.h.bf16 %v13521_v56 }
 0x429   :  { %15884 = vmatprep.mubr.msk.f32.mxu0 %vm4620_vm1, %v19305_v4  ;;  %15906 = vmatpush3.msra.mxu0 %v19293_v7  ;;  %v19398_v20 = vpop.f32.mrb[218].mxu1  ;;  %v13524_v4 = vld [vmem:[%s20607_s3 + $0x4e8] sm:$0xff]  }
 0x42a   :  { %v19400_v23 = vpop.f32.mrb[219].mxu1  ;;  %15396 = vmatmul.mubr.f32.gmra.mrb[68].mxu1 %v13107_v46  ;;  %15931 = vmatprep.subr.mxu0 %v19388_v8  ;;  %v13135_v55 = vunpack.c.h.bf16 %v13524_v4  ;;  %v13531_v46 = vld [vmem:[%s20607_s3 + $0x520] sm:$0xff]  }
 0x42b   :  { %15398 = vmatprep.mubr.f32.mxu1 %v13110_v34  ;;  %v13163_v62 = vunpack.c.h.bf16 %v13531_v46 }
 0x42c   :  { %15885 = vmatmul.mubr.msk.f32.gmra.mrb[106].mxu0 %vm4620_vm1, %v19303_v41  ;;  %v13130_v41 = vunpack.c.l.bf16 %v13523_v54 }
 0x42d   :  { %15887 = vmatprep.mubr.msk.f32.mxu0 %vm4620_vm1, %v19317_v60  ;;  %v19410_v27 = vpop.f32.mrb[220].mxu1  ;;  %v13525_v60 = vld [vmem:[%s20607_s3 + $0x4f0] sm:$0xff]  }
 0x42e   :  { %v19412_v28 = vpop.f32.mrb[221].mxu1  ;;  %15399 = vmatmul.mubr.f32.gmra.mrb[70].mxu1 %v13111_v31  ;;  %v13139_v9 = vunpack.c.h.bf16 %v13525_v60 }
 0x42f   :  { %15401 = vmatprep.mubr.f32.mxu1 %v13114_v15 }
 0x430   :  { %15888 = vmatmul.mubr.msk.f32.gmra.mrb[108].mxu0 %vm4620_vm1, %v19315_v44  ;;  %v13134_v44 = vunpack.c.l.bf16 %v13524_v4 }
 0x431   :  { %15890 = vmatprep.mubr.msk.f32.mxu0 %vm4620_vm1, %v19328_v50  ;;  %v19421_v43 = vpop.f32.mrb[222].mxu1  ;;  %v13526_v50 = vld [vmem:[%s20607_s3 + $0x4f8] sm:$0xff]  }
 0x432   :  { %v19423_v13 = vpop.f32.mrb[223].mxu1  ;;  %15402 = vmatmul.mubr.f32.gmra.mrb[72].mxu1 %v13115_v51 }
 0x433   :  { %15404 = vmatprep.mubr.f32.mxu1 %v13118_v11 }
 0x434   :  { %15891 = vmatmul.mubr.msk.f32.gmra.mrb[110].mxu0 %vm4620_vm1, %v19326_v30  ;;  %v13138_v30 = vunpack.c.l.bf16 %v13525_v60 }
 0x435   :  { %15893 = vmatprep.mubr.msk.f32.mxu0 %vm4620_vm1, %v19339_v10  ;;  %v19432_v59 = vpop.f32.mrb[224].mxu1  ;;  %v19483_v10 = vld [vmem:[%s20608_s4 + $0x70] sm:$0xff] }
 0x436   :  { %v19434_v33 = vpop.f32.mrb[225].mxu1  ;;  %15405 = vmatmul.mubr.f32.gmra.mrb[74].mxu1 %v13119_v61 }
 0x437   :  { %15407 = vmatprep.mubr.f32.mxu1 %v13122_v1 }
 0x438   :  { %15894 = vmatmul.mubr.msk.f32.gmra.mrb[112].mxu0 %vm4620_vm1, %v19337_v16  ;;  %v13142_v16 = vunpack.c.l.bf16 %v13526_v50 }
 0x439   :  { %15896 = vmatprep.mubr.msk.f32.mxu0 %vm4620_vm1, %v19350_v52  ;;  %v19443_v38 = vpop.f32.mrb[226].mxu1  ;;  %v13146_v52 = vunpack.c.l.bf16 %v13527_v32 }
 0x43a   :  { %v19445_v7 = vpop.f32.mrb[227].mxu1  ;;  %15408 = vmatmul.mubr.f32.gmra.mrb[76].mxu1 %v13123_v0  ;;  %v13535_v0 = vld [vmem:[%s20607_s3 + $0x540] sm:$0xff]  }
 0x43b   :  { %15410 = vmatprep.mubr.f32.mxu1 %v13126_v58 }
 0x43c   :  { %15897 = vmatmul.mubr.msk.f32.gmra.mrb[114].mxu0 %vm4620_vm1, %v19348_v63  ;;  %v13143_v63 = vunpack.c.h.bf16 %v13526_v50 }
 0x43d   :  { %15899 = vmatprep.mubr.msk.f32.mxu0 %vm4620_vm1, %v19361_v36  ;;  %v19454_v42 = vpop.f32.mrb[228].mxu1  ;;  %v13150_v36 = vunpack.c.l.bf16 %v13528_v57 }
 0x43e   :  { %v19456_v3 = vpop.f32.mrb[229].mxu1  ;;  %15411 = vmatmul.mubr.f32.gmra.mrb[78].mxu1 %v13127_v35  ;;  %v13536_v35 = vld [vmem:[%s20607_s3 + $0x548] sm:$0xff]  }
 0x43f   :  { %15413 = vmatprep.mubr.f32.mxu1 %v13130_v41 }
 0x440   :  { %15900 = vmatmul.mubr.msk.f32.gmra.mrb[116].mxu0 %vm4620_vm1, %v19359_v49  ;;  %v13147_v49 = vunpack.c.h.bf16 %v13527_v32 }
 0x441   :  { %15902 = vmatprep.mubr.msk.f32.mxu0 %vm4620_vm1, %v19372_v48  ;;  %v19465_v40 = vpop.f32.mrb[230].mxu1  ;;  %v13154_v48 = vunpack.c.l.bf16 %v13529_v5 }
 0x442   :  { %v19467_v47 = vpop.f32.mrb[231].mxu1  ;;  %15414 = vmatmul.mubr.f32.gmra.mrb[80].mxu1 %v13131_v6  ;;  %v13537_v6 = vld [vmem:[%s20607_s3 + $0x550] sm:$0xff]  }
 0x443   :  { %15416 = vmatprep.mubr.f32.mxu1 %v13134_v44 }
 0x444   :  { %15903 = vmatmul.mubr.msk.f32.gmra.mrb[118].mxu0 %vm4620_vm1, %v19370_v21  ;;  %v13151_v21 = vunpack.c.h.bf16 %v13528_v57 }
 0x445   :  { %15907 = vmatprep.mubr.msk.f32.mxu0 %vm4620_vm1, %v19383_v26  ;;  %v19476_v12 = vpop.f32.mrb[232].mxu1  ;;  %v13158_v26 = vunpack.c.l.bf16 %v13530_v53 }
 0x446   :  { %v19478_v19 = vpop.f32.mrb[233].mxu1  ;;  %15417 = vmatmul.mubr.f32.gmra.mrb[82].mxu1 %v13135_v55  ;;  %v13538_v55 = vld [vmem:[%s20607_s3 + $0x558] sm:$0xff]  }
 0x447   :  { %15419 = vmatprep.mubr.f32.mxu1 %v13138_v30  ;;  %v13191_v32 = vunpack.c.h.bf16 %v13538_v55 }
 0x448   :  { %15908 = vmatmul.mubr.msk.f32.vlgmr.msra.gmra.mrb[104].mxu0 %vm4620_vm1, %v19381_v18  ;;  %v13155_v18 = vunpack.c.h.bf16 %v13529_v5 }
 0x449   :  { %15910 = vmatprep.mubr.msk.f32.mxu0 %vm4620_vm1, %v19400_v23  ;;  %15932 = vmatpush3.msra.mxu0 %v19388_v8  ;;  %v19493_v37 = vpop.f32.mrb[234].mxu1  ;;  %v13532_v23 = vld [vmem:[%s20607_s3 + $0x528] sm:$0xff]  }
 0x44a   :  { %v19495_v29 = vpop.f32.mrb[235].mxu1  ;;  %15420 = vmatmul.mubr.f32.gmra.mrb[84].mxu1 %v13139_v9  ;;  %15957 = vmatprep.subr.mxu0 %v19483_v10  ;;  %v13167_v56 = vunpack.c.h.bf16 %v13532_v23  ;;  %v13539_v9 = vld [vmem:[%s20607_s3 + $0x560] sm:$0xff]  }
 0x44b   :  { %15422 = vmatprep.mubr.f32.mxu1 %v13142_v16  ;;  %v13195_v57 = vunpack.c.h.bf16 %v13539_v9 }
 0x44c   :  { %15911 = vmatmul.mubr.msk.f32.gmra.mrb[106].mxu0 %vm4620_vm1, %v19398_v20  ;;  %v13162_v20 = vunpack.c.l.bf16 %v13531_v46 }
 0x44d   :  { %15913 = vmatprep.mubr.msk.f32.mxu0 %vm4620_vm1, %v19412_v28  ;;  %v19505_v25 = vpop.f32.mrb[236].mxu1  ;;  %v13533_v28 = vld [vmem:[%s20607_s3 + $0x530] sm:$0xff]  }
 0x44e   :  { %v19507_v14 = vpop.f32.mrb[237].mxu1  ;;  %15423 = vmatmul.mubr.f32.gmra.mrb[86].mxu1 %v13143_v63  ;;  %v13171_v22 = vunpack.c.h.bf16 %v13533_v28 }
 0x44f   :  { %15425 = vmatprep.mubr.f32.mxu1 %v13146_v52 }
 0x450   :  { %15914 = vmatmul.mubr.msk.f32.gmra.mrb[108].mxu0 %vm4620_vm1, %v19410_v27  ;;  %v13166_v27 = vunpack.c.l.bf16 %v13532_v23 }
 0x451   :  { %15916 = vmatprep.mubr.msk.f32.mxu0 %vm4620_vm1, %v19423_v13  ;;  %v19516_v24 = vpop.f32.mrb[238].mxu1  ;;  %v13534_v13 = vld [vmem:[%s20607_s3 + $0x538] sm:$0xff]  }
 0x452   :  { %v19518_v2 = vpop.f32.mrb[239].mxu1  ;;  %15426 = vmatmul.mubr.f32.gmra.mrb[88].mxu1 %v13147_v49 }
 0x453   :  { %15428 = vmatprep.mubr.f32.mxu1 %v13150_v36 }
 0x454   :  { %15917 = vmatmul.mubr.msk.f32.gmra.mrb[110].mxu0 %vm4620_vm1, %v19421_v43  ;;  %v13170_v43 = vunpack.c.l.bf16 %v13533_v28 }
 0x455   :  { %15919 = vmatprep.mubr.msk.f32.mxu0 %vm4620_vm1, %v19434_v33  ;;  %v19527_v39 = vpop.f32.mrb[240].mxu1  ;;  %v19578_v33 = vld [vmem:[%s20608_s4 + $0x78] sm:$0xff] }
 0x456   :  { %v19529_v45 = vpop.f32.mrb[241].mxu1  ;;  %15429 = vmatmul.mubr.f32.gmra.mrb[90].mxu1 %v13151_v21 }
 0x457   :  { %15431 = vmatprep.mubr.f32.mxu1 %v13154_v48 }
 0x458   :  { %15920 = vmatmul.mubr.msk.f32.gmra.mrb[112].mxu0 %vm4620_vm1, %v19432_v59  ;;  %v13174_v59 = vunpack.c.l.bf16 %v13534_v13 }
 0x459   :  { %15922 = vmatprep.mubr.msk.f32.mxu0 %vm4620_vm1, %v19445_v7  ;;  %v19538_v34 = vpop.f32.mrb[242].mxu1  ;;  %v13178_v7 = vunpack.c.l.bf16 %v13535_v0 }
 0x45a   :  { %v19540_v8 = vpop.f32.mrb[243].mxu1  ;;  %15432 = vmatmul.mubr.f32.gmra.mrb[92].mxu1 %v13155_v18  ;;  %v13543_v18 = vld [vmem:[%s20607_s3 + $0x580] sm:$0xff]  }
 0x45b   :  { %15434 = vmatprep.mubr.f32.mxu1 %v13158_v26 }
 0x45c   :  { %15923 = vmatmul.mubr.msk.f32.gmra.mrb[114].mxu0 %vm4620_vm1, %v19443_v38  ;;  %v13175_v38 = vunpack.c.h.bf16 %v13534_v13 }
 0x45d   :  { %15925 = vmatprep.mubr.msk.f32.mxu0 %vm4620_vm1, %v19456_v3  ;;  %v19549_v31 = vpop.f32.mrb[244].mxu1  ;;  %v13182_v3 = vunpack.c.l.bf16 %v13536_v35 }
 0x45e   :  { %v19551_v15 = vpop.f32.mrb[245].mxu1  ;;  %15435 = vmatmul.mubr.f32.gmra.mrb[94].mxu1 %v13159_v17  ;;  %v13544_v17 = vld [vmem:[%s20607_s3 + $0x588] sm:$0xff]  }
 0x45f   :  { %15437 = vmatprep.mubr.f32.mxu1 %v13162_v20 }
 0x460   :  { %15926 = vmatmul.mubr.msk.f32.gmra.mrb[116].mxu0 %vm4620_vm1, %v19454_v42  ;;  %v13179_v42 = vunpack.c.h.bf16 %v13535_v0 }
 0x461   :  { %15928 = vmatprep.mubr.msk.f32.mxu0 %vm4620_vm1, %v19467_v47  ;;  %v19560_v51 = vpop.f32.mrb[246].mxu1  ;;  %v13186_v47 = vunpack.c.l.bf16 %v13537_v6 }
 0x462   :  { %v19562_v11 = vpop.f32.mrb[247].mxu1  ;;  %15438 = vmatmul.mubr.f32.gmra.mrb[96].mxu1 %v13163_v62  ;;  %v13545_v62 = vld [vmem:[%s20607_s3 + $0x590] sm:$0xff]  }
 0x463   :  { %15440 = vmatprep.mubr.f32.mxu1 %v13166_v27 }
 0x464   :  { %15929 = vmatmul.mubr.msk.f32.gmra.mrb[118].mxu0 %vm4620_vm1, %v19465_v40  ;;  %v13183_v40 = vunpack.c.h.bf16 %v13536_v35 }
 0x465   :  { %15933 = vmatprep.mubr.msk.f32.mxu0 %vm4620_vm1, %v19478_v19  ;;  %v19571_v61 = vpop.f32.mrb[248].mxu1  ;;  %v13190_v19 = vunpack.c.l.bf16 %v13538_v55 }
 0x466   :  { %v19573_v1 = vpop.f32.mrb[249].mxu1  ;;  %15441 = vmatmul.mubr.f32.gmra.mrb[98].mxu1 %v13167_v56  ;;  %v13546_v56 = vld [vmem:[%s20607_s3 + $0x598] sm:$0xff]  }
 0x467   :  { %15443 = vmatprep.mubr.f32.mxu1 %v13170_v43  ;;  %v13223_v0 = vunpack.c.h.bf16 %v13546_v56 }
 0x468   :  { %15934 = vmatmul.mubr.msk.f32.vlgmr.msra.gmra.mrb[104].mxu0 %vm4620_vm1, %v19476_v12  ;;  %v13187_v12 = vunpack.c.h.bf16 %v13537_v6 }
 0x469   :  { %15936 = vmatprep.mubr.msk.f32.mxu0 %vm4620_vm1, %v19495_v29  ;;  %15958 = vmatpush3.msra.mxu0 %v19483_v10  ;;  %v19588_v58 = vpop.f32.mrb[250].mxu1  ;;  %v13540_v29 = vld [vmem:[%s20607_s3 + $0x568] sm:$0xff]  }
 0x46a   :  { %v19590_v54 = vpop.f32.mrb[251].mxu1  ;;  %15444 = vmatmul.mubr.f32.gmra.mrb[100].mxu1 %v13171_v22  ;;  %15983 = vmatprep.subr.mxu0 %v19578_v33  ;;  %v13199_v5 = vunpack.c.h.bf16 %v13540_v29  ;;  %v13547_v22 = vld [vmem:[%s20607_s3 + $0x5a0] sm:$0xff]  }
 0x46b   :  { %15446 = vmatprep.mubr.f32.mxu1 %v13174_v59  ;;  %v13227_v35 = vunpack.c.h.bf16 %v13547_v22 }
 0x46c   :  { %15937 = vmatmul.mubr.msk.f32.gmra.mrb[106].mxu0 %vm4620_vm1, %v19493_v37  ;;  %v13194_v37 = vunpack.c.l.bf16 %v13539_v9 }
 0x46d   :  { %15939 = vmatprep.mubr.msk.f32.mxu0 %vm4620_vm1, %v19507_v14  ;;  %v19600_v41 = vpop.f32.mrb[252].mxu1  ;;  %v13541_v14 = vld [vmem:[%s20607_s3 + $0x570] sm:$0xff]  }
 0x46e   :  { %v19602_v4 = vpop.f32.mrb[253].mxu1  ;;  %15447 = vmatmul.mubr.f32.gmra.mrb[102].mxu1 %v13175_v38  ;;  %v13203_v53 = vunpack.c.h.bf16 %v13541_v14 }
 0x46f   :  { %15449 = vmatprep.mubr.f32.mxu1 %v13178_v7 }
 0x470   :  { %15940 = vmatmul.mubr.msk.f32.gmra.mrb[108].mxu0 %vm4620_vm1, %v19505_v25  ;;  %v13198_v25 = vunpack.c.l.bf16 %v13540_v29 }
 0x471   :  { %15942 = vmatprep.mubr.msk.f32.mxu0 %vm4620_vm1, %v19518_v2  ;;  %v19611_v44 = vpop.f32.mrb[254].mxu1  ;;  %v13542_v2 = vld [vmem:[%s20607_s3 + $0x578] sm:$0xff]  }
 0x472   :  { %v19613_v60 = vpop.f32.mrb[255].mxu1  ;;  %15450 = vmatmul.mubr.f32.gmra.mrb[104].mxu1 %v13179_v42 }
 0x473   :  { %15452 = vmatprep.mubr.f32.mxu1 %v13182_v3 }
 0x474   :  { %15943 = vmatmul.mubr.msk.f32.gmra.mrb[110].mxu0 %vm4620_vm1, %v19516_v24  ;;  %v13202_v24 = vunpack.c.l.bf16 %v13541_v14 }
 0x475   :  { %15945 = vmatprep.mubr.msk.f32.mxu0 %vm4620_vm1, %v19529_v45  ;;  %v19622_v30 = vpop.f32.mrb[0].mxu1  ;;  %v19673_v45 = vld [vmem:[%s20608_s4 + $0x80] sm:$0xff] }
 0x476   :  { %v19624_v50 = vpop.f32.mrb[1].mxu1  ;;  %15453 = vmatmul.mubr.f32.gmra.mrb[106].mxu1 %v13183_v40 }
 0x477   :  { %15455 = vmatprep.mubr.f32.mxu1 %v13186_v47 }
 0x478   :  { %15946 = vmatmul.mubr.msk.f32.gmra.mrb[112].mxu0 %vm4620_vm1, %v19527_v39  ;;  %v13206_v39 = vunpack.c.l.bf16 %v13542_v2 }
 0x479   :  { %15948 = vmatprep.mubr.msk.f32.mxu0 %vm4620_vm1, %v19540_v8  ;;  %v19633_v16 = vpop.f32.mrb[2].mxu1  ;;  %v13210_v8 = vunpack.c.l.bf16 %v13543_v18 }
 0x47a   :  { %v19635_v10 = vpop.f32.mrb[3].mxu1  ;;  %15456 = vmatmul.mubr.f32.gmra.mrb[108].mxu1 %v13187_v12  ;;  %v13551_v12 = vld [vmem:[%s20607_s3 + $0x5c0] sm:$0xff]  }
 0x47b   :  { %15458 = vmatprep.mubr.f32.mxu1 %v13190_v19 }
 0x47c   :  { %15949 = vmatmul.mubr.msk.f32.gmra.mrb[114].mxu0 %vm4620_vm1, %v19538_v34  ;;  %v13207_v34 = vunpack.c.h.bf16 %v13542_v2 }
 0x47d   :  { %15951 = vmatprep.mubr.msk.f32.mxu0 %vm4620_vm1, %v19551_v15  ;;  %v19644_v63 = vpop.f32.mrb[4].mxu1  ;;  %v13214_v15 = vunpack.c.l.bf16 %v13544_v17 }
 0x47e   :  { %v19646_v52 = vpop.f32.mrb[5].mxu1  ;;  %15459 = vmatmul.mubr.f32.gmra.mrb[110].mxu1 %v13191_v32  ;;  %v13552_v32 = vld [vmem:[%s20607_s3 + $0x5c8] sm:$0xff]  }
 0x47f   :  { %15461 = vmatprep.mubr.f32.mxu1 %v13194_v37 }
 0x480   :  { %15952 = vmatmul.mubr.msk.f32.gmra.mrb[116].mxu0 %vm4620_vm1, %v19549_v31  ;;  %v13211_v31 = vunpack.c.h.bf16 %v13543_v18 }
 0x481   :  { %15954 = vmatprep.mubr.msk.f32.mxu0 %vm4620_vm1, %v19562_v11  ;;  %v19655_v49 = vpop.f32.mrb[6].mxu1  ;;  %v13218_v11 = vunpack.c.l.bf16 %v13545_v62 }
 0x482   :  { %v19657_v36 = vpop.f32.mrb[7].mxu1  ;;  %15462 = vmatmul.mubr.f32.gmra.mrb[112].mxu1 %v13195_v57  ;;  %v13553_v57 = vld [vmem:[%s20607_s3 + $0x5d0] sm:$0xff]  }
 0x483   :  { %15464 = vmatprep.mubr.f32.mxu1 %v13198_v25 }
 0x484   :  { %15955 = vmatmul.mubr.msk.f32.gmra.mrb[118].mxu0 %vm4620_vm1, %v19560_v51  ;;  %v13215_v51 = vunpack.c.h.bf16 %v13544_v17 }
 0x485   :  { %15959 = vmatprep.mubr.msk.f32.mxu0 %vm4620_vm1, %v19573_v1  ;;  %v19666_v21 = vpop.f32.mrb[8].mxu1  ;;  %v13222_v1 = vunpack.c.l.bf16 %v13546_v56 }
 0x486   :  { %v19668_v48 = vpop.f32.mrb[9].mxu1  ;;  %15465 = vmatmul.mubr.f32.gmra.mrb[114].mxu1 %v13199_v5  ;;  %v13554_v5 = vld [vmem:[%s20607_s3 + $0x5d8] sm:$0xff]  }
 0x487   :  { %15467 = vmatprep.mubr.f32.mxu1 %v13202_v24  ;;  %v13255_v18 = vunpack.c.h.bf16 %v13554_v5 }
 0x488   :  { %15960 = vmatmul.mubr.msk.f32.vlgmr.msra.gmra.mrb[104].mxu0 %vm4620_vm1, %v19571_v61  ;;  %v13219_v61 = vunpack.c.h.bf16 %v13545_v62 }
 0x489   :  { %15962 = vmatprep.mubr.msk.f32.mxu0 %vm4620_vm1, %v19590_v54  ;;  %15984 = vmatpush3.msra.mxu0 %v19578_v33  ;;  %v19683_v26 = vpop.f32.mrb[10].mxu1  ;;  %v13548_v54 = vld [vmem:[%s20607_s3 + $0x5a8] sm:$0xff]  }
 0x48a   :  { %v19685_v46 = vpop.f32.mrb[11].mxu1  ;;  %15468 = vmatmul.mubr.f32.gmra.mrb[116].mxu1 %v13203_v53  ;;  %16009 = vmatprep.subr.mxu0 %v19673_v45  ;;  %v13231_v6 = vunpack.c.h.bf16 %v13548_v54  ;;  %v13555_v53 = vld [vmem:[%s20607_s3 + $0x5e0] sm:$0xff]  }
 0x48b   :  { %15470 = vmatprep.mubr.f32.mxu1 %v13206_v39  ;;  %v13259_v17 = vunpack.c.h.bf16 %v13555_v53 }
 0x48c   :  { %15963 = vmatmul.mubr.msk.f32.gmra.mrb[106].mxu0 %vm4620_vm1, %v19588_v58  ;;  %v13226_v58 = vunpack.c.l.bf16 %v13547_v22 }
 0x48d   :  { %15965 = vmatprep.mubr.msk.f32.mxu0 %vm4620_vm1, %v19602_v4  ;;  %v19695_v20 = vpop.f32.mrb[12].mxu1  ;;  %v13549_v4 = vld [vmem:[%s20607_s3 + $0x5b0] sm:$0xff]  }
 0x48e   :  { %v19697_v23 = vpop.f32.mrb[13].mxu1  ;;  %15471 = vmatmul.mubr.f32.gmra.mrb[118].mxu1 %v13207_v34  ;;  %v13235_v55 = vunpack.c.h.bf16 %v13549_v4 }
 0x48f   :  { %15473 = vmatprep.mubr.f32.mxu1 %v13210_v8 }
 0x490   :  { %15966 = vmatmul.mubr.msk.f32.gmra.mrb[108].mxu0 %vm4620_vm1, %v19600_v41  ;;  %v13230_v41 = vunpack.c.l.bf16 %v13548_v54 }
 0x491   :  { %15968 = vmatprep.mubr.msk.f32.mxu0 %vm4620_vm1, %v19613_v60  ;;  %v19706_v27 = vpop.f32.mrb[14].mxu1  ;;  %v13550_v60 = vld [vmem:[%s20607_s3 + $0x5b8] sm:$0xff]  }
 0x492   :  { %v19708_v28 = vpop.f32.mrb[15].mxu1  ;;  %15474 = vmatmul.mubr.f32.gmra.mrb[120].mxu1 %v13211_v31 }
 0x493   :  { %15476 = vmatprep.mubr.f32.mxu1 %v13214_v15 }
 0x494   :  { %15969 = vmatmul.mubr.msk.f32.gmra.mrb[110].mxu0 %vm4620_vm1, %v19611_v44  ;;  %v13234_v44 = vunpack.c.l.bf16 %v13549_v4 }
 0x495   :  { %15971 = vmatprep.mubr.msk.f32.mxu0 %vm4620_vm1, %v19624_v50  ;;  %v19717_v43 = vpop.f32.mrb[16].mxu1  ;;  %v19768_v50 = vld [vmem:[%s20608_s4 + $0x88] sm:$0xff] }
 0x496   :  { %v19719_v13 = vpop.f32.mrb[17].mxu1  ;;  %15477 = vmatmul.mubr.f32.gmra.mrb[122].mxu1 %v13215_v51 }
 0x497   :  { %15479 = vmatprep.mubr.f32.mxu1 %v13218_v11 }
 0x498   :  { %15972 = vmatmul.mubr.msk.f32.gmra.mrb[112].mxu0 %vm4620_vm1, %v19622_v30  ;;  %v13238_v30 = vunpack.c.l.bf16 %v13550_v60 }
 0x499   :  { %15974 = vmatprep.mubr.msk.f32.mxu0 %vm4620_vm1, %v19635_v10  ;;  %v19728_v59 = vpop.f32.mrb[18].mxu1  ;;  %v13242_v10 = vunpack.c.l.bf16 %v13551_v12 }
 0x49a   :  { %v19730_v33 = vpop.f32.mrb[19].mxu1  ;;  %15480 = vmatmul.mubr.f32.gmra.mrb[124].mxu1 %v13219_v61  ;;  %v13559_v61 = vld [vmem:[%s20607_s3 + $0x600] sm:$0xff]  }
 0x49b   :  { %15482 = vmatprep.mubr.f32.mxu1 %v13222_v1 }
 0x49c   :  { %15975 = vmatmul.mubr.msk.f32.gmra.mrb[114].mxu0 %vm4620_vm1, %v19633_v16  ;;  %v13239_v16 = vunpack.c.h.bf16 %v13550_v60 }
 0x49d   :  { %15977 = vmatprep.mubr.msk.f32.mxu0 %vm4620_vm1, %v19646_v52  ;;  %v19739_v38 = vpop.f32.mrb[20].mxu1  ;;  %v13246_v52 = vunpack.c.l.bf16 %v13552_v32 }
 0x49e   :  { %v19741_v7 = vpop.f32.mrb[21].mxu1  ;;  %15483 = vmatmul.mubr.f32.gmra.mrb[126].mxu1 %v13223_v0  ;;  %v13560_v0 = vld [vmem:[%s20607_s3 + $0x608] sm:$0xff]  }
 0x49f   :  { %15485 = vmatprep.mubr.f32.mxu1 %v13226_v58 }
 0x4a0   :  { %15978 = vmatmul.mubr.msk.f32.gmra.mrb[116].mxu0 %vm4620_vm1, %v19644_v63  ;;  %v13243_v63 = vunpack.c.h.bf16 %v13551_v12 }
 0x4a1   :  { %15980 = vmatprep.mubr.msk.f32.mxu0 %vm4620_vm1, %v19657_v36  ;;  %v19750_v42 = vpop.f32.mrb[22].mxu1  ;;  %v13250_v36 = vunpack.c.l.bf16 %v13553_v57 }
 0x4a2   :  { %v19752_v3 = vpop.f32.mrb[23].mxu1  ;;  %15486 = vmatmul.mubr.f32.gmra.mrb[128].mxu1 %v13227_v35  ;;  %v13561_v35 = vld [vmem:[%s20607_s3 + $0x610] sm:$0xff]  }
 0x4a3   :  { %15488 = vmatprep.mubr.f32.mxu1 %v13230_v41 }
 0x4a4   :  { %15981 = vmatmul.mubr.msk.f32.gmra.mrb[118].mxu0 %vm4620_vm1, %v19655_v49  ;;  %v13247_v49 = vunpack.c.h.bf16 %v13552_v32 }
 0x4a5   :  { %15985 = vmatprep.mubr.msk.f32.mxu0 %vm4620_vm1, %v19668_v48  ;;  %v19761_v40 = vpop.f32.mrb[24].mxu1  ;;  %v13254_v48 = vunpack.c.l.bf16 %v13554_v5 }
 0x4a6   :  { %v19763_v47 = vpop.f32.mrb[25].mxu1  ;;  %15489 = vmatmul.mubr.f32.gmra.mrb[130].mxu1 %v13231_v6  ;;  %v13562_v6 = vld [vmem:[%s20607_s3 + $0x618] sm:$0xff]  }
 0x4a7   :  { %15491 = vmatprep.mubr.f32.mxu1 %v13234_v44  ;;  %v13287_v12 = vunpack.c.h.bf16 %v13562_v6 }
 0x4a8   :  { %15986 = vmatmul.mubr.msk.f32.vlgmr.msra.gmra.mrb[104].mxu0 %vm4620_vm1, %v19666_v21  ;;  %v13251_v21 = vunpack.c.h.bf16 %v13553_v57 }
 0x4a9   :  { %15988 = vmatprep.mubr.msk.f32.mxu0 %vm4620_vm1, %v19685_v46  ;;  %16010 = vmatpush3.msra.mxu0 %v19673_v45  ;;  %v19778_v19 = vpop.f32.mrb[26].mxu1  ;;  %v13556_v46 = vld [vmem:[%s20607_s3 + $0x5e8] sm:$0xff]  }
 0x4aa   :  { %v19780_v9 = vpop.f32.mrb[27].mxu1  ;;  %15492 = vmatmul.mubr.f32.gmra.mrb[132].mxu1 %v13235_v55  ;;  %16035 = vmatprep.subr.mxu0 %v19768_v50  ;;  %v13263_v62 = vunpack.c.h.bf16 %v13556_v46  ;;  %v13563_v55 = vld [vmem:[%s20607_s3 + $0x620] sm:$0xff]  }
 0x4ab   :  { %15494 = vmatprep.mubr.f32.mxu1 %v13238_v30  ;;  %v13291_v32 = vunpack.c.h.bf16 %v13563_v55 }
 0x4ac   :  { %15989 = vmatmul.mubr.msk.f32.gmra.mrb[106].mxu0 %vm4620_vm1, %v19683_v26  ;;  %v13258_v26 = vunpack.c.l.bf16 %v13555_v53 }
 0x4ad   :  { %15991 = vmatprep.mubr.msk.f32.mxu0 %vm4620_vm1, %v19697_v23  ;;  %v19790_v37 = vpop.f32.mrb[28].mxu1  ;;  %v13557_v23 = vld [vmem:[%s20607_s3 + $0x5f0] sm:$0xff]  }
 0x4ae   :  { %v19792_v29 = vpop.f32.mrb[29].mxu1  ;;  %15495 = vmatmul.mubr.f32.gmra.mrb[134].mxu1 %v13239_v16  ;;  %v13267_v56 = vunpack.c.h.bf16 %v13557_v23 }
 0x4af   :  { %15497 = vmatprep.mubr.f32.mxu1 %v13242_v10 }
 0x4b0   :  { %15992 = vmatmul.mubr.msk.f32.gmra.mrb[108].mxu0 %vm4620_vm1, %v19695_v20  ;;  %v13262_v20 = vunpack.c.l.bf16 %v13556_v46 }
 0x4b1   :  { %15994 = vmatprep.mubr.msk.f32.mxu0 %vm4620_vm1, %v19708_v28  ;;  %v19801_v25 = vpop.f32.mrb[30].mxu1  ;;  %v13558_v28 = vld [vmem:[%s20607_s3 + $0x5f8] sm:$0xff]  }
 0x4b2   :  { %v19803_v14 = vpop.f32.mrb[31].mxu1  ;;  %15498 = vmatmul.mubr.f32.gmra.mrb[136].mxu1 %v13243_v63 }
 0x4b3   :  { %15500 = vmatprep.mubr.f32.mxu1 %v13246_v52 }
 0x4b4   :  { %15995 = vmatmul.mubr.msk.f32.gmra.mrb[110].mxu0 %vm4620_vm1, %v19706_v27  ;;  %v13266_v27 = vunpack.c.l.bf16 %v13557_v23 }
 0x4b5   :  { %15997 = vmatprep.mubr.msk.f32.mxu0 %vm4620_vm1, %v19719_v13  ;;  %v19812_v24 = vpop.f32.mrb[32].mxu1  ;;  %v19863_v13 = vld [vmem:[%s20608_s4 + $0x90] sm:$0xff] }
 0x4b6   :  { %v19814_v2 = vpop.f32.mrb[33].mxu1  ;;  %15501 = vmatmul.mubr.f32.gmra.mrb[138].mxu1 %v13247_v49 }
 0x4b7   :  { %15503 = vmatprep.mubr.f32.mxu1 %v13250_v36 }
 0x4b8   :  { %15998 = vmatmul.mubr.msk.f32.gmra.mrb[112].mxu0 %vm4620_vm1, %v19717_v43  ;;  %v13270_v43 = vunpack.c.l.bf16 %v13558_v28 }
 0x4b9   :  { %16000 = vmatprep.mubr.msk.f32.mxu0 %vm4620_vm1, %v19730_v33  ;;  %v19823_v39 = vpop.f32.mrb[34].mxu1  ;;  %v13274_v33 = vunpack.c.l.bf16 %v13559_v61 }
 0x4ba   :  { %v19825_v45 = vpop.f32.mrb[35].mxu1  ;;  %15504 = vmatmul.mubr.f32.gmra.mrb[140].mxu1 %v13251_v21  ;;  %v13567_v21 = vld [vmem:[%s20607_s3 + $0x640] sm:$0xff]  }
 0x4bb   :  { %15506 = vmatprep.mubr.f32.mxu1 %v13254_v48 }
 0x4bc   :  { %16001 = vmatmul.mubr.msk.f32.gmra.mrb[114].mxu0 %vm4620_vm1, %v19728_v59  ;;  %v13271_v59 = vunpack.c.h.bf16 %v13558_v28 }
 0x4bd   :  { %16003 = vmatprep.mubr.msk.f32.mxu0 %vm4620_vm1, %v19741_v7  ;;  %v19834_v34 = vpop.f32.mrb[36].mxu1  ;;  %v13278_v7 = vunpack.c.l.bf16 %v13560_v0 }
 0x4be   :  { %v19836_v8 = vpop.f32.mrb[37].mxu1  ;;  %15507 = vmatmul.mubr.f32.gmra.mrb[142].mxu1 %v13255_v18  ;;  %v13568_v18 = vld [vmem:[%s20607_s3 + $0x648] sm:$0xff]  }
 0x4bf   :  { %15509 = vmatprep.mubr.f32.mxu1 %v13258_v26 }
 0x4c0   :  { %16004 = vmatmul.mubr.msk.f32.gmra.mrb[116].mxu0 %vm4620_vm1, %v19739_v38  ;;  %v13275_v38 = vunpack.c.h.bf16 %v13559_v61 }
 0x4c1   :  { %16006 = vmatprep.mubr.msk.f32.mxu0 %vm4620_vm1, %v19752_v3  ;;  %v19845_v31 = vpop.f32.mrb[38].mxu1  ;;  %v13282_v3 = vunpack.c.l.bf16 %v13561_v35 }
 0x4c2   :  { %v19847_v15 = vpop.f32.mrb[39].mxu1  ;;  %15510 = vmatmul.mubr.f32.gmra.mrb[144].mxu1 %v13259_v17  ;;  %v13569_v17 = vld [vmem:[%s20607_s3 + $0x650] sm:$0xff]  }
 0x4c3   :  { %15512 = vmatprep.mubr.f32.mxu1 %v13262_v20 }
 0x4c4   :  { %16007 = vmatmul.mubr.msk.f32.gmra.mrb[118].mxu0 %vm4620_vm1, %v19750_v42  ;;  %v13279_v42 = vunpack.c.h.bf16 %v13560_v0 }
 0x4c5   :  { %16011 = vmatprep.mubr.msk.f32.mxu0 %vm4620_vm1, %v19763_v47  ;;  %v19856_v51 = vpop.f32.mrb[40].mxu1  ;;  %v13286_v47 = vunpack.c.l.bf16 %v13562_v6 }
 0x4c6   :  { %v19858_v11 = vpop.f32.mrb[41].mxu1  ;;  %15513 = vmatmul.mubr.f32.gmra.mrb[146].mxu1 %v13263_v62  ;;  %v13570_v62 = vld [vmem:[%s20607_s3 + $0x658] sm:$0xff]  }
 0x4c7   :  { %15515 = vmatprep.mubr.f32.mxu1 %v13266_v27  ;;  %v13319_v61 = vunpack.c.h.bf16 %v13570_v62 }
 0x4c8   :  { %16012 = vmatmul.mubr.msk.f32.vlgmr.msra.gmra.mrb[104].mxu0 %vm4620_vm1, %v19761_v40  ;;  %v13283_v40 = vunpack.c.h.bf16 %v13561_v35 }
 0x4c9   :  { %16014 = vmatprep.mubr.msk.f32.mxu0 %vm4620_vm1, %v19780_v9  ;;  %16036 = vmatpush3.msra.mxu0 %v19768_v50  ;;  %v19873_v1 = vpop.f32.mrb[42].mxu1  ;;  %v13564_v9 = vld [vmem:[%s20607_s3 + $0x628] sm:$0xff]  }
 0x4ca   :  { %v19875_v22 = vpop.f32.mrb[43].mxu1  ;;  %15516 = vmatmul.mubr.f32.gmra.mrb[148].mxu1 %v13267_v56  ;;  %16061 = vmatprep.subr.mxu0 %v19863_v13  ;;  %v13295_v57 = vunpack.c.h.bf16 %v13564_v9  ;;  %v13571_v56 = vld [vmem:[%s20607_s3 + $0x660] sm:$0xff]  }
 0x4cb   :  { %15518 = vmatprep.mubr.f32.mxu1 %v13270_v43  ;;  %v13323_v0 = vunpack.c.h.bf16 %v13571_v56 }
 0x4cc   :  { %16015 = vmatmul.mubr.msk.f32.gmra.mrb[106].mxu0 %vm4620_vm1, %v19778_v19  ;;  %v13290_v19 = vunpack.c.l.bf16 %v13563_v55 }
 0x4cd   :  { %16017 = vmatprep.mubr.msk.f32.mxu0 %vm4620_vm1, %v19792_v29  ;;  %v19885_v58 = vpop.f32.mrb[44].mxu1  ;;  %v13565_v29 = vld [vmem:[%s20607_s3 + $0x630] sm:$0xff]  }
 0x4ce   :  { %v19887_v54 = vpop.f32.mrb[45].mxu1  ;;  %15519 = vmatmul.mubr.f32.gmra.mrb[150].mxu1 %v13271_v59  ;;  %v13299_v5 = vunpack.c.h.bf16 %v13565_v29 }
 0x4cf   :  { %15521 = vmatprep.mubr.f32.mxu1 %v13274_v33 }
 0x4d0   :  { %16018 = vmatmul.mubr.msk.f32.gmra.mrb[108].mxu0 %vm4620_vm1, %v19790_v37  ;;  %v13294_v37 = vunpack.c.l.bf16 %v13564_v9 }
 0x4d1   :  { %16020 = vmatprep.mubr.msk.f32.mxu0 %vm4620_vm1, %v19803_v14  ;;  %v19896_v41 = vpop.f32.mrb[46].mxu1  ;;  %v13566_v14 = vld [vmem:[%s20607_s3 + $0x638] sm:$0xff]  }
 0x4d2   :  { %v19898_v4 = vpop.f32.mrb[47].mxu1  ;;  %15522 = vmatmul.mubr.f32.gmra.mrb[152].mxu1 %v13275_v38 }
 0x4d3   :  { %15524 = vmatprep.mubr.f32.mxu1 %v13278_v7 }
 0x4d4   :  { %16021 = vmatmul.mubr.msk.f32.gmra.mrb[110].mxu0 %vm4620_vm1, %v19801_v25  ;;  %v13298_v25 = vunpack.c.l.bf16 %v13565_v29 }
 0x4d5   :  { %16023 = vmatprep.mubr.msk.f32.mxu0 %vm4620_vm1, %v19814_v2  ;;  %v19907_v44 = vpop.f32.mrb[48].mxu1  ;;  %v19958_v2 = vld [vmem:[%s20608_s4 + $0x98] sm:$0xff] }
 0x4d6   :  { %v19909_v60 = vpop.f32.mrb[49].mxu1  ;;  %15525 = vmatmul.mubr.f32.gmra.mrb[154].mxu1 %v13279_v42 }
 0x4d7   :  { %15527 = vmatprep.mubr.f32.mxu1 %v13282_v3 }
 0x4d8   :  { %16024 = vmatmul.mubr.msk.f32.gmra.mrb[112].mxu0 %vm4620_vm1, %v19812_v24  ;;  %v13302_v24 = vunpack.c.l.bf16 %v13566_v14 }
 0x4d9   :  { %16026 = vmatprep.mubr.msk.f32.mxu0 %vm4620_vm1, %v19825_v45  ;;  %v19918_v30 = vpop.f32.mrb[50].mxu1  ;;  %v13306_v45 = vunpack.c.l.bf16 %v13567_v21 }
 0x4da   :  { %v19920_v50 = vpop.f32.mrb[51].mxu1  ;;  %15528 = vmatmul.mubr.f32.gmra.mrb[156].mxu1 %v13283_v40  ;;  %v13575_v40 = vld [vmem:[%s20607_s3 + $0x680] sm:$0xff]  }
 0x4db   :  { %15530 = vmatprep.mubr.f32.mxu1 %v13286_v47 }
 0x4dc   :  { %16027 = vmatmul.mubr.msk.f32.gmra.mrb[114].mxu0 %vm4620_vm1, %v19823_v39  ;;  %v13303_v39 = vunpack.c.h.bf16 %v13566_v14 }
 0x4dd   :  { %16029 = vmatprep.mubr.msk.f32.mxu0 %vm4620_vm1, %v19836_v8  ;;  %v19929_v16 = vpop.f32.mrb[52].mxu1  ;;  %v13310_v8 = vunpack.c.l.bf16 %v13568_v18 }
 0x4de   :  { %v19931_v10 = vpop.f32.mrb[53].mxu1  ;;  %15531 = vmatmul.mubr.f32.gmra.mrb[158].mxu1 %v13287_v12  ;;  %v13576_v12 = vld [vmem:[%s20607_s3 + $0x688] sm:$0xff]  }
 0x4df   :  { %15533 = vmatprep.mubr.f32.mxu1 %v13290_v19 }
 0x4e0   :  { %16030 = vmatmul.mubr.msk.f32.gmra.mrb[116].mxu0 %vm4620_vm1, %v19834_v34  ;;  %v13307_v34 = vunpack.c.h.bf16 %v13567_v21 }
 0x4e1   :  { %16032 = vmatprep.mubr.msk.f32.mxu0 %vm4620_vm1, %v19847_v15  ;;  %v19940_v63 = vpop.f32.mrb[54].mxu1  ;;  %v13314_v15 = vunpack.c.l.bf16 %v13569_v17 }
 0x4e2   :  { %v19942_v52 = vpop.f32.mrb[55].mxu1  ;;  %15534 = vmatmul.mubr.f32.gmra.mrb[160].mxu1 %v13291_v32  ;;  %v13577_v32 = vld [vmem:[%s20607_s3 + $0x690] sm:$0xff]  }
 0x4e3   :  { %15536 = vmatprep.mubr.f32.mxu1 %v13294_v37 }
 0x4e4   :  { %16033 = vmatmul.mubr.msk.f32.gmra.mrb[118].mxu0 %vm4620_vm1, %v19845_v31  ;;  %v13311_v31 = vunpack.c.h.bf16 %v13568_v18 }
 0x4e5   :  { %16037 = vmatprep.mubr.msk.f32.mxu0 %vm4620_vm1, %v19858_v11  ;;  %v19951_v49 = vpop.f32.mrb[56].mxu1  ;;  %v13318_v11 = vunpack.c.l.bf16 %v13570_v62 }
 0x4e6   :  { %v19953_v36 = vpop.f32.mrb[57].mxu1  ;;  %15537 = vmatmul.mubr.f32.gmra.mrb[162].mxu1 %v13295_v57  ;;  %v13578_v57 = vld [vmem:[%s20607_s3 + $0x698] sm:$0xff]  }
 0x4e7   :  { %15539 = vmatprep.mubr.f32.mxu1 %v13298_v25  ;;  %v13351_v21 = vunpack.c.h.bf16 %v13578_v57 }
 0x4e8   :  { %16038 = vmatmul.mubr.msk.f32.vlgmr.msra.gmra.mrb[104].mxu0 %vm4620_vm1, %v19856_v51  ;;  %v13315_v51 = vunpack.c.h.bf16 %v13569_v17 }
 0x4e9   :  { %16040 = vmatprep.mubr.msk.f32.mxu0 %vm4620_vm1, %v19875_v22  ;;  %16062 = vmatpush3.msra.mxu0 %v19863_v13  ;;  %v19968_v48 = vpop.f32.mrb[58].mxu1  ;;  %v13572_v22 = vld [vmem:[%s20607_s3 + $0x668] sm:$0xff]  }
 0x4ea   :  { %v19970_v53 = vpop.f32.mrb[59].mxu1  ;;  %15540 = vmatmul.mubr.f32.gmra.mrb[164].mxu1 %v13299_v5  ;;  %16087 = vmatprep.subr.mxu0 %v19958_v2  ;;  %v13327_v35 = vunpack.c.h.bf16 %v13572_v22  ;;  %v13579_v5 = vld [vmem:[%s20607_s3 + $0x6a0] sm:$0xff]  }
 0x4eb   :  { %15542 = vmatprep.mubr.f32.mxu1 %v13302_v24  ;;  %v13355_v18 = vunpack.c.h.bf16 %v13579_v5 }
 0x4ec   :  { %16041 = vmatmul.mubr.msk.f32.gmra.mrb[106].mxu0 %vm4620_vm1, %v19873_v1  ;;  %v13322_v1 = vunpack.c.l.bf16 %v13571_v56 }
 0x4ed   :  { %16043 = vmatprep.mubr.msk.f32.mxu0 %vm4620_vm1, %v19887_v54  ;;  %v19980_v26 = vpop.f32.mrb[60].mxu1  ;;  %v13573_v54 = vld [vmem:[%s20607_s3 + $0x670] sm:$0xff]  }
 0x4ee   :  { %v19982_v46 = vpop.f32.mrb[61].mxu1  ;;  %15543 = vmatmul.mubr.f32.gmra.mrb[166].mxu1 %v13303_v39  ;;  %v13331_v6 = vunpack.c.h.bf16 %v13573_v54 }
 0x4ef   :  { %15545 = vmatprep.mubr.f32.mxu1 %v13306_v45 }
 0x4f0   :  { %16044 = vmatmul.mubr.msk.f32.gmra.mrb[108].mxu0 %vm4620_vm1, %v19885_v58  ;;  %v13326_v58 = vunpack.c.l.bf16 %v13572_v22 }
 0x4f1   :  { %16046 = vmatprep.mubr.msk.f32.mxu0 %vm4620_vm1, %v19898_v4  ;;  %v19991_v20 = vpop.f32.mrb[62].mxu1  ;;  %v13574_v4 = vld [vmem:[%s20607_s3 + $0x678] sm:$0xff]  }
 0x4f2   :  { %v19993_v23 = vpop.f32.mrb[63].mxu1  ;;  %15546 = vmatmul.mubr.f32.gmra.mrb[168].mxu1 %v13307_v34 }
 0x4f3   :  { %15548 = vmatprep.mubr.f32.mxu1 %v13310_v8 }
 0x4f4   :  { %16047 = vmatmul.mubr.msk.f32.gmra.mrb[110].mxu0 %vm4620_vm1, %v19896_v41  ;;  %v13330_v41 = vunpack.c.l.bf16 %v13573_v54 }
 0x4f5   :  { %16049 = vmatprep.mubr.msk.f32.mxu0 %vm4620_vm1, %v19909_v60  ;;  %v20002_v27 = vpop.f32.mrb[64].mxu1  ;;  %v20053_v60 = vld [vmem:[%s20608_s4 + $0xa0] sm:$0xff] }
 0x4f6   :  { %v20004_v28 = vpop.f32.mrb[65].mxu1  ;;  %15549 = vmatmul.mubr.f32.gmra.mrb[170].mxu1 %v13311_v31 }
 0x4f7   :  { %15551 = vmatprep.mubr.f32.mxu1 %v13314_v15 }
 0x4f8   :  { %16050 = vmatmul.mubr.msk.f32.gmra.mrb[112].mxu0 %vm4620_vm1, %v19907_v44  ;;  %v13334_v44 = vunpack.c.l.bf16 %v13574_v4 }
 0x4f9   :  { %16052 = vmatprep.mubr.msk.f32.mxu0 %vm4620_vm1, %v19920_v50  ;;  %v20013_v43 = vpop.f32.mrb[66].mxu1  ;;  %v13338_v50 = vunpack.c.l.bf16 %v13575_v40 }
 0x4fa   :  { %v20015_v13 = vpop.f32.mrb[67].mxu1  ;;  %15552 = vmatmul.mubr.f32.gmra.mrb[172].mxu1 %v13315_v51 }
 0x4fb   :  { %15554 = vmatprep.mubr.f32.mxu1 %v13318_v11 }
 0x4fc   :  { %16053 = vmatmul.mubr.msk.f32.gmra.mrb[114].mxu0 %vm4620_vm1, %v19918_v30  ;;  %v13335_v30 = vunpack.c.h.bf16 %v13574_v4  ;;  %v12382_v4 = vld [vmem:[%s20608_s4 + $0xb0] sm:$0xff] }
 0x4fd   :  { %16055 = vmatprep.mubr.msk.f32.mxu0 %vm4620_vm1, %v19931_v10  ;;  %v20024_v59 = vpop.f32.mrb[68].mxu1  ;;  %v13342_v10 = vunpack.c.l.bf16 %v13576_v12 }
 0x4fe   :  { %v20026_v33 = vpop.f32.mrb[69].mxu1  ;;  %15555 = vmatmul.mubr.f32.gmra.mrb[174].mxu1 %v13319_v61 }
 0x4ff   :  { %15557 = vmatprep.mubr.f32.mxu1 %v13322_v1 }
 0x500   :  { %16056 = vmatmul.mubr.msk.f32.gmra.mrb[116].mxu0 %vm4620_vm1, %v19929_v16  ;;  %v13339_v16 = vunpack.c.h.bf16 %v13575_v40 }
 0x501   :  { %16058 = vmatprep.mubr.msk.f32.mxu0 %vm4620_vm1, %v19942_v52  ;;  %v20035_v38 = vpop.f32.mrb[70].mxu1  ;;  %v13346_v52 = vunpack.c.l.bf16 %v13577_v32 }
 0x502   :  { %v20037_v7 = vpop.f32.mrb[71].mxu1  ;;  %15558 = vmatmul.mubr.f32.gmra.mrb[176].mxu1 %v13323_v0 }
 0x503   :  { %15560 = vmatprep.mubr.f32.mxu1 %v13326_v58 }
 0x504   :  { %16059 = vmatmul.mubr.msk.f32.gmra.mrb[118].mxu0 %vm4620_vm1, %v19940_v63  ;;  %v13343_v63 = vunpack.c.h.bf16 %v13576_v12 }
 0x505   :  { %16063 = vmatprep.mubr.msk.f32.mxu0 %vm4620_vm1, %v19953_v36  ;;  %v20046_v42 = vpop.f32.mrb[72].mxu1  ;;  %v13350_v36 = vunpack.c.l.bf16 %v13578_v57 }
 0x506   :  { %v20048_v3 = vpop.f32.mrb[73].mxu1  ;;  %15561 = vmatmul.mubr.f32.gmra.mrb[178].mxu1 %v13327_v35 }
 0x507   :  { %15563 = vmatprep.mubr.f32.mxu1 %v13330_v41 }
 0x508   :  { %16064 = vmatmul.mubr.msk.f32.vlgmr.msra.gmra.mrb[104].mxu0 %vm4620_vm1, %v19951_v49  ;;  %v13347_v49 = vunpack.c.h.bf16 %v13577_v32 }
 0x509   :  { %16066 = vmatprep.mubr.msk.f32.mxu0 %vm4620_vm1, %v19970_v53  ;;  %16088 = vmatpush3.msra.mxu0 %v19958_v2  ;;  %v20063_v47 = vpop.f32.mrb[74].mxu1  ;;  %v13580_v53 = vld [vmem:[%s20607_s3 + $0x6a8] sm:$0xff]  }
 0x50a   :  { %v20065_v55 = vpop.f32.mrb[75].mxu1  ;;  %15564 = vmatmul.mubr.f32.gmra.mrb[180].mxu1 %v13331_v6  ;;  %16113 = vmatprep.subr.mxu0 %v20053_v60  ;;  %v13359_v17 = vunpack.c.h.bf16 %v13580_v53 }
 0x50b   :  { %15566 = vmatprep.mubr.f32.mxu1 %v13334_v44 }
 0x50c   :  { %16067 = vmatmul.mubr.msk.f32.gmra.mrb[106].mxu0 %vm4620_vm1, %v19968_v48  ;;  %v13354_v48 = vunpack.c.l.bf16 %v13579_v5 }
 0x50d   :  { %16069 = vmatprep.mubr.msk.f32.mxu0 %vm4620_vm1, %v19982_v46  ;;  %v20075_v19 = vpop.f32.mrb[76].mxu1  ;;  %v13581_v46 = vld [vmem:[%s20607_s3 + $0x6b0] sm:$0xff]  }
 0x50e   :  { %v20077_v9 = vpop.f32.mrb[77].mxu1  ;;  %15567 = vmatmul.mubr.f32.gmra.mrb[182].mxu1 %v13335_v30  ;;  %v13363_v62 = vunpack.c.h.bf16 %v13581_v46 }
 0x50f   :  { %15569 = vmatprep.mubr.f32.mxu1 %v13338_v50 }
 0x510   :  { %16070 = vmatmul.mubr.msk.f32.gmra.mrb[108].mxu0 %vm4620_vm1, %v19980_v26  ;;  %v13358_v26 = vunpack.c.l.bf16 %v13580_v53 }
 0x511   :  { %16072 = vmatprep.mubr.msk.f32.mxu0 %vm4620_vm1, %v19993_v23  ;;  %v20086_v37 = vpop.f32.mrb[78].mxu1  ;;  %v13582_v23 = vld [vmem:[%s20607_s3 + $0x6b8] sm:$0xff]  }
 0x512   :  { %v20088_v29 = vpop.f32.mrb[79].mxu1  ;;  %15570 = vmatmul.mubr.f32.gmra.mrb[184].mxu1 %v13339_v16  ;;  %v13367_v56 = vunpack.c.h.bf16 %v13582_v23 }
 0x513   :  { %15572 = vmatprep.mubr.f32.mxu1 %v13342_v10 }
 0x514   :  { %16073 = vmatmul.mubr.msk.f32.gmra.mrb[110].mxu0 %vm4620_vm1, %v19991_v20  ;;  %v13362_v20 = vunpack.c.l.bf16 %v13581_v46 }
 0x515   :  { %16075 = vmatprep.mubr.msk.f32.mxu0 %vm4620_vm1, %v20004_v28  ;;  %v20097_v25 = vpop.f32.mrb[80].mxu1  ;;  %v12365_v28 = vld [vmem:[%s20608_s4 + $0xa8] sm:$0xff] }
 0x516   :  { %v4018_v14 = vpop.f32.mrb[81].mxu1  ;;  %15573 = vmatmul.mubr.f32.gmra.mrb[186].mxu1 %v13343_v63 }
 0x517   :  { %15575 = vmatprep.mubr.f32.mxu1 %v13346_v52 }
 0x518   :  { %16076 = vmatmul.mubr.msk.f32.gmra.mrb[112].mxu0 %vm4620_vm1, %v20002_v27  ;;  %v13366_v27 = vunpack.c.l.bf16 %v13582_v23 }
 0x519   :  { %16078 = vmatprep.mubr.msk.f32.mxu0 %vm4620_vm1, %v20015_v13  ;;  %v15418_v24 = vpop.f32.mrb[82].mxu1 }
 0x51a   :  { %v4028_v2 = vpop.f32.mrb[83].mxu1  ;;  %15576 = vmatmul.mubr.f32.gmra.mrb[188].mxu1 %v13347_v49 }
 0x51b   :  { %15578 = vmatprep.mubr.f32.mxu1 %v13350_v36 }
 0x51c   :  { %16079 = vmatmul.mubr.msk.f32.gmra.mrb[114].mxu0 %vm4620_vm1, %v20013_v43 }
 0x51d   :  { %16081 = vmatprep.mubr.msk.f32.mxu0 %vm4620_vm1, %v20026_v33  ;;  %v15421_v39 = vpop.f32.mrb[84].mxu1 }
 0x51e   :  { %v4038_v45 = vpop.f32.mrb[85].mxu1  ;;  %15579 = vmatmul.mubr.f32.gmra.mrb[190].mxu1 %v13351_v21 }
 0x51f   :  { %15581 = vmatprep.mubr.f32.mxu1 %v13354_v48 }
 0x520   :  { %16082 = vmatmul.mubr.msk.f32.gmra.mrb[116].mxu0 %vm4620_vm1, %v20024_v59 }
 0x521   :  { %16084 = vmatprep.mubr.msk.f32.mxu0 %vm4620_vm1, %v20037_v7  ;;  %v15424_v34 = vpop.f32.mrb[86].mxu1 }
 0x522   :  { %v4048_v8 = vpop.f32.mrb[87].mxu1  ;;  %15582 = vmatmul.mubr.f32.gmra.mrb[192].mxu1 %v13355_v18  ;;  %v12416_v18 = vld [vmem:[%s20608_s4 + $0xc0] sm:$0xff] }
 0x523   :  { %15584 = vmatprep.mubr.f32.mxu1 %v13358_v26 }
 0x524   :  { %16085 = vmatmul.mubr.msk.f32.gmra.mrb[118].mxu0 %vm4620_vm1, %v20035_v38 }
 0x525   :  { %16089 = vmatprep.mubr.msk.f32.mxu0 %vm4620_vm1, %v20048_v3  ;;  %v15427_v31 = vpop.f32.mrb[88].mxu1 }
 0x526   :  { %v4058_v15 = vpop.f32.mrb[89].mxu1  ;;  %15585 = vmatmul.mubr.f32.gmra.mrb[194].mxu1 %v13359_v17 }
 0x527   :  { %15587 = vmatprep.mubr.f32.mxu1 %v13362_v20 }
 0x528   :  { %16090 = vmatmul.mubr.msk.f32.vlgmr.msra.gmra.mrb[104].mxu0 %vm4620_vm1, %v20046_v42 }
 0x529   :  { %16092 = vmatprep.mubr.msk.f32.mxu0 %vm4620_vm1, %v20065_v55  ;;  %16114 = vmatpush3.msra.mxu0 %v20053_v60  ;;  %v15430_v51 = vpop.f32.mrb[90].mxu1 }
 0x52a   :  { %v4068_v11 = vpop.f32.mrb[91].mxu1  ;;  %15588 = vmatmul.mubr.f32.gmra.mrb[196].mxu1 %v13363_v62  ;;  %16139 = vmatprep.subr.mxu0 %v12365_v28 }
 0x52b   :  { %15590 = vmatprep.mubr.f32.mxu1 %v13366_v27 }
 0x52c   :  { %16093 = vmatmul.mubr.msk.f32.gmra.mrb[106].mxu0 %vm4620_vm1, %v20063_v47 }
 0x52d   :  { %16095 = vmatprep.mubr.msk.f32.mxu0 %vm4620_vm1, %v20077_v9  ;;  %v15433_v43 = vpop.f32.mrb[92].mxu1 }
 0x52e   :  { %v4078_v13 = vpop.f32.mrb[93].mxu1  ;;  %15591 = vmatmul.mubr.f32.gmra.mrb[198].mxu1 %v13367_v56 }
 0x530   :  { %16096 = vmatmul.mubr.msk.f32.gmra.mrb[108].mxu0 %vm4620_vm1, %v20075_v19 }
 0x531   :  { %16098 = vmatprep.mubr.msk.f32.mxu0 %vm4620_vm1, %v20088_v29  ;;  %v15436_v61 = vpop.f32.mrb[94].mxu1 }
 0x532   :  { %v4088_v1 = vpop.f32.mrb[95].mxu1 }
 0x534   :  { %16099 = vmatmul.mubr.msk.f32.gmra.mrb[110].mxu0 %vm4620_vm1, %v20086_v37  ;;  %v12399_v37 = vld [vmem:[%s20608_s4 + $0xb8] sm:$0xff] }
 0x535   :  { %16101 = vmatprep.mubr.msk.f32.mxu0 %vm4620_vm1, %v4018_v14  ;;  %v15439_v22 = vpop.f32.mrb[96].mxu1 }
 0x536   :  { %v4098_v59 = vpop.f32.mrb[97].mxu1 }
 0x538   :  { %16102 = vmatmul.mubr.msk.f32.gmra.mrb[112].mxu0 %vm4620_vm1, %v20097_v25 }
 0x539   :  { %16104 = vmatprep.mubr.msk.f32.mxu0 %vm4620_vm1, %v4028_v2  ;;  %v15442_v33 = vpop.f32.mrb[98].mxu1 }
 0x53a   :  { %v4108_v0 = vpop.f32.mrb[99].mxu1 }
 0x53c   :  { %16105 = vmatmul.mubr.msk.f32.gmra.mrb[114].mxu0 %vm4620_vm1, %v15418_v24 }
 0x53d   :  { %16107 = vmatprep.mubr.msk.f32.mxu0 %vm4620_vm1, %v4038_v45  ;;  %v15445_v58 = vpop.f32.mrb[100].mxu1 }
 0x53e   :  { %v4118_v54 = vpop.f32.mrb[101].mxu1 }
 0x540   :  { %16108 = vmatmul.mubr.msk.f32.gmra.mrb[116].mxu0 %vm4620_vm1, %v15421_v39 }
 0x541   :  { %16110 = vmatprep.mubr.msk.f32.mxu0 %vm4620_vm1, %v4048_v8  ;;  %v15448_v38 = vpop.f32.mrb[102].mxu1 }
 0x542   :  { %v4128_v7 = vpop.f32.mrb[103].mxu1 }
 0x544   :  { %16111 = vmatmul.mubr.msk.f32.gmra.mrb[118].mxu0 %vm4620_vm1, %v15424_v34 }
 0x545   :  { %16115 = vmatprep.mubr.msk.f32.mxu0 %vm4620_vm1, %v4058_v15  ;;  %v15451_v35 = vpop.f32.mrb[104].mxu1 }
 0x546   :  { %v4138_v41 = vpop.f32.mrb[105].mxu1 }
 0x548   :  { %16116 = vmatmul.mubr.msk.f32.vlgmr.msra.gmra.mrb[104].mxu0 %vm4620_vm1, %v15427_v31 }
 0x549   :  { %16118 = vmatprep.mubr.msk.f32.mxu0 %vm4620_vm1, %v4068_v11  ;;  %16140 = vmatpush3.msra.mxu0 %v12365_v28  ;;  %v15454_v42 = vpop.f32.mrb[106].mxu1 }
 0x54a   :  { %v4148_v3 = vpop.f32.mrb[107].mxu1  ;;  %16165 = vmatprep.subr.mxu0 %v12382_v4 }
 0x54c   :  { %16119 = vmatmul.mubr.msk.f32.gmra.mrb[106].mxu0 %vm4620_vm1, %v15430_v51 }
 0x54d   :  { %16121 = vmatprep.mubr.msk.f32.mxu0 %vm4620_vm1, %v4078_v13  ;;  %v15457_v6 = vpop.f32.mrb[108].mxu1  ;;  %v12433_v13 = vld [vmem:[%s20608_s4 + $0xc8] sm:$0xff] }
 0x54e   :  { %v4158_v44 = vpop.f32.mrb[109].mxu1 }
 0x550   :  { %16122 = vmatmul.mubr.msk.f32.gmra.mrb[108].mxu0 %vm4620_vm1, %v15433_v43 }
 0x551   :  { %16124 = vmatprep.mubr.msk.f32.mxu0 %vm4620_vm1, %v4088_v1  ;;  %v15460_v60 = vpop.f32.mrb[110].mxu1 }
 0x552   :  { %v4168_v40 = vpop.f32.mrb[111].mxu1 }
 0x554   :  { %16125 = vmatmul.mubr.msk.f32.gmra.mrb[110].mxu0 %vm4620_vm1, %v15436_v61 }
 0x555   :  { %16127 = vmatprep.mubr.msk.f32.mxu0 %vm4620_vm1, %v4098_v59  ;;  %v15463_v47 = vpop.f32.mrb[112].mxu1 }
 0x556   :  { %v4178_v55 = vpop.f32.mrb[113].mxu1 }
 0x558   :  { %16128 = vmatmul.mubr.msk.f32.gmra.mrb[112].mxu0 %vm4620_vm1, %v15439_v22 }
 0x559   :  { %16130 = vmatprep.mubr.msk.f32.mxu0 %vm4620_vm1, %v4108_v0  ;;  %v15466_v30 = vpop.f32.mrb[114].mxu1 }
 0x55a   :  { %v4188_v50 = vpop.f32.mrb[115].mxu1 }
 0x55c   :  { %16131 = vmatmul.mubr.msk.f32.gmra.mrb[114].mxu0 %vm4620_vm1, %v15442_v33 }
 0x55d   :  { %16133 = vmatprep.mubr.msk.f32.mxu0 %vm4620_vm1, %v4118_v54  ;;  %v15469_v12 = vpop.f32.mrb[116].mxu1 }
 0x55e   :  { %v4198_v19 = vpop.f32.mrb[117].mxu1 }
 0x560   :  { %16134 = vmatmul.mubr.msk.f32.gmra.mrb[116].mxu0 %vm4620_vm1, %v15445_v58 }
 0x561   :  { %16136 = vmatprep.mubr.msk.f32.mxu0 %vm4620_vm1, %v4128_v7  ;;  %v15472_v9 = vpop.f32.mrb[118].mxu1 }
 0x562   :  { %v4208_v16 = vpop.f32.mrb[119].mxu1 }
 0x564   :  { %16137 = vmatmul.mubr.msk.f32.gmra.mrb[118].mxu0 %vm4620_vm1, %v15448_v38 }
 0x565   :  { %16141 = vmatprep.mubr.msk.f32.mxu0 %vm4620_vm1, %v4138_v41  ;;  %v15475_v10 = vpop.f32.mrb[120].mxu1 }
 0x566   :  { %v4218_v32 = vpop.f32.mrb[121].mxu1 }
 0x568   :  { %16142 = vmatmul.mubr.msk.f32.vlgmr.msra.gmra.mrb[104].mxu0 %vm4620_vm1, %v15451_v35 }
 0x569   :  { %16144 = vmatprep.mubr.msk.f32.mxu0 %vm4620_vm1, %v4148_v3  ;;  %16166 = vmatpush3.msra.mxu0 %v12382_v4  ;;  %v15478_v29 = vpop.f32.mrb[122].mxu1 }
 0x56a   :  { %v4228_v63 = vpop.f32.mrb[123].mxu1  ;;  %16191 = vmatprep.subr.mxu0 %v12399_v37 }
 0x56c   :  { %16145 = vmatmul.mubr.msk.f32.gmra.mrb[106].mxu0 %vm4620_vm1, %v15454_v42 }
 0x56d   :  { %16147 = vmatprep.mubr.msk.f32.mxu0 %vm4620_vm1, %v4158_v44  ;;  %v15481_v52 = vpop.f32.mrb[124].mxu1  ;;  %v12450_v44 = vld [vmem:[%s20608_s4 + $0xd0] sm:$0xff] }
 0x56e   :  { %v4238_v57 = vpop.f32.mrb[125].mxu1 }
 0x570   :  { %16148 = vmatmul.mubr.msk.f32.gmra.mrb[108].mxu0 %vm4620_vm1, %v15457_v6 }
 0x571   :  { %16150 = vmatprep.mubr.msk.f32.mxu0 %vm4620_vm1, %v4168_v40  ;;  %v15484_v25 = vpop.f32.mrb[126].mxu1 }
 0x572   :  { %v4248_v14 = vpop.f32.mrb[127].mxu1 }
 0x574   :  { %16151 = vmatmul.mubr.msk.f32.gmra.mrb[110].mxu0 %vm4620_vm1, %v15460_v60 }
 0x575   :  { %16153 = vmatprep.mubr.msk.f32.mxu0 %vm4620_vm1, %v4178_v55  ;;  %v15487_v49 = vpop.f32.mrb[128].mxu1 }
 0x576   :  { %v4258_v36 = vpop.f32.mrb[129].mxu1 }
 0x578   :  { %16154 = vmatmul.mubr.msk.f32.gmra.mrb[112].mxu0 %vm4620_vm1, %v15463_v47 }
 0x579   :  { %16156 = vmatprep.mubr.msk.f32.mxu0 %vm4620_vm1, %v4188_v50  ;;  %v15490_v5 = vpop.f32.mrb[130].mxu1 }
 0x57a   :  { %v4268_v24 = vpop.f32.mrb[131].mxu1 }
 0x57c   :  { %16157 = vmatmul.mubr.msk.f32.gmra.mrb[114].mxu0 %vm4620_vm1, %v15466_v30 }
 0x57d   :  { %16159 = vmatprep.mubr.msk.f32.mxu0 %vm4620_vm1, %v4198_v19  ;;  %v15493_v2 = vpop.f32.mrb[132].mxu1 }
 0x57e   :  { %v4278_v21 = vpop.f32.mrb[133].mxu1 }
 0x580   :  { %16160 = vmatmul.mubr.msk.f32.gmra.mrb[116].mxu0 %vm4620_vm1, %v15469_v12 }
 0x581   :  { %16162 = vmatprep.mubr.msk.f32.mxu0 %vm4620_vm1, %v4208_v16  ;;  %v15496_v48 = vpop.f32.mrb[134].mxu1 }
 0x582   :  { %v4288_v53 = vpop.f32.mrb[135].mxu1 }
 0x584   :  { %16163 = vmatmul.mubr.msk.f32.gmra.mrb[118].mxu0 %vm4620_vm1, %v15472_v9 }
 0x585   :  { %16167 = vmatprep.mubr.msk.f32.mxu0 %vm4620_vm1, %v4218_v32  ;;  %v15499_v39 = vpop.f32.mrb[136].mxu1 }
 0x586   :  { %v4298_v45 = vpop.f32.mrb[137].mxu1 }
 0x588   :  { %16168 = vmatmul.mubr.msk.f32.vlgmr.msra.gmra.mrb[104].mxu0 %vm4620_vm1, %v15475_v10 }
 0x589   :  { %16170 = vmatprep.mubr.msk.f32.mxu0 %vm4620_vm1, %v4228_v63  ;;  %16192 = vmatpush3.msra.mxu0 %v12399_v37  ;;  %v15502_v26 = vpop.f32.mrb[138].mxu1 }
 0x58a   :  { %v4308_v46 = vpop.f32.mrb[139].mxu1  ;;  %16217 = vmatprep.subr.mxu0 %v12416_v18 }
 0x58c   :  { %16171 = vmatmul.mubr.msk.f32.gmra.mrb[106].mxu0 %vm4620_vm1, %v15478_v29 }
 0x58d   :  { %16173 = vmatprep.mubr.msk.f32.mxu0 %vm4620_vm1, %v4238_v57  ;;  %v15505_v34 = vpop.f32.mrb[140].mxu1 }
 0x58e   :  { %v4318_v8 = vpop.f32.mrb[141].mxu1 }
 0x590   :  { %16174 = vmatmul.mubr.msk.f32.gmra.mrb[108].mxu0 %vm4620_vm1, %v15481_v52 }
 0x591   :  { %16176 = vmatprep.mubr.msk.f32.mxu0 %vm4620_vm1, %v4248_v14  ;;  %v15508_v17 = vpop.f32.mrb[142].mxu1 }
 0x592   :  { %v4328_v20 = vpop.f32.mrb[143].mxu1 }
 0x594   :  { %16177 = vmatmul.mubr.msk.f32.gmra.mrb[110].mxu0 %vm4620_vm1, %v15484_v25 }
 0x595   :  { %16179 = vmatprep.mubr.msk.f32.mxu0 %vm4620_vm1, %v4258_v36  ;;  %v15511_v23 = vpop.f32.mrb[144].mxu1 }
 0x596   :  { %v4338_v31 = vpop.f32.mrb[145].mxu1 }
 0x598   :  { %16180 = vmatmul.mubr.msk.f32.gmra.mrb[112].mxu0 %vm4620_vm1, %v15487_v49 }
 0x599   :  { %16182 = vmatprep.mubr.msk.f32.mxu0 %vm4620_vm1, %v4268_v24  ;;  %v15514_v15 = vpop.f32.mrb[146].mxu1 }
 0x59a   :  { %v4348_v62 = vpop.f32.mrb[147].mxu1 }
 0x59c   :  { %16183 = vmatmul.mubr.msk.f32.gmra.mrb[114].mxu0 %vm4620_vm1, %v15490_v5 }
 0x59d   :  { %16185 = vmatprep.mubr.msk.f32.mxu0 %vm4620_vm1, %v4278_v21  ;;  %v15517_v27 = vpop.f32.mrb[148].mxu1 }
 0x59e   :  { %v4358_v28 = vpop.f32.mrb[149].mxu1 }
 0x5a0   :  { %16186 = vmatmul.mubr.msk.f32.gmra.mrb[116].mxu0 %vm4620_vm1, %v15493_v2 }
 0x5a1   :  { %16188 = vmatprep.mubr.msk.f32.mxu0 %vm4620_vm1, %v4288_v53  ;;  %v15520_v51 = vpop.f32.mrb[150].mxu1 }
 0x5a2   :  { %v4368_v11 = vpop.f32.mrb[151].mxu1 }
 0x5a4   :  { %16189 = vmatmul.mubr.msk.f32.gmra.mrb[118].mxu0 %vm4620_vm1, %v15496_v48 }
 0x5a5   :  { %16193 = vmatprep.mubr.msk.f32.mxu0 %vm4620_vm1, %v4298_v45  ;;  %v15523_v56 = vpop.f32.mrb[152].mxu1 }
 0x5a6   :  { %v4378_v43 = vpop.f32.mrb[153].mxu1 }
 0x5a8   :  { %16194 = vmatmul.mubr.msk.f32.vlgmr.msra.gmra.mrb[104].mxu0 %vm4620_vm1, %v15499_v39 }
 0x5a9   :  { %16196 = vmatprep.mubr.msk.f32.mxu0 %vm4620_vm1, %v4308_v46  ;;  %16218 = vmatpush3.msra.mxu0 %v12416_v18  ;;  %v15526_v61 = vpop.f32.mrb[154].mxu1  ;;  %v17059_v46 = vmov 0.0  }
 0x5aa   :  { %v4388_v1 = vpop.f32.mrb[155].mxu1  ;;  %16243 = vmatprep.subr.mxu0 %v12433_v13  ;;  %16299 = vmatprep.mubr.msk.f32.mxu1 %vm17058_vm2, %v17059_v46 }
 0x5ac   :  { %16197 = vmatmul.mubr.msk.f32.gmra.mrb[106].mxu0 %vm4620_vm1, %v15502_v26  ;;  %v17057_v26 = vmov 0.0|0.0  }
 0x5ad   :  { %16199 = vmatprep.mubr.msk.f32.mxu0 %vm4620_vm1, %v4318_v8  ;;  %v15529_v22 = vpop.f32.mrb[156].mxu1  ;;  %16536 = vmatprep.subr.bf16.mxu1 %v17057_v26  ;;  %v12467_v8 = vld [vmem:[%s20609_s5] ss:$0 sm:$0xff] }
 0x5ae   :  { %v4398_v59 = vpop.f32.mrb[157].mxu1 }
 0x5b0   :  { %16200 = vmatmul.mubr.msk.f32.gmra.mrb[108].mxu0 %vm4620_vm1, %v15505_v34 }
 0x5b1   :  { %16202 = vmatprep.mubr.msk.f32.mxu0 %vm4620_vm1, %v4328_v20  ;;  %v15532_v33 = vpop.f32.mrb[158].mxu1 }
 0x5b2   :  { %v4408_v0 = vpop.f32.mrb[159].mxu1 }
 0x5b4   :  { %16203 = vmatmul.mubr.msk.f32.gmra.mrb[110].mxu0 %vm4620_vm1, %v15508_v17 }
 0x5b5   :  { %16205 = vmatprep.mubr.msk.f32.mxu0 %vm4620_vm1, %v4338_v31  ;;  %v15535_v58 = vpop.f32.mrb[160].mxu1 }
 0x5b6   :  { %v4418_v54 = vpop.f32.mrb[161].mxu1 }
 0x5b8   :  { %16206 = vmatmul.mubr.msk.f32.gmra.mrb[112].mxu0 %vm4620_vm1, %v15511_v23 }
 0x5b9   :  { %16208 = vmatprep.mubr.msk.f32.mxu0 %vm4620_vm1, %v4348_v62  ;;  %v15538_v38 = vpop.f32.mrb[162].mxu1 }
 0x5ba   :  { %v4428_v7 = vpop.f32.mrb[163].mxu1 }
 0x5bc   :  { %16209 = vmatmul.mubr.msk.f32.gmra.mrb[114].mxu0 %vm4620_vm1, %v15514_v15 }
 0x5bd   :  { %16211 = vmatprep.mubr.msk.f32.mxu0 %vm4620_vm1, %v4358_v28  ;;  %v15541_v35 = vpop.f32.mrb[164].mxu1 }
 0x5be   :  { %v4438_v41 = vpop.f32.mrb[165].mxu1 }
 0x5c0   :  { %16212 = vmatmul.mubr.msk.f32.gmra.mrb[116].mxu0 %vm4620_vm1, %v15517_v27 }
 0x5c1   :  { %16214 = vmatprep.mubr.msk.f32.mxu0 %vm4620_vm1, %v4368_v11  ;;  %v15544_v4 = vpop.f32.mrb[166].mxu1 }
 0x5c2   :  { %v4448_v42 = vpop.f32.mrb[167].mxu1 }
 0x5c4   :  { %16215 = vmatmul.mubr.msk.f32.gmra.mrb[118].mxu0 %vm4620_vm1, %v15520_v51 }
 0x5c5   :  { %16219 = vmatprep.mubr.msk.f32.mxu0 %vm4620_vm1, %v4378_v43  ;;  %v15547_v3 = vpop.f32.mrb[168].mxu1 }
 0x5c6   :  { %v4458_v6 = vpop.f32.mrb[169].mxu1 }
 0x5c8   :  { %16220 = vmatmul.mubr.msk.f32.vlgmr.msra.gmra.mrb[104].mxu0 %vm4620_vm1, %v15523_v56 }
 0x5c9   :  { %16222 = vmatprep.mubr.msk.f32.mxu0 %vm4620_vm1, %v4388_v1  ;;  %16244 = vmatpush3.msra.mxu0 %v12433_v13  ;;  %v15550_v60 = vpop.f32.mrb[170].mxu1 }
 0x5ca   :  { %v4468_v40 = vpop.f32.mrb[171].mxu1  ;;  %16269 = vmatprep.subr.mxu0 %v12450_v44 }
 0x5cc   :  { %16223 = vmatmul.mubr.msk.f32.gmra.mrb[106].mxu0 %vm4620_vm1, %v15526_v61 }
 0x5cd   :  { %16225 = vmatprep.mubr.msk.f32.mxu0 %vm4620_vm1, %v4398_v59  ;;  %v15553_v47 = vpop.f32.mrb[172].mxu1 }
 0x5ce   :  { %v4478_v55 = vpop.f32.mrb[173].mxu1 }
 0x5d0   :  { %16226 = vmatmul.mubr.msk.f32.gmra.mrb[108].mxu0 %vm4620_vm1, %v15529_v22 }
 0x5d1   :  { %16228 = vmatprep.mubr.msk.f32.mxu0 %vm4620_vm1, %v4408_v0  ;;  %v15556_v30 = vpop.f32.mrb[174].mxu1 }
 0x5d2   :  { %v4488_v50 = vpop.f32.mrb[175].mxu1 }
 0x5d4   :  { %16229 = vmatmul.mubr.msk.f32.gmra.mrb[110].mxu0 %vm4620_vm1, %v15532_v33 }
 0x5d5   :  { %16231 = vmatprep.mubr.msk.f32.mxu0 %vm4620_vm1, %v4418_v54  ;;  %v15559_v12 = vpop.f32.mrb[176].mxu1 }
 0x5d6   :  { %v4498_v19 = vpop.f32.mrb[177].mxu1 }
 0x5d8   :  { %16232 = vmatmul.mubr.msk.f32.gmra.mrb[112].mxu0 %vm4620_vm1, %v15535_v58 }
 0x5d9   :  { %16234 = vmatprep.mubr.msk.f32.mxu0 %vm4620_vm1, %v4428_v7  ;;  %v15562_v9 = vpop.f32.mrb[178].mxu1 }
 0x5da   :  { %v4508_v16 = vpop.f32.mrb[179].mxu1 }
 0x5dc   :  { %16235 = vmatmul.mubr.msk.f32.gmra.mrb[114].mxu0 %vm4620_vm1, %v15538_v38 }
 0x5dd   :  { %16237 = vmatprep.mubr.msk.f32.mxu0 %vm4620_vm1, %v4438_v41  ;;  %v15565_v10 = vpop.f32.mrb[180].mxu1 }
 0x5de   :  { %v4518_v32 = vpop.f32.mrb[181].mxu1 }
 0x5e0   :  { %16238 = vmatmul.mubr.msk.f32.gmra.mrb[116].mxu0 %vm4620_vm1, %v15541_v35 }
 0x5e1   :  { %16240 = vmatprep.mubr.msk.f32.mxu0 %vm4620_vm1, %v4448_v42  ;;  %v15568_v37 = vpop.f32.mrb[182].mxu1 }
 0x5e2   :  { %v4528_v29 = vpop.f32.mrb[183].mxu1 }
 0x5e4   :  { %16241 = vmatmul.mubr.msk.f32.gmra.mrb[118].mxu0 %vm4620_vm1, %v15544_v4 }
 0x5e5   :  { %16245 = vmatprep.mubr.msk.f32.mxu0 %vm4620_vm1, %v4458_v6  ;;  %v15571_v63 = vpop.f32.mrb[184].mxu1 }
 0x5e6   :  { %v4538_v52 = vpop.f32.mrb[185].mxu1 }
 0x5e8   :  { %16246 = vmatmul.mubr.msk.f32.vlgmr.msra.gmra.mrb[104].mxu0 %vm4620_vm1, %v15547_v3 }
 0x5e9   :  { %16248 = vmatprep.mubr.msk.f32.mxu0 %vm4620_vm1, %v4468_v40  ;;  %16270 = vmatpush3.msra.mxu0 %v12450_v44  ;;  %v15574_v57 = vpop.f32.mrb[186].mxu1 }
 0x5ea   :  { %v4548_v25 = vpop.f32.mrb[187].mxu1 }
 0x5ec   :  { %16249 = vmatmul.mubr.msk.f32.gmra.mrb[106].mxu0 %vm4620_vm1, %v15550_v60 }
 0x5ed   :  { %16251 = vmatprep.mubr.msk.f32.mxu0 %vm4620_vm1, %v4478_v55  ;;  %v15577_v14 = vpop.f32.mrb[188].mxu1 }
 0x5ee   :  { %v4558_v49 = vpop.f32.mrb[189].mxu1 }
 0x5f0   :  { %16252 = vmatmul.mubr.msk.f32.gmra.mrb[108].mxu0 %vm4620_vm1, %v15553_v47 }
 0x5f1   :  { %16254 = vmatprep.mubr.msk.f32.mxu0 %vm4620_vm1, %v4488_v50  ;;  %v15580_v36 = vpop.f32.mrb[190].mxu1 }
 0x5f2   :  { %v4568_v5 = vpop.f32.mrb[191].mxu1 }
 0x5f4   :  { %16255 = vmatmul.mubr.msk.f32.gmra.mrb[110].mxu0 %vm4620_vm1, %v15556_v30 }
 0x5f5   :  { %16257 = vmatprep.mubr.msk.f32.mxu0 %vm4620_vm1, %v4498_v19  ;;  %v15583_v24 = vpop.f32.mrb[192].mxu1 }
 0x5f6   :  { %v4578_v2 = vpop.f32.mrb[193].mxu1 }
 0x5f8   :  { %16258 = vmatmul.mubr.msk.f32.gmra.mrb[112].mxu0 %vm4620_vm1, %v15559_v12 }
 0x5f9   :  { %16260 = vmatprep.mubr.msk.f32.mxu0 %vm4620_vm1, %v4508_v16  ;;  %v15586_v21 = vpop.f32.mrb[194].mxu1 }
 0x5fa   :  { %v4588_v48 = vpop.f32.mrb[195].mxu1 }
 0x5fc   :  { %16261 = vmatmul.mubr.msk.f32.gmra.mrb[114].mxu0 %vm4620_vm1, %v15562_v9 }
 0x5fd   :  { %16263 = vmatprep.mubr.msk.f32.mxu0 %vm4620_vm1, %v4518_v32  ;;  %v15589_v53 = vpop.f32.mrb[196].mxu1 }
 0x5fe   :  { %v4598_v39 = vpop.f32.mrb[197].mxu1 }
 0x600   :  { %16264 = vmatmul.mubr.msk.f32.gmra.mrb[116].mxu0 %vm4620_vm1, %v15565_v10 }
 0x601   :  { %16266 = vmatprep.mubr.msk.f32.mxu0 %vm4620_vm1, %v4528_v29  ;;  %v15592_v45 = vpop.f32.mrb[198].mxu1 }
 0x602   :  { %v4608_v18 = vpop.f32.mrb[199].mxu1 }
 0x604   :  { %16267 = vmatmul.mubr.msk.f32.gmra.mrb[118].mxu0 %vm4620_vm1, %v15568_v37 }
 0x605   :  { %16271 = vmatprep.mubr.msk.f32.mxu0 %vm4620_vm1, %v4538_v52 }
 0x608   :  { %16272 = vmatmul.mubr.msk.f32.vlgmr.msra.gmra.mrb[104].mxu0 %vm4620_vm1, %v15571_v63 }
 0x609   :  { %16274 = vmatprep.mubr.msk.f32.mxu0 %vm4620_vm1, %v4548_v25 }
 0x60c   :  { %16275 = vmatmul.mubr.msk.f32.gmra.mrb[106].mxu0 %vm4620_vm1, %v15574_v57 }
 0x60d   :  { %16277 = vmatprep.mubr.msk.f32.mxu0 %vm4620_vm1, %v4558_v49 }
 0x610   :  { %16278 = vmatmul.mubr.msk.f32.gmra.mrb[108].mxu0 %vm4620_vm1, %v15577_v14 }
 0x611   :  { %16280 = vmatprep.mubr.msk.f32.mxu0 %vm4620_vm1, %v4568_v5 }
 0x614   :  { %16281 = vmatmul.mubr.msk.f32.gmra.mrb[110].mxu0 %vm4620_vm1, %v15580_v36 }
 0x615   :  { %16283 = vmatprep.mubr.msk.f32.mxu0 %vm4620_vm1, %v4578_v2 }
 0x618   :  { %16284 = vmatmul.mubr.msk.f32.gmra.mrb[112].mxu0 %vm4620_vm1, %v15583_v24 }
 0x619   :  { %16286 = vmatprep.mubr.msk.f32.mxu0 %vm4620_vm1, %v4588_v48 }
 0x61c   :  { %16287 = vmatmul.mubr.msk.f32.gmra.mrb[114].mxu0 %vm4620_vm1, %v15586_v21 }
 0x61d   :  { %16289 = vmatprep.mubr.msk.f32.mxu0 %vm4620_vm1, %v4598_v39 }
 0x620   :  { %16290 = vmatmul.mubr.msk.f32.gmra.mrb[116].mxu0 %vm4620_vm1, %v15589_v53 }
 0x621   :  { %16292 = vmatprep.mubr.msk.f32.mxu0 %vm4620_vm1, %v4608_v18 }
 0x624   :  { %16293 = vmatmul.mubr.msk.f32.gmra.mrb[118].mxu0 %vm4620_vm1, %v15592_v45 }
 0x6db   :  { %v16273_v34 = vpop.f32.mrb[104].mxu0 }
 0x6dc   :  { %v10187_v17 = vpop.f32.mrb[105].mxu0  ;;  %v10290_v20 = vadd.f32 %v16273_v34, %v12467_v8 }
 0x6dd   :  { %v10289_v23 = vadd.f32 %v12467_v8, %v10187_v17 }
 0x6de   :  { %v10306_v28 = vmax.f32 %v10290_v20, 0.0 }
 0x6df   :  { %v16276_v31 = vpop.f32.mrb[106].mxu0  ;;  %v10305_v11 = vmax.f32 %v10289_v23, 0.0 }
 0x6e0   :  { %v10292_v15 = vadd.f32 %v16276_v31, %v12467_v8  ;;  %v10197_v62 = vpop.f32.mrb[107].mxu0 }
 0x6e1   :  { %v10291_v27 = vadd.f32 %v12467_v8, %v10197_v62 }
 0x6e2   :  { %v10308_v51 = vmax.f32 %v10292_v15, 0.0 }
 0x6e3   :  { %v10307_v56 = vmax.f32 %v10291_v27, 0.0  ;;  %v16279_v43 = vpop.f32.mrb[108].mxu0 }
 0x6e4   :  { %v10322_v13 = vmax.f32 %v10306_v28, %v10308_v51  ;;  %v10294_v61 = vadd.f32 %v16279_v43, %v12467_v8  ;;  %v10207_v1 = vpop.f32.mrb[109].mxu0 }
 0x6e5   :  { %v10321_v22 = vmax.f32 %v10305_v11, %v10307_v56  ;;  %v10293_v59 = vadd.f32 %v12467_v8, %v10207_v1 }
 0x6e6   :  { %v10310_v33 = vmax.f32 %v10294_v61, 0.0 }
 0x6e7   :  { %v10309_v0 = vmax.f32 %v10293_v59, 0.0  ;;  %v16282_v58 = vpop.f32.mrb[110].mxu0 }
 0x6e8   :  { %v10324_v54 = vmax.f32 %v10322_v13, %v10310_v33  ;;  %v10296_v38 = vadd.f32 %v16282_v58, %v12467_v8  ;;  %v10217_v7 = vpop.f32.mrb[111].mxu0 }
 0x6e9   :  { %v10323_v35 = vmax.f32 %v10321_v22, %v10309_v0  ;;  %v10295_v41 = vadd.f32 %v12467_v8, %v10217_v7 }
 0x6ea   :  { %v10312_v4 = vmax.f32 %v10296_v38, 0.0  ;;  %v12468_v38 = vld [vmem:[%s20610_s6] ss:$0 sm:$0xff] }
 0x6eb   :  { %v10311_v42 = vmax.f32 %v10295_v41, 0.0  ;;  %v16285_v3 = vpop.f32.mrb[112].mxu0  ;;  %v12469_v41 = vld [vmem:[%s20611_s7] ss:$0 sm:$0xff] }
 0x6ec   :  { %v10326_v6 = vmax.f32 %v10324_v54, %v10312_v4  ;;  %v10298_v44 = vadd.f32 %v16285_v3, %v12467_v8  ;;  %v10227_v60 = vpop.f32.mrb[113].mxu0 }
 0x6ed   :  { %v10325_v40 = vmax.f32 %v10323_v35, %v10311_v42  ;;  %v10297_v47 = vadd.f32 %v12467_v8, %v10227_v60  ;;  %v10378_v60 = vld [vmem:[%s20612_s8] sm:$0xff] }
 0x6ee   :  { %v10314_v55 = vmax.f32 %v10298_v44, 0.0 }
 0x6ef   :  { %v10313_v30 = vmax.f32 %v10297_v47, 0.0  ;;  %v16288_v50 = vpop.f32.mrb[114].mxu0  ;;  %v12473_v47 = vld [vmem:[%s20613_s9 + $0x8] sm:$0xff] }
 0x6f0   :  { %v10328_v12 = vmax.f32 %v10326_v6, %v10314_v55  ;;  %v10300_v19 = vadd.f32 %v16288_v50, %v12467_v8  ;;  %v10237_v9 = vpop.f32.mrb[115].mxu0  ;;  %v10453_v50 = vld [vmem:[%s20613_s9] sm:$0xff] }
 0x6f1   :  { %v10327_v16 = vmax.f32 %v10325_v40, %v10313_v30  ;;  %v10299_v10 = vadd.f32 %v12467_v8, %v10237_v9  ;;  %v12471_v40 = vld [vmem:[%s20612_s8 + $0x8] sm:$0xff]  ;;  %v12476_v9 = vld [vmem:[%s20612_s8 + $0x10] sm:$0xff] }
 0x6f2   :  { %v10316_v32 = vmax.f32 %v10300_v19, 0.0 }
 0x6f3   :  { %v10315_v37 = vmax.f32 %v10299_v10, 0.0  ;;  %v16291_v29 = vpop.f32.mrb[116].mxu0 }
 0x6f4   :  { %v10330_v63 = vmax.f32 %v10328_v12, %v10316_v32  ;;  %v10302_v52 = vadd.f32 %v16291_v29, %v12467_v8  ;;  %v10247_v57 = vpop.f32.mrb[117].mxu0 }
 0x6f5   :  { %v10329_v25 = vmax.f32 %v10327_v16, %v10315_v37  ;;  %v10301_v14 = vadd.f32 %v12467_v8, %v10247_v57  ;;  %v12478_v16 = vld [vmem:[%s20613_s9 + $0x10] sm:$0xff] }
 0x6f6   :  { %v10318_v49 = vmax.f32 %v10302_v52, 0.0 }
 0x6f7   :  { %v10317_v36 = vmax.f32 %v10301_v14, 0.0  ;;  %v16294_v5 = vpop.f32.mrb[118].mxu0  ;;  %v12482_v14 = vld [vmem:[%s20613_s9 + $0x18] sm:$0xff] }
 0x6f8   :  { %v10332_v24 = vmax.f32 %v10330_v63, %v10318_v49  ;;  %v10304_v2 = vadd.f32 %v16294_v5, %v12467_v8  ;;  %v10257_v21 = vpop.f32.mrb[119].mxu0 }
 0x6f9   :  { %v10331_v48 = vmax.f32 %v10329_v25, %v10317_v36  ;;  %v10303_v53 = vadd.f32 %v12467_v8, %v10257_v21  ;;  %v12480_v25 = vld [vmem:[%s20612_s8 + $0x18] sm:$0xff]  ;;  %v12484_v21 = vld [vmem:[%s20612_s8 + $0x20] sm:$0xff] }
 0x6fa   :  { %v10320_v39 = vmax.f32 %v10304_v2, 0.0 }
 0x6fb   :  { %v10319_v45 = vmax.f32 %v10303_v53, 0.0 }
 0x6fc   :  { %v10334_v18 = vmax.f32 %v10332_v24, %v10320_v39 }
 0x6fd   :  { %v10333_v34 = vmax.f32 %v10331_v48, %v10319_v45  ;;  %v12486_v48 = vld [vmem:[%s20613_s9 + $0x20] sm:$0xff] }
 0x6ff   :  { %v10335_v17 = vadd.f32 %v10334_v18, %v10333_v34 }
 0x701   :  { %v10336_v20 = vrot.slane %v10335_v17, 4 }
 0x703   :  { %v10337_v23 = vadd.f32 %v10336_v20, %v10335_v17  ;;  %v12488_v17 = vld [vmem:[%s20612_s8 + $0x28] sm:$0xff] }
 0x704   :  { %v12490_v20 = vld [vmem:[%s20613_s9 + $0x28] sm:$0xff] }
 0x705   :  { %v10338_v31 = vrot.slane %v10337_v23, 2 }
 0x707   :  { %v10339_v15 = vadd.f32 %v10338_v31, %v10337_v23 }
 0x709   :  { %v10340_v62 = vrot.slane %v10339_v15, 1 }
 0x70b   :  { %v10341_v27 = vadd.f32 %v10340_v62, %v10339_v15 }
 0x70d   :  { %v10343_v28 = vmul.f32 0.0625, %v10341_v27 }
 0x70f   :  { %v10344_v51 = vsub.f32 %v10333_v34, %v10343_v28  ;;  %v10345_v11 = vsub.f32 %v10334_v18, %v10343_v28  ;;  %v12492_v28 = vld [vmem:[%s20612_s8 + $0x30] sm:$0xff] }
 0x711   :  { %v10346_v56 = vmul.f32 %v10344_v51, %v10344_v51  ;;  %v10347_v43 = vmul.f32 %v10345_v11, %v10345_v11 }
 0x713   :  { %v10348_v13 = vadd.f32 %v10347_v43, %v10346_v56 }
 0x715   :  { %v10349_v61 = vrot.slane %v10348_v13, 4 }
 0x717   :  { %v10350_v1 = vadd.f32 %v10349_v61, %v10348_v13 }
 0x719   :  { %v10351_v8 = vrot.slane %v10350_v1, 2 }
 0x71b   :  { %v10352_v22 = vadd.f32 %v10351_v8, %v10350_v1  ;;  %v12496_v1 = vld [vmem:[%s20612_s8 + $0x38] sm:$0xff] }
 0x71c   :  { %v12498_v8 = vld [vmem:[%s20613_s9 + $0x38] sm:$0xff] }
 0x71d   :  { %v10353_v59 = vrot.slane %v10352_v22, 1 }
 0x71f   :  { %v10354_v33 = vadd.f32 %v10353_v59, %v10352_v22  ;;  %v11592_v22 = vld [vmem:[%s20614_s11] sm:$0xff]  ;;  %v11593_v59 = vld [vmem:[%s20614_s11 + $0x8] sm:$0xff] }
 0x721   :  { %v10355_v0 = vmul.f32 0.0625, %v10354_v33 }
 0x723   :  { %v10356_v58 = vadd.f32 1e-05, %v10355_v0 }
 0x725   :  { %17055 = vrsqrt.f32 %v10356_v58 }
 0x72f   :  { %v17056_v54 = vpop.eup %17055 }
 0x730   :  { %v10358_v7 = vmul.f32 %v17056_v54, %v10344_v51  ;;  %v10359_v35 = vmul.f32 %v17056_v54, %v10345_v11  ;;  %v12494_v51 = vld [vmem:[%s20613_s9 + $0x30] sm:$0xff]  ;;  %v16561_v54 = vpack.c.bf16 %v11593_v59, %v11592_v22  ;;  %v11782_v59 = vld [vmem:[%s20618_s16] sm:$0xff] }
 0x732   :  { %v10367_v4 = vmul.f32 %v12468_v38, %v10358_v7  ;;  %v10368_v42 = vmul.f32 %v12468_v38, %v10359_v35  ;;  %v11594_v38 = vld [vmem:[%s20614_s11 + $0x10] sm:$0xff]  ;;  %v11595_v7 = vld [vmem:[%s20614_s11 + $0x18] sm:$0xff] }
 0x734   :  { %v10376_v3 = vadd.f32 %v12469_v41, %v10367_v4  ;;  %v10377_v6 = vadd.f32 %v12469_v41, %v10368_v42  ;;  %v16564_v4 = vpack.c.bf16 %v11595_v7, %v11594_v38  ;;  %v11596_v42 = vld [vmem:[%s20614_s11 + $0x20] sm:$0xff]  ;;  %v11784_v7 = vld [vmem:[%s20618_s16 + $0x10] sm:$0xff] }
 0x736   :  { %v20293_v44 = vpack.c.bf16 %v10377_v6, %v10376_v3  ;;  %v11597_v3 = vld [vmem:[%s20614_s11 + $0x28] sm:$0xff] }
 0x737   :  { %v16567_v6 = vpack.c.bf16 %v11597_v3, %v11596_v42  ;;  %v11787_v42 = vld [vmem:[%s20618_s16 + $0x28] sm:$0xff] }
 0x738   :  { %16538 = vmatpush3.bf16.msra.mxu1 %v20293_v44 }
 0x739   :  { %16539 = vmatprep.subr.bf16.mxu1 %v17057_v26 }
 0x73b   :  { %16300 = vmatmul.mubr.msk.f32.vlgmr.msra.gmra.mrb[200].mxu1 %vm10379_vm3, %v10378_v60  ;;  %v11599_v60 = vld [vmem:[%s20614_s11 + $0x38] sm:$0xff] }
 0x73c   :  { %16541 = vmatpush3.bf16.msra.mxu1 %v20293_v44  ;;  %16306 = vmatprep.mubr.msk.f32.mxu1 %vm17058_vm2, %v17059_v46 }
 0x73d   :  { %16309 = vmatprep.subr.mxu1 %v17059_v46 }
 0x73f   :  { %16307 = vmatmul.mubr.msk.f32.vlgmr.msra.gmra.mrb[202].mxu1 %vm10379_vm3, %v12471_v40 }
 0x740   :  { %16311 = vmatprep.mubr.msk.f32.mxu1 %vm17058_vm2, %v17059_v46  ;;  %16310 = vmatpush3.msra.mxu1 %v12473_v47  ;;  %v11600_v47 = vld [vmem:[%s20614_s11 + $0x40] sm:$0xff] }
 0x741   :  { %16314 = vmatprep.subr.mxu1 %v17059_v46 }
 0x80e   :  { %v10449_v55 = vpop.f32.mrb[200].mxu1 }
 0x80f   :  { %v16301_v30 = vpop.f32.mrb[201].mxu1 }
 0x812   :  { %v10525_v12 = vpop.f32.mrb[202].mxu1 }
 0x813   :  { %16312 = vmatmul.mubr.msk.f32.vlgmr.msra.gmra.mrb[204].mxu1 %vm4620_vm1, %v10525_v12  ;;  %v16308_v19 = vpop.f32.mrb[203].mxu1  ;;  %v11603_v12 = vld [vmem:[%s20614_s11 + $0x58] sm:$0xff] }
 0x814   :  { %16315 = vmatpush3.msra.mxu1 %v10453_v50  ;;  %16316 = vmatprep.mubr.msk.f32.mxu1 %vm17058_vm2, %v17059_v46  ;;  %v11602_v50 = vld [vmem:[%s20614_s11 + $0x50] sm:$0xff] }
 0x815   :  { %16542 = vmatprep.subr.bf16.mxu1 %v17057_v26  ;;  %v16576_v19 = vpack.c.bf16 %v11603_v12, %v11602_v50  ;;  %v11794_v12 = vld [vmem:[%s20618_s16 + $0x60] sm:$0xff] }
 0x817   :  { %16317 = vmatmul.mubr.msk.f32.vlgmr.msra.gmra.mrb[206].mxu1 %vm4620_vm1, %v10449_v55  ;;  %v11601_v55 = vld [vmem:[%s20614_s11 + $0x48] sm:$0xff] }
 0x818   :  { %16544 = vmatpush3.bf16.msra.mxu1 %v20293_v44  ;;  %16323 = vmatprep.mubr.msk.f32.mxu1 %vm17058_vm2, %v17059_v46  ;;  %v16573_v30 = vpack.c.bf16 %v11601_v55, %v11600_v47  ;;  %v11792_v55 = vld [vmem:[%s20618_s16 + $0x50] sm:$0xff] }
 0x819   :  { %16326 = vmatprep.subr.mxu1 %v17059_v46 }
 0x81b   :  { %16324 = vmatmul.mubr.msk.f32.vlgmr.msra.gmra.mrb[208].mxu1 %vm10379_vm3, %v12476_v9  ;;  %v11604_v9 = vld [vmem:[%s20614_s11 + $0x60] sm:$0xff] }
 0x81c   :  { %16328 = vmatprep.mubr.msk.f32.mxu1 %vm17058_vm2, %v17059_v46  ;;  %16327 = vmatpush3.msra.mxu1 %v12478_v16  ;;  %v11605_v16 = vld [vmem:[%s20614_s11 + $0x68] sm:$0xff] }
 0x81d   :  { %16545 = vmatprep.subr.bf16.mxu1 %v17057_v26 }
 0x8e6   :  { %v10600_v10 = vpop.f32.mrb[204].mxu1 }
 0x8e7   :  { %v16313_v32 = vpop.f32.mrb[205].mxu1 }
 0x8e8   :  { %v11606_v32 = vld [vmem:[%s20614_s11 + $0x70] sm:$0xff] }
 0x8ea   :  { %v10673_v37 = vpop.f32.mrb[206].mxu1 }
 0x8eb   :  { %v10674_v29 = vadd.f32 %v10673_v37, %v10600_v10  ;;  %v16318_v63 = vpop.f32.mrb[207].mxu1  ;;  %v16579_v10 = vpack.c.bf16 %v11605_v16, %v11604_v9  ;;  %v11607_v37 = vld [vmem:[%s20614_s11 + $0x78] sm:$0xff]  ;;  %v11796_v16 = vld [vmem:[%s20618_s16 + $0x70] sm:$0xff] }
 0x8ee   :  { %v10748_v52 = vpop.f32.mrb[208].mxu1 }
 0x8ef   :  { %16329 = vmatmul.mubr.msk.f32.vlgmr.msra.gmra.mrb[210].mxu1 %vm4620_vm1, %v10748_v52  ;;  %v16325_v57 = vpop.f32.mrb[209].mxu1  ;;  %v12500_v52 = vld [vmem:[%s20615_s10] ss:$0 sm:$0xff] }
 0x8f0   :  { %16547 = vmatpush3.bf16.msra.mxu1 %v20293_v44  ;;  %16335 = vmatprep.mubr.msk.f32.mxu1 %vm17058_vm2, %v17059_v46 }
 0x8f1   :  { %16338 = vmatprep.subr.mxu1 %v17059_v46 }
 0x8f3   :  { %16336 = vmatmul.mubr.msk.f32.vlgmr.msra.gmra.mrb[212].mxu1 %vm10379_vm3, %v12480_v25  ;;  %v11688_v25 = vld [vmem:[%s20616_s14] sm:$0xff] }
 0x8f4   :  { %16340 = vmatprep.mubr.msk.f32.mxu1 %vm17058_vm2, %v17059_v46  ;;  %16339 = vmatpush3.msra.mxu1 %v12482_v14  ;;  %v11689_v14 = vld [vmem:[%s20616_s14 + $0x8] sm:$0xff] }
 0x8f5   :  { %16548 = vmatprep.subr.bf16.mxu1 %v17057_v26 }
 0x9c2   :  { %v10823_v49 = vpop.f32.mrb[210].mxu1 }
 0x9c3   :  { %v10827_v36 = vadd.f32 %v10823_v49, %v10674_v29  ;;  %v16330_v5 = vpop.f32.mrb[211].mxu1  ;;  %v16582_v29 = vpack.c.bf16 %v11607_v37, %v11606_v32  ;;  %v12502_v37 = vld [vmem:[%s20620_s15] ss:$0 sm:$0xff] }
 0x9c4   :  { %v16585_v5 = vpack.c.bf16 %v11689_v14, %v11688_v25 }
 0x9c6   :  { %v10899_v24 = vpop.f32.mrb[212].mxu1 }
 0x9c7   :  { %16341 = vmatmul.mubr.msk.f32.vlgmr.msra.gmra.mrb[214].mxu1 %vm4620_vm1, %v10899_v24  ;;  %v16337_v2 = vpop.f32.mrb[213].mxu1 }
 0x9c8   :  { %16550 = vmatpush3.bf16.msra.mxu1 %v20293_v44  ;;  %16347 = vmatprep.mubr.msk.f32.mxu1 %vm17058_vm2, %v17059_v46  ;;  %v11690_v2 = vld [vmem:[%s20616_s14 + $0x10] sm:$0xff] }
 0x9c9   :  { %16350 = vmatprep.subr.mxu1 %v17059_v46 }
 0x9cb   :  { %16348 = vmatmul.mubr.msk.f32.vlgmr.msra.gmra.mrb[216].mxu1 %vm10379_vm3, %v12484_v21  ;;  %v11691_v21 = vld [vmem:[%s20616_s14 + $0x18] sm:$0xff] }
 0x9cc   :  { %16352 = vmatprep.mubr.msk.f32.mxu1 %vm17058_vm2, %v17059_v46  ;;  %16351 = vmatpush3.msra.mxu1 %v12486_v48  ;;  %v16588_v48 = vpack.c.bf16 %v11691_v21, %v11690_v2 }
 0x9cd   :  { %16551 = vmatprep.subr.bf16.mxu1 %v17057_v26 }
 0xa9a   :  { %v10974_v53 = vpop.f32.mrb[214].mxu1 }
 0xa9b   :  { %v10978_v39 = vadd.f32 %v10974_v53, %v10827_v36  ;;  %v16342_v45 = vpop.f32.mrb[215].mxu1  ;;  %v11692_v53 = vld [vmem:[%s20616_s14 + $0x20] sm:$0xff] }
 0xa9e   :  { %v11050_v18 = vpop.f32.mrb[216].mxu1 }
 0xa9f   :  { %16353 = vmatmul.mubr.msk.f32.vlgmr.msra.gmra.mrb[218].mxu1 %vm4620_vm1, %v11050_v18  ;;  %v16349_v34 = vpop.f32.mrb[217].mxu1  ;;  %v11694_v18 = vld [vmem:[%s20616_s14 + $0x30] sm:$0xff] }
 0xaa0   :  { %16553 = vmatpush3.bf16.msra.mxu1 %v20293_v44  ;;  %16359 = vmatprep.mubr.msk.f32.mxu1 %vm17058_vm2, %v17059_v46  ;;  %v11695_v34 = vld [vmem:[%s20616_s14 + $0x38] sm:$0xff] }
 0xaa1   :  { %16362 = vmatprep.subr.mxu1 %v17059_v46 }
 0xaa3   :  { %16360 = vmatmul.mubr.msk.f32.vlgmr.msra.gmra.mrb[220].mxu1 %vm10379_vm3, %v12488_v17  ;;  %v16594_v17 = vpack.c.bf16 %v11695_v34, %v11694_v18 }
 0xaa4   :  { %16364 = vmatprep.mubr.msk.f32.mxu1 %vm17058_vm2, %v17059_v46  ;;  %16363 = vmatpush3.msra.mxu1 %v12490_v20  ;;  %v11696_v20 = vld [vmem:[%s20616_s14 + $0x40] sm:$0xff] }
 0xaa5   :  { %16554 = vmatprep.subr.bf16.mxu1 %v17057_v26 }
 0xb72   :  { %v11125_v23 = vpop.f32.mrb[218].mxu1 }
 0xb73   :  { %v11129_v31 = vadd.f32 %v11125_v23, %v10978_v39  ;;  %v16354_v15 = vpop.f32.mrb[219].mxu1  ;;  %v11693_v39 = vld [vmem:[%s20616_s14 + $0x28] sm:$0xff] }
 0xb74   :  { %v16591_v45 = vpack.c.bf16 %v11693_v39, %v11692_v53  ;;  %v11697_v23 = vld [vmem:[%s20616_s14 + $0x48] sm:$0xff]  ;;  %v11698_v15 = vld [vmem:[%s20616_s14 + $0x50] sm:$0xff] }
 0xb76   :  { %v11201_v62 = vpop.f32.mrb[220].mxu1 }
 0xb77   :  { %16365 = vmatmul.mubr.msk.f32.vlgmr.msra.gmra.mrb[222].mxu1 %vm4620_vm1, %v11201_v62  ;;  %v16361_v27 = vpop.f32.mrb[221].mxu1  ;;  %v11699_v62 = vld [vmem:[%s20616_s14 + $0x58] sm:$0xff] }
 0xb78   :  { %16556 = vmatpush3.bf16.msra.mxu1 %v20293_v44  ;;  %16371 = vmatprep.mubr.msk.f32.mxu1 %vm17058_vm2, %v17059_v46  ;;  %v16600_v27 = vpack.c.bf16 %v11699_v62, %v11698_v15 }
 0xb79   :  { %16374 = vmatprep.subr.mxu1 %v17059_v46 }
 0xb7b   :  { %16372 = vmatmul.mubr.msk.f32.vlgmr.msra.gmra.mrb[224].mxu1 %vm10379_vm3, %v12492_v28  ;;  %v11700_v28 = vld [vmem:[%s20616_s14 + $0x60] sm:$0xff] }
 0xb7c   :  { %16376 = vmatprep.mubr.msk.f32.mxu1 %vm17058_vm2, %v17059_v46  ;;  %16375 = vmatpush3.msra.mxu1 %v12494_v51  ;;  %v11701_v51 = vld [vmem:[%s20616_s14 + $0x68] sm:$0xff] }
 0xb7d   :  { %16557 = vmatprep.subr.bf16.mxu1 %v17057_v26 }
 0xc4a   :  { %v11276_v11 = vpop.f32.mrb[222].mxu1 }
 0xc4b   :  { %v11280_v56 = vadd.f32 %v11276_v11, %v11129_v31  ;;  %v16366_v43 = vpop.f32.mrb[223].mxu1  ;;  %v16597_v31 = vpack.c.bf16 %v11697_v23, %v11696_v20  ;;  %v16603_v11 = vpack.c.bf16 %v11701_v51, %v11700_v28 }
 0xc4c   :  { %v11703_v43 = vld [vmem:[%s20616_s14 + $0x78] sm:$0xff] }
 0xc4e   :  { %v11352_v13 = vpop.f32.mrb[224].mxu1 }
 0xc4f   :  { %16377 = vmatmul.mubr.msk.f32.vlgmr.msra.gmra.mrb[226].mxu1 %vm4620_vm1, %v11352_v13  ;;  %v16373_v61 = vpop.f32.mrb[225].mxu1 }
 0xc50   :  { %16559 = vmatpush3.bf16.msra.mxu1 %v20293_v44  ;;  %16383 = vmatprep.mubr.msk.f32.mxu1 %vm17058_vm2, %v17059_v46  ;;  %v11598_v44 = vld [vmem:[%s20614_s11 + $0x30] sm:$0xff]  ;;  %v12501_v61 = vld [vmem:[%s20617_s12] ss:$0 sm:$0xff] }
 0xc51   :  { %16386 = vmatprep.subr.mxu1 %v17059_v46  ;;  %v16570_v40 = vpack.c.bf16 %v11599_v60, %v11598_v44  ;;  %v11790_v60 = vld [vmem:[%s20618_s16 + $0x40] sm:$0xff] }
 0xc53   :  { %16384 = vmatmul.mubr.msk.f32.vlgmr.msra.gmra.mrb[228].mxu1 %vm10379_vm3, %v12496_v1 }
 0xc54   :  { %16388 = vmatprep.mubr.msk.f32.mxu1 %vm17058_vm2, %v17059_v46  ;;  %16387 = vmatpush3.msra.mxu1 %v12498_v8 }
 0xc55   :  { %16560 = vmatprep.subr.bf16.mxu1 %v17057_v26 }
 0xd22   :  { %v11427_v33 = vpop.f32.mrb[226].mxu1 }
 0xd23   :  { %v11431_v0 = vadd.f32 %v11427_v33, %v11280_v56  ;;  %v16378_v58 = vpop.f32.mrb[227].mxu1  ;;  %v11702_v56 = vld [vmem:[%s20616_s14 + $0x70] sm:$0xff]  ;;  %v11783_v33 = vld [vmem:[%s20618_s16 + $0x8] sm:$0xff] }
 0xd24   :  { %v16606_v13 = vpack.c.bf16 %v11703_v43, %v11702_v56 }
 0xd26   :  { %v11503_v35 = vpop.f32.mrb[228].mxu1 }
 0xd27   :  { %16389 = vmatmul.mubr.msk.f32.vlgmr.msra.gmra.mrb[230].mxu1 %vm4620_vm1, %v11503_v35  ;;  %v16385_v41 = vpop.f32.mrb[229].mxu1  ;;  %v11785_v35 = vld [vmem:[%s20618_s16 + $0x18] sm:$0xff] }
 0xd28   :  { %16562 = vmatpush3.bf16.msra.mxu1 %v16561_v54  ;;  %16423 = vmatprep.mubr.msk.f32.mxu1 %vm17058_vm2, %v17059_v46  ;;  %v16609_v54 = vpack.c.bf16 %v11783_v33, %v11782_v59  ;;  %v16612_v41 = vpack.c.bf16 %v11785_v35, %v11784_v7 }
 0xd29   :  { %16563 = vmatprep.subr.bf16.mxu1 %v17057_v26 }
 0xd2c   :  { %16565 = vmatpush3.bf16.msra.mxu1 %v16564_v4  ;;  %v11786_v4 = vld [vmem:[%s20618_s16 + $0x20] sm:$0xff] }
 0xd2d   :  { %16566 = vmatprep.subr.bf16.mxu1 %v17057_v26  ;;  %v16615_v3 = vpack.c.bf16 %v11787_v42, %v11786_v4 }
 0xd30   :  { %16568 = vmatpush3.bf16.msra.mxu1 %v16567_v6  ;;  %v11788_v6 = vld [vmem:[%s20618_s16 + $0x30] sm:$0xff] }
 0xd31   :  { %16569 = vmatprep.subr.bf16.mxu1 %v17057_v26 }
 0xd34   :  { %16571 = vmatpush3.bf16.msra.mxu1 %v16570_v40  ;;  %v11791_v40 = vld [vmem:[%s20618_s16 + $0x48] sm:$0xff] }
 0xd35   :  { %16572 = vmatprep.subr.bf16.mxu1 %v17057_v26  ;;  %v16621_v47 = vpack.c.bf16 %v11791_v40, %v11790_v60 }
 0xd38   :  { %16574 = vmatpush3.bf16.msra.mxu1 %v16573_v30  ;;  %v11793_v30 = vld [vmem:[%s20618_s16 + $0x58] sm:$0xff] }
 0xd39   :  { %16575 = vmatprep.subr.bf16.mxu1 %v17057_v26  ;;  %v16624_v50 = vpack.c.bf16 %v11793_v30, %v11792_v55 }
 0xd3c   :  { %16577 = vmatpush3.bf16.msra.mxu1 %v16576_v19  ;;  %v11795_v19 = vld [vmem:[%s20618_s16 + $0x68] sm:$0xff] }
 0xd3d   :  { %16578 = vmatprep.subr.bf16.mxu1 %v17057_v26  ;;  %v16627_v9 = vpack.c.bf16 %v11795_v19, %v11794_v12 }
 0xd40   :  { %16580 = vmatpush3.bf16.msra.mxu1 %v16579_v10  ;;  %v11797_v10 = vld [vmem:[%s20618_s16 + $0x78] sm:$0xff] }
 0xd41   :  { %16581 = vmatprep.subr.bf16.mxu1 %v17057_v26  ;;  %v16630_v32 = vpack.c.bf16 %v11797_v10, %v11796_v16 }
 0xd44   :  { %16583 = vmatpush3.bf16.msra.mxu1 %v16582_v29 }
 0xd45   :  { %16584 = vmatprep.subr.bf16.mxu1 %v17057_v26 }
 0xdfa   :  { %v11578_v63 = vpop.f32.mrb[230].mxu1 }
 0xdfb   :  { %v11582_v57 = vadd.f32 %v11578_v63, %v11431_v0  ;;  %v16390_v49 = vpop.f32.mrb[231].mxu1  ;;  %v11686_v0 = vld [vmem:[%s20619_s13] sm:$0xff] }
 0xdfd   :  { %v11590_v36 = vadd.f32 %v12500_v52, %v11582_v57 }
 0xdff   :  { %v11591_v24 = vmax.f32 %v11590_v36, 0.0 }
 0xe01   :  { %16424 = vmatmul.mubr.f32.vlgmr.msra.gmra.mrb[232].mxu1 %v11591_v24 }
 0xe02   :  { %16586 = vmatpush3.bf16.msra.mxu1 %v16585_v5  ;;  %16458 = vmatprep.mubr.msk.f32.mxu1 %vm17058_vm2, %v17059_v46 }
 0xe03   :  { %16587 = vmatprep.subr.bf16.mxu1 %v17057_v26 }
 0xe06   :  { %16589 = vmatpush3.bf16.msra.mxu1 %v16588_v48 }
 0xe07   :  { %16590 = vmatprep.subr.bf16.mxu1 %v17057_v26 }
 0xe0a   :  { %16592 = vmatpush3.bf16.msra.mxu1 %v16591_v45 }
 0xe0b   :  { %16593 = vmatprep.subr.bf16.mxu1 %v17057_v26 }
 0xe0e   :  { %16595 = vmatpush3.bf16.msra.mxu1 %v16594_v17 }
 0xe0f   :  { %16596 = vmatprep.subr.bf16.mxu1 %v17057_v26 }
 0xe12   :  { %16598 = vmatpush3.bf16.msra.mxu1 %v16597_v31 }
 0xe13   :  { %16599 = vmatprep.subr.bf16.mxu1 %v17057_v26 }
 0xe16   :  { %16601 = vmatpush3.bf16.msra.mxu1 %v16600_v27 }
 0xe17   :  { %16602 = vmatprep.subr.bf16.mxu1 %v17057_v26 }
 0xe1a   :  { %16604 = vmatpush3.bf16.msra.mxu1 %v16603_v11 }
 0xe1b   :  { %16605 = vmatprep.subr.bf16.mxu1 %v17057_v26 }
 0xe1e   :  { %16607 = vmatpush3.bf16.msra.mxu1 %v16606_v13 }
 0xe1f   :  { %16608 = vmatprep.subr.bf16.mxu1 %v17057_v26 }
 0xed4   :  { %v11681_v1 = vpop.f32.mrb[232].mxu1 }
 0xed5   :  { %v11682_v8 = vadd.f32 %v12501_v61, %v11681_v1  ;;  %v16425_v22 = vpop.f32.mrb[233].mxu1 }
 0xed7   :  { %v11685_v58 = vmax.f32 %v11682_v8, 0.0 }
 0xed9   :  { %v11687_v38 = vadd.f32 %v11686_v0, %v11685_v58 }
 0xedb   :  { %16459 = vmatmul.mubr.f32.vlgmr.msra.gmra.mrb[234].mxu1 %v11687_v38 }
 0xedc   :  { %16610 = vmatpush3.bf16.msra.mxu1 %v16609_v54  ;;  %16493 = vmatprep.mubr.msk.f32.mxu1 %vm17058_vm2, %v17059_v46  ;;  %v11789_v46 = vld [vmem:[%s20618_s16 + $0x38] sm:$0xff] }
 0xedd   :  { %16611 = vmatprep.subr.bf16.mxu1 %v17057_v26  ;;  %v16618_v44 = vpack.c.bf16 %v11789_v46, %v11788_v6 }
 0xee0   :  { %16613 = vmatpush3.bf16.msra.mxu1 %v16612_v41 }
 0xee1   :  { %16614 = vmatprep.subr.bf16.mxu1 %v17057_v26 }
 0xee4   :  { %16616 = vmatpush3.bf16.msra.mxu1 %v16615_v3 }
 0xee5   :  { %16617 = vmatprep.subr.bf16.mxu1 %v17057_v26 }
 0xee8   :  { %16619 = vmatpush3.bf16.msra.mxu1 %v16618_v44 }
 0xee9   :  { %16620 = vmatprep.subr.bf16.mxu1 %v17057_v26 }
 0xeec   :  { %16622 = vmatpush3.bf16.msra.mxu1 %v16621_v47 }
 0xeed   :  { %16623 = vmatprep.subr.bf16.mxu1 %v17057_v26 }
 0xef0   :  { %16625 = vmatpush3.bf16.msra.mxu1 %v16624_v50 }
 0xef1   :  { %16626 = vmatprep.subr.bf16.mxu1 %v17057_v26 }
 0xef4   :  { %16628 = vmatpush3.bf16.msra.mxu1 %v16627_v9 }
 0xef5   :  { %16629 = vmatprep.subr.bf16.mxu1 %v17057_v26  ;;  %v12503_v26 = vld [vmem:[%s20621_s17] ss:$0 sm:$0xff] }
 0xef8   :  { %16631 = vmatpush3.bf16.msra.mxu1 %v16630_v32 }
 0xfae   :  { %v11777_v29 = vpop.f32.mrb[234].mxu1 }
 0xfaf   :  { %v11778_v63 = vadd.f32 %v12502_v37, %v11777_v29  ;;  %v16460_v52 = vpop.f32.mrb[235].mxu1 }
 0xfb1   :  { %v11781_v57 = vmax.f32 %v11778_v63, 0.0 }
 0xfb3   :  { %16494 = vmatmul.mubr.f32.vlgmr.msra.gmra.mrb[236].mxu1 %v11781_v57 }
0x1086   :  { %v11871_v25 = vpop.f32.mrb[236].mxu1 }
0x1087   :  { %v11872_v14 = vadd.f32 %v12503_v26, %v11871_v25  ;;  %v16495_v49 = vpop.f32.mrb[237].mxu1 }
0x1089   :  { %11875 = vst [vmem:[%s20622_s18] sm:$0xff] %v11872_v14 }

</bundles_post_ra>
